<compile_context>
chip_gen: v6e
topology: v6e:2x2x1
jax: 0.10.0
libtpu: 0.0.40
codegen_flags: <defaults>
</compile_context>

<pallas_src>
import functools

import jax
import jax.numpy as jnp
from jax.experimental import pallas as pl
from jax.experimental.pallas import tpu as pltpu


# ----------------------------------------------------------------------------
# Pallas kernel: full GIN stack in one invocation + mean pooling at the end.
# ----------------------------------------------------------------------------
def gin_tower_kernel(h0_ref, adj_ref, eb_ref, w1_ref, b1_ref, w2_ref, b2_ref,
                     bn_scale_ref, bn_shift_ref, pool_ref,
                     pooled_ref, nodes_ref, *, num_layers):
    adj = adj_ref[...]                      # [N, N] f32 adjacency (w/ self loops)
    h = h0_ref[...]                         # [N, H] f32 node embeddings

    # Layer loop statically unrolled (num_layers is small and trace-time known).
    for l in range(num_layers):
        # GIN aggregation: neighbours (incl. self loop) + aggregated edge emb.
        agg = jnp.dot(adj, h, preferred_element_type=jnp.float32) + eb_ref[l]

        # MLP: Linear(H, 2H) -> ReLU -> Linear(2H, H)
        z = jnp.dot(agg, w1_ref[l], preferred_element_type=jnp.float32)
        z = jnp.maximum(z + b1_ref[pl.ds(l, 1), :], 0.0)
        hn = jnp.dot(z, w2_ref[l], preferred_element_type=jnp.float32)
        hn = hn + b2_ref[pl.ds(l, 1), :]

        # BatchNorm (eval mode): y = x * scale + shift  (kept unfolded, f32 VPU).
        hn = hn * bn_scale_ref[pl.ds(l, 1), :] + bn_shift_ref[pl.ds(l, 1), :]

        # Inter-layer ReLU on all but the last layer (dropout = identity).
        if l < num_layers - 1:
            hn = jnp.maximum(hn, 0.0)
        h = hn

    nodes_ref[...] = h                                          # JK='last'
    pooled_ref[...] = jnp.dot(pool_ref[...], h,
                              preferred_element_type=jnp.float32)   # mean pool


# ----------------------------------------------------------------------------
# Wrapper: everything resident in VMEM (single grid step), explicit VMEM limit.
# ----------------------------------------------------------------------------
def graph_tower_forward(h0, adj, edge_bias, w1, b1, w2, b2, bn_scale, bn_shift,
                        pool_mat):
    """Runs the GIN tower.

    h0        : [N, H]      initial node embeddings
    adj       : [N, N]      adjacency (with self loops)
    edge_bias : [L, N, H]   per-layer aggregated edge embeddings
    w1, b1    : [L, H, 2H], [L, 2H]
    w2, b2    : [L, 2H, H], [L, H]
    bn_scale  : [L, H]      gamma / sqrt(var + eps)
    bn_shift  : [L, H]      beta - mean * scale
    pool_mat  : [G, N]      mean-pool matrix
    returns (pooled [G, H], node_feats [N, H])
    """
    L, N, H = edge_bias.shape
    G = pool_mat.shape[0]
    H2 = w1.shape[-1]

    f32 = jnp.float32
    args = (h0.astype(f32), adj.astype(f32), edge_bias.astype(f32),
            w1.astype(f32), b1.astype(f32), w2.astype(f32), b2.astype(f32),
            bn_scale.astype(f32), bn_shift.astype(f32), pool_mat.astype(f32))

    # All operands resident in VMEM for the single kernel invocation.
    def vmem_spec():
        return pl.BlockSpec(memory_space=pltpu.MemorySpace.VMEM)

    # Explicit VMEM budget (inputs + outputs, f32), with headroom; the 64 MiB
    # cap keeps the same setting safe on v7x (128 MiB parts simply use less).
    est = 4 * (N * H                      # h0
               + N * N                    # adjacency
               + L * N * H                # edge bias
               + L * H * H2 + L * H2      # w1 / b1
               + L * H2 * H + L * H       # w2 / b2
               + 2 * L * H                # bn scale / shift
               + G * N                    # pool matrix
               + G * H + N * H)           # outputs
    vmem_limit = int(min(max(2 * est + (4 << 20), 16 << 20), 64 << 20))

    return pl.pallas_call(
        functools.partial(gin_tower_kernel, num_layers=L),
        out_shape=(jax.ShapeDtypeStruct((G, H), f32),
                   jax.ShapeDtypeStruct((N, H), f32)),
        in_specs=[vmem_spec() for _ in range(10)],
        out_specs=(vmem_spec(), vmem_spec()),
        compiler_params=pltpu.CompilerParams(vmem_limit_bytes=vmem_limit),
    )(*args)


# ----------------------------------------------------------------------------
# Pure-JAX f32 reference (same math, outside Pallas) for a sanity check.
# ----------------------------------------------------------------------------
def ref_forward(h0, adj, edge_bias, w1, b1, w2, b2, bn_scale, bn_shift,
                pool_mat):
    L = edge_bias.shape[0]
    h = h0
    for l in range(L):
        agg = adj @ h + edge_bias[l]
        z = jnp.maximum(agg @ w1[l] + b1[l], 0.0)
        hn = (z @ w2[l] + b2[l]) * bn_scale[l] + bn_shift[l]
        if l < L - 1:
            hn = jnp.maximum(hn, 0.0)
        h = hn
    return pool_mat @ h, h


if __name__ == "__main__":
    # GraphConfig-like hyper-parameters (small but MXU-friendly: N=256, H=128).
    num_layer = 3          # config.encoder_num_layer
    hidden = 128           # config.hidden_size (lane-aligned)
    num_atom_types = 16
    num_bond_types = 5     # 4 real bond types + 1 self-loop type
    G = 8                  # graphs in the batch
    nodes_per_graph = 32
    N = G * nodes_per_graph

    key = jax.random.PRNGKey(0)
    ks = jax.random.split(key, 12)

    # ----- synthetic graph batch ---------------------------------------------
    atom_type = jax.random.randint(ks[0], (N,), 0, num_atom_types)
    rnd = jax.random.uniform(ks[1], (N, N))
    rnd = jnp.minimum(rnd, rnd.T)                            # symmetric
    graph_id = jnp.arange(N) // nodes_per_graph
    same_graph = graph_id[:, None] == graph_id[None, :]
    adj = ((rnd < 0.12) & same_graph).astype(jnp.float32)
    adj = adj * (1.0 - jnp.eye(N)) + jnp.eye(N)              # force self loops
    bond_type = jax.random.randint(ks[2], (N, N), 0, 4)
    bond_type = jnp.where(jnp.eye(N, dtype=bool), 4, bond_type)  # self-loop type

    # ----- deterministic parameters ------------------------------------------
    atom_emb = jax.random.normal(ks[3], (num_atom_types, hidden)) * 0.3
    edge_emb = jax.random.normal(ks[4], (num_layer, num_bond_types, hidden)) * 0.1
    w1 = jax.random.normal(ks[5], (num_layer, hidden, 2 * hidden)) * 0.04
    b1 = jax.random.normal(ks[6], (num_layer, 2 * hidden)) * 0.01
    w2 = jax.random.normal(ks[7], (num_layer, 2 * hidden, hidden)) * 0.04
    b2 = jax.random.normal(ks[8], (num_layer, hidden)) * 0.01
    gamma = 1.0 + 0.1 * jax.random.normal(ks[9], (num_layer, hidden))
    beta = 0.1 * jax.random.normal(ks[10], (num_layer, hidden))
    run_mean = jnp.zeros((num_layer, hidden))
    run_var = jnp.ones((num_layer, hidden))
    bn_scale = (gamma * jax.lax.rsqrt(run_var + 1e-5)).astype(jnp.float32)
    bn_shift = (beta - run_mean * bn_scale).astype(jnp.float32)

    # ----- glue (outside the kernel): embedding lookups / edge bias / pooling -
    h0 = jnp.take(atom_emb, atom_type, axis=0).astype(jnp.float32)       # [N, H]
    # eb[l, i] = sum_j A[i,j] * edge_emb[l, bond_type(i,j)]  (via bond counts)
    bond_onehot = jax.nn.one_hot(bond_type, num_bond_types, dtype=jnp.float32)
    bond_cnt = jnp.einsum("ij,ijb->ib", adj, bond_onehot)                # [N, B]
    eb = jnp.einsum("ib,lbh->lih", bond_cnt, edge_emb).astype(jnp.float32)
    pool_mat = (jax.nn.one_hot(graph_id, G, dtype=jnp.float32).T
                / nodes_per_graph)                                       # [G, N]

    args = (h0, adj, eb,
            w1.astype(jnp.float32), b1.astype(jnp.float32),
            w2.astype(jnp.float32), b2.astype(jnp.float32),
            bn_scale, bn_shift, pool_mat)

    pooled, node_feats = jax.block_until_ready(
        jax.jit(graph_tower_forward)(*args))

    pooled_ref, node_ref = ref_forward(*args)
    assert pooled.shape == (G, hidden) and node_feats.shape == (N, hidden)
    assert jnp.allclose(pooled, pooled_ref, rtol=2e-2, atol=2e-2), \
        float(jnp.max(jnp.abs(pooled - pooled_ref)))
    assert jnp.allclose(node_feats, node_ref, rtol=2e-2, atol=2e-2), \
        float(jnp.max(jnp.abs(node_feats - node_ref)))

    print("KERNEL_OK")
</pallas_src>

<mosaic_0001>
module attributes {stable_mosaic.version = 11 : i64} {
  func.func @gin_tower_kernel(%arg0: memref<256x128xf32, #tpu.memory_space<vmem>>, %arg1: memref<256x256xf32, #tpu.memory_space<vmem>>, %arg2: memref<3x256x128xf32, #tpu.memory_space<vmem>>, %arg3: memref<3x128x256xf32, #tpu.memory_space<vmem>>, %arg4: memref<3x256xf32, #tpu.memory_space<vmem>>, %arg5: memref<3x256x128xf32, #tpu.memory_space<vmem>>, %arg6: memref<3x128xf32, #tpu.memory_space<vmem>>, %arg7: memref<3x128xf32, #tpu.memory_space<vmem>>, %arg8: memref<3x128xf32, #tpu.memory_space<vmem>>, %arg9: memref<8x256xf32, #tpu.memory_space<vmem>>, %arg10: memref<8x128xf32, #tpu.memory_space<vmem>>, %arg11: memref<256x128xf32, #tpu.memory_space<vmem>>) attributes {dimension_semantics = [], scalar_prefetch = 0 : i64, scratch_operands = 0 : i64, tpu.core_type = #tpu.core_type<tc>} {
    %c0 = arith.constant 0 : index
    %c0_0 = arith.constant 0 : index
    %0 = vector.load %arg1[%c0, %c0_0] : memref<256x256xf32, #tpu.memory_space<vmem>>, vector<256x256xf32>
    %c0_1 = arith.constant 0 : index
    %c0_2 = arith.constant 0 : index
    %1 = vector.load %arg0[%c0_1, %c0_2] : memref<256x128xf32, #tpu.memory_space<vmem>>, vector<256x128xf32>
    %cst = arith.constant dense<0.000000e+00> : vector<256x128xf32>
    %2 = tpu.matmul %0, %1, %cst {dimension_numbers = #tpu.dot_dimension_numbers<[1], [0], [0], [1], [0, 0, 1, 1], [], []>} : vector<256x256xf32>, vector<256x128xf32>, vector<256x128xf32> -> vector<256x128xf32>
    %c0_3 = arith.constant 0 : index
    %c0_4 = arith.constant 0 : index
    %c0_5 = arith.constant 0 : index
    %3 = vector.load %arg2[%c0_3, %c0_4, %c0_5] : memref<3x256x128xf32, #tpu.memory_space<vmem>>, vector<1x256x128xf32>
    %4 = vector.shape_cast %3 : vector<1x256x128xf32> to vector<256x128xf32>
    %5 = arith.addf %2, %4 : vector<256x128xf32>
    %c0_6 = arith.constant 0 : index
    %c0_7 = arith.constant 0 : index
    %c0_8 = arith.constant 0 : index
    %6 = vector.load %arg3[%c0_6, %c0_7, %c0_8] : memref<3x128x256xf32, #tpu.memory_space<vmem>>, vector<1x128x256xf32>
    %7 = vector.shape_cast %6 : vector<1x128x256xf32> to vector<128x256xf32>
    %cst_9 = arith.constant dense<0.000000e+00> : vector<256x256xf32>
    %8 = tpu.matmul %5, %7, %cst_9 {dimension_numbers = #tpu.dot_dimension_numbers<[1], [0], [0], [1], [0, 0, 1, 1], [], []>} : vector<256x128xf32>, vector<128x256xf32>, vector<256x256xf32> -> vector<256x256xf32>
    %c0_10 = arith.constant 0 : index
    %c0_11 = arith.constant 0 : index
    %9 = vector.load %arg4[%c0_10, %c0_11] : memref<3x256xf32, #tpu.memory_space<vmem>>, vector<1x256xf32>
    %10 = vector.broadcast %9 : vector<1x256xf32> to vector<256x256xf32>
    %11 = arith.addf %8, %10 : vector<256x256xf32>
    %cst_12 = arith.constant 0.000000e+00 : f32
    %12 = vector.broadcast %cst_12 : f32 to vector<256x256xf32>
    %13 = arith.maximumf %11, %12 : vector<256x256xf32>
    %c0_13 = arith.constant 0 : index
    %c0_14 = arith.constant 0 : index
    %c0_15 = arith.constant 0 : index
    %14 = vector.load %arg5[%c0_13, %c0_14, %c0_15] : memref<3x256x128xf32, #tpu.memory_space<vmem>>, vector<1x256x128xf32>
    %15 = vector.shape_cast %14 : vector<1x256x128xf32> to vector<256x128xf32>
    %cst_16 = arith.constant dense<0.000000e+00> : vector<256x128xf32>
    %16 = tpu.matmul %13, %15, %cst_16 {dimension_numbers = #tpu.dot_dimension_numbers<[1], [0], [0], [1], [0, 0, 1, 1], [], []>} : vector<256x256xf32>, vector<256x128xf32>, vector<256x128xf32> -> vector<256x128xf32>
    %c0_17 = arith.constant 0 : index
    %c0_18 = arith.constant 0 : index
    %17 = vector.load %arg6[%c0_17, %c0_18] : memref<3x128xf32, #tpu.memory_space<vmem>>, vector<1x128xf32>
    %18 = vector.broadcast %17 : vector<1x128xf32> to vector<256x128xf32>
    %19 = arith.addf %16, %18 : vector<256x128xf32>
    %c0_19 = arith.constant 0 : index
    %c0_20 = arith.constant 0 : index
    %20 = vector.load %arg7[%c0_19, %c0_20] : memref<3x128xf32, #tpu.memory_space<vmem>>, vector<1x128xf32>
    %21 = vector.broadcast %20 : vector<1x128xf32> to vector<256x128xf32>
    %22 = arith.mulf %19, %21 : vector<256x128xf32>
    %c0_21 = arith.constant 0 : index
    %c0_22 = arith.constant 0 : index
    %23 = vector.load %arg8[%c0_21, %c0_22] : memref<3x128xf32, #tpu.memory_space<vmem>>, vector<1x128xf32>
    %24 = vector.broadcast %23 : vector<1x128xf32> to vector<256x128xf32>
    %25 = arith.addf %22, %24 : vector<256x128xf32>
    %cst_23 = arith.constant 0.000000e+00 : f32
    %26 = vector.broadcast %cst_23 : f32 to vector<256x128xf32>
    %27 = arith.maximumf %25, %26 : vector<256x128xf32>
    %cst_24 = arith.constant dense<0.000000e+00> : vector<256x128xf32>
    %28 = tpu.matmul %0, %27, %cst_24 {dimension_numbers = #tpu.dot_dimension_numbers<[1], [0], [0], [1], [0, 0, 1, 1], [], []>} : vector<256x256xf32>, vector<256x128xf32>, vector<256x128xf32> -> vector<256x128xf32>
    %c1 = arith.constant 1 : index
    %c0_25 = arith.constant 0 : index
    %c0_26 = arith.constant 0 : index
    %29 = vector.load %arg2[%c1, %c0_25, %c0_26] : memref<3x256x128xf32, #tpu.memory_space<vmem>>, vector<1x256x128xf32>
    %30 = vector.shape_cast %29 : vector<1x256x128xf32> to vector<256x128xf32>
    %31 = arith.addf %28, %30 : vector<256x128xf32>
    %c1_27 = arith.constant 1 : index
    %c0_28 = arith.constant 0 : index
    %c0_29 = arith.constant 0 : index
    %32 = vector.load %arg3[%c1_27, %c0_28, %c0_29] : memref<3x128x256xf32, #tpu.memory_space<vmem>>, vector<1x128x256xf32>
    %33 = vector.shape_cast %32 : vector<1x128x256xf32> to vector<128x256xf32>
    %cst_30 = arith.constant dense<0.000000e+00> : vector<256x256xf32>
    %34 = tpu.matmul %31, %33, %cst_30 {dimension_numbers = #tpu.dot_dimension_numbers<[1], [0], [0], [1], [0, 0, 1, 1], [], []>} : vector<256x128xf32>, vector<128x256xf32>, vector<256x256xf32> -> vector<256x256xf32>
    %c1_31 = arith.constant 1 : index
    %c0_32 = arith.constant 0 : index
    %35 = vector.load %arg4[%c1_31, %c0_32] : memref<3x256xf32, #tpu.memory_space<vmem>>, vector<1x256xf32>
    %36 = vector.broadcast %35 : vector<1x256xf32> to vector<256x256xf32>
    %37 = arith.addf %34, %36 : vector<256x256xf32>
    %cst_33 = arith.constant 0.000000e+00 : f32
    %38 = vector.broadcast %cst_33 : f32 to vector<256x256xf32>
    %39 = arith.maximumf %37, %38 : vector<256x256xf32>
    %c1_34 = arith.constant 1 : index
    %c0_35 = arith.constant 0 : index
    %c0_36 = arith.constant 0 : index
    %40 = vector.load %arg5[%c1_34, %c0_35, %c0_36] : memref<3x256x128xf32, #tpu.memory_space<vmem>>, vector<1x256x128xf32>
    %41 = vector.shape_cast %40 : vector<1x256x128xf32> to vector<256x128xf32>
    %cst_37 = arith.constant dense<0.000000e+00> : vector<256x128xf32>
    %42 = tpu.matmul %39, %41, %cst_37 {dimension_numbers = #tpu.dot_dimension_numbers<[1], [0], [0], [1], [0, 0, 1, 1], [], []>} : vector<256x256xf32>, vector<256x128xf32>, vector<256x128xf32> -> vector<256x128xf32>
    %c1_38 = arith.constant 1 : index
    %c0_39 = arith.constant 0 : index
    %43 = vector.load %arg6[%c1_38, %c0_39] : memref<3x128xf32, #tpu.memory_space<vmem>>, vector<1x128xf32>
    %44 = vector.broadcast %43 : vector<1x128xf32> to vector<256x128xf32>
    %45 = arith.addf %42, %44 : vector<256x128xf32>
    %c1_40 = arith.constant 1 : index
    %c0_41 = arith.constant 0 : index
    %46 = vector.load %arg7[%c1_40, %c0_41] : memref<3x128xf32, #tpu.memory_space<vmem>>, vector<1x128xf32>
    %47 = vector.broadcast %46 : vector<1x128xf32> to vector<256x128xf32>
    %48 = arith.mulf %45, %47 : vector<256x128xf32>
    %c1_42 = arith.constant 1 : index
    %c0_43 = arith.constant 0 : index
    %49 = vector.load %arg8[%c1_42, %c0_43] : memref<3x128xf32, #tpu.memory_space<vmem>>, vector<1x128xf32>
    %50 = vector.broadcast %49 : vector<1x128xf32> to vector<256x128xf32>
    %51 = arith.addf %48, %50 : vector<256x128xf32>
    %cst_44 = arith.constant 0.000000e+00 : f32
    %52 = vector.broadcast %cst_44 : f32 to vector<256x128xf32>
    %53 = arith.maximumf %51, %52 : vector<256x128xf32>
    %cst_45 = arith.constant dense<0.000000e+00> : vector<256x128xf32>
    %54 = tpu.matmul %0, %53, %cst_45 {dimension_numbers = #tpu.dot_dimension_numbers<[1], [0], [0], [1], [0, 0, 1, 1], [], []>} : vector<256x256xf32>, vector<256x128xf32>, vector<256x128xf32> -> vector<256x128xf32>
    %c2 = arith.constant 2 : index
    %c0_46 = arith.constant 0 : index
    %c0_47 = arith.constant 0 : index
    %55 = vector.load %arg2[%c2, %c0_46, %c0_47] : memref<3x256x128xf32, #tpu.memory_space<vmem>>, vector<1x256x128xf32>
    %56 = vector.shape_cast %55 : vector<1x256x128xf32> to vector<256x128xf32>
    %57 = arith.addf %54, %56 : vector<256x128xf32>
    %c2_48 = arith.constant 2 : index
    %c0_49 = arith.constant 0 : index
    %c0_50 = arith.constant 0 : index
    %58 = vector.load %arg3[%c2_48, %c0_49, %c0_50] : memref<3x128x256xf32, #tpu.memory_space<vmem>>, vector<1x128x256xf32>
    %59 = vector.shape_cast %58 : vector<1x128x256xf32> to vector<128x256xf32>
    %cst_51 = arith.constant dense<0.000000e+00> : vector<256x256xf32>
    %60 = tpu.matmul %57, %59, %cst_51 {dimension_numbers = #tpu.dot_dimension_numbers<[1], [0], [0], [1], [0, 0, 1, 1], [], []>} : vector<256x128xf32>, vector<128x256xf32>, vector<256x256xf32> -> vector<256x256xf32>
    %c2_52 = arith.constant 2 : index
    %c0_53 = arith.constant 0 : index
    %61 = vector.load %arg4[%c2_52, %c0_53] : memref<3x256xf32, #tpu.memory_space<vmem>>, vector<1x256xf32>
    %62 = vector.broadcast %61 : vector<1x256xf32> to vector<256x256xf32>
    %63 = arith.addf %60, %62 : vector<256x256xf32>
    %cst_54 = arith.constant 0.000000e+00 : f32
    %64 = vector.broadcast %cst_54 : f32 to vector<256x256xf32>
    %65 = arith.maximumf %63, %64 : vector<256x256xf32>
    %c2_55 = arith.constant 2 : index
    %c0_56 = arith.constant 0 : index
    %c0_57 = arith.constant 0 : index
    %66 = vector.load %arg5[%c2_55, %c0_56, %c0_57] : memref<3x256x128xf32, #tpu.memory_space<vmem>>, vector<1x256x128xf32>
    %67 = vector.shape_cast %66 : vector<1x256x128xf32> to vector<256x128xf32>
    %cst_58 = arith.constant dense<0.000000e+00> : vector<256x128xf32>
    %68 = tpu.matmul %65, %67, %cst_58 {dimension_numbers = #tpu.dot_dimension_numbers<[1], [0], [0], [1], [0, 0, 1, 1], [], []>} : vector<256x256xf32>, vector<256x128xf32>, vector<256x128xf32> -> vector<256x128xf32>
    %c2_59 = arith.constant 2 : index
    %c0_60 = arith.constant 0 : index
    %69 = vector.load %arg6[%c2_59, %c0_60] : memref<3x128xf32, #tpu.memory_space<vmem>>, vector<1x128xf32>
    %70 = vector.broadcast %69 : vector<1x128xf32> to vector<256x128xf32>
    %71 = arith.addf %68, %70 : vector<256x128xf32>
    %c2_61 = arith.constant 2 : index
    %c0_62 = arith.constant 0 : index
    %72 = vector.load %arg7[%c2_61, %c0_62] : memref<3x128xf32, #tpu.memory_space<vmem>>, vector<1x128xf32>
    %73 = vector.broadcast %72 : vector<1x128xf32> to vector<256x128xf32>
    %74 = arith.mulf %71, %73 : vector<256x128xf32>
    %c2_63 = arith.constant 2 : index
    %c0_64 = arith.constant 0 : index
    %75 = vector.load %arg8[%c2_63, %c0_64] : memref<3x128xf32, #tpu.memory_space<vmem>>, vector<1x128xf32>
    %76 = vector.broadcast %75 : vector<1x128xf32> to vector<256x128xf32>
    %77 = arith.addf %74, %76 : vector<256x128xf32>
    %c0_65 = arith.constant 0 : index
    %c0_66 = arith.constant 0 : index
    %78 = vector.load %arg11[%c0_65, %c0_66] : memref<256x128xf32, #tpu.memory_space<vmem>>, vector<256x128xf32>
    tpu.vector_store %arg11[%c0_65, %c0_66], %77 {strides = array<i32>} : memref<256x128xf32, #tpu.memory_space<vmem>>, vector<256x128xf32>,
    %c0_67 = arith.constant 0 : index
    %c0_68 = arith.constant 0 : index
    %79 = vector.load %arg9[%c0_67, %c0_68] : memref<8x256xf32, #tpu.memory_space<vmem>>, vector<8x256xf32>
    %cst_69 = arith.constant dense<0.000000e+00> : vector<8x128xf32>
    %80 = tpu.matmul %79, %77, %cst_69 {dimension_numbers = #tpu.dot_dimension_numbers<[1], [0], [0], [1], [0, 0, 1, 1], [], []>} : vector<8x256xf32>, vector<256x128xf32>, vector<8x128xf32> -> vector<8x128xf32>
    %c0_70 = arith.constant 0 : index
    %c0_71 = arith.constant 0 : index
    %81 = vector.load %arg10[%c0_70, %c0_71] : memref<8x128xf32, #tpu.memory_space<vmem>>, vector<8x128xf32>
    tpu.vector_store %arg10[%c0_70, %c0_71], %80 {strides = array<i32>} : memref<8x128xf32, #tpu.memory_space<vmem>>, vector<8x128xf32>,
    return
  }
}

</mosaic_0001>

<bundles_post_ra>
// kernel: graph_tower_forward.1
= control target key start
LH: loop header
LB: loop body
LE: loop exit
PB: predicated region body
PF: predicated region fallthrough
CT: control target
= control target key end

     0   :  { %17 = vsyncpa [#allocation3], 0  ;;  %s5019_s0 = inlined_call_operand.hbm [shape: f32[256,128], index: 0, kind: input, shape index: {}]   ;;  %s5020_s1 = inlined_call_operand.hbm [shape: f32[256,256], index: 1, kind: input, shape index: {}]   ;;  %s5021_s2 = inlined_call_operand.hbm [shape: f32[3,256,128], index: 2, kind: input, shape index: {}]   ;;  %s5022_s3 = inlined_call_operand.hbm [shape: f32[3,128,256], index: 3, kind: input, shape index: {}]   ;;  %s5023_s4 = inlined_call_operand.hbm [shape: f32[3,256], index: 4, kind: input, shape index: {}]   ;;  %s5024_s5 = inlined_call_operand.hbm [shape: f32[3,256,128], index: 5, kind: input, shape index: {}]   ;;  %s5025_s6 = inlined_call_operand.hbm [shape: f32[3,128], index: 6, kind: input, shape index: {}]   ;;  %s5026_s7 = inlined_call_operand.hbm [shape: f32[3,128], index: 7, kind: input, shape index: {}]   ;;  %s5027_s8 = inlined_call_operand.hbm [shape: f32[3,128], index: 8, kind: input, shape index: {}]   ;;  %s5028_s9 = inlined_call_operand.vmem [shape: f32[8,256], index: 9, kind: input, shape index: {}]   ;;  %s5029_s10 = inlined_call_operand.hbm [shape: f32[8,128], index: 10, kind: output, shape index: {0}]   ;;  %s5030_s11 = inlined_call_operand.hbm [shape: f32[256,128], index: 11, kind: output, shape index: {1}]  }
   0x1   :  { %18 = vsyncpa [#allocation6], 0 }
   0x2   :  { %19 = vsyncpa [#allocation9], 0 }
   0x3   :  { %20 = vsyncpa [#allocation12], 0 }
   0x4   :  { %21 = vsyncpa [#allocation15], 0 }
   0x5   :  { %22 = vsyncpa [#allocation4], 0 }
   0x6   :  { %23 = vsyncpa [#allocation19], 0  ;;  %s3819_s17 = smov [#allocation5]  }
   0x7   :  { %s41_s18 = sshll.u32 %s3819_s17, 4  ;;  %s42_s18 = int_to_ptr.vmem [resolvable:$true] %s41_s18 }
   0x8   :  { %s3593_s19 = scalar_lea.vmem %s42_s18, 8192  ;;  %p3598_p1 = scmp.lt.s32.totalorder %s42_s18, %s42_s18 }
   0x9   :  { %p3594_p0 = scmp.ne.s32.totalorder %s42_s18, %s3593_s19  ;;  %p3599_p2 = scmp.lt.s32.totalorder %s3593_s19, %s3593_s19 }
   0xb   :  { %p3600_p3 = por %p3599_p2, %p3598_p1 }
   0xd   :  { %p3601_p4 = pnand %p3600_p3, %p3594_p0 }
   0xf   :  { %3604 = shalt.err (!%p3601_p4)
}
  0x10   :  { %s3820_s20 = smov 256   ;;  %s3821_s21 = smov 16  }
  0x11   :  { %47 = dma.hbm_to_vmem [thread:$0]  %s5020_s1, 8192, %s42_s18, [#allocation6], %s3820_s20, %s3820_s20, %s3821_s21  }
  0x12   :  { %s3822_s24 = smov [#allocation8]  }
  0x13   :  { %s65_s25 = sshll.u32 %s3822_s24, 4  ;;  %s66_s25 = int_to_ptr.vmem [resolvable:$true] %s65_s25 }
  0x14   :  { %s3613_s26 = scalar_lea.vmem %s66_s25, 12288  ;;  %p3618_p6 = scmp.lt.s32.totalorder %s66_s25, %s66_s25 }
  0x15   :  { %p3614_p5 = scmp.ne.s32.totalorder %s66_s25, %s3613_s26  ;;  %p3619_p7 = scmp.lt.s32.totalorder %s3613_s26, %s3613_s26 }
  0x17   :  { %p3620_p8 = por %p3619_p7, %p3618_p6 }
  0x19   :  { %p3621_p9 = pnand %p3620_p8, %p3614_p5 }
  0x1b   :  { %3624 = shalt.err (!%p3621_p9)
}
  0x1c   :  { %71 = dma.hbm_to_vmem [thread:$0]  %s5022_s3, 12288, %s66_s25, [#allocation9], %s3820_s20, %s3820_s20, %s3821_s21  }
  0x1d   :  { %s3823_s29 = smov [#allocation11]   ;;  %s3824_s12 = smov [#allocation14]  }
  0x1e   :  { %s87_s30 = sshll.u32 %s3823_s29, 4  ;;  %s110_s13 = sshll.u32 %s3824_s12, 4  ;;  %s88_s30 = int_to_ptr.vmem [resolvable:$true] %s87_s30  ;;  %s111_s13 = int_to_ptr.vmem [resolvable:$true] %s110_s13 }
  0x1f   :  { %s3633_s1 = scalar_lea.vmem %s88_s30, 12288  ;;  %p3638_p11 = scmp.lt.s32.totalorder %s88_s30, %s88_s30 }
  0x20   :  { %p3634_p10 = scmp.ne.s32.totalorder %s88_s30, %s3633_s1  ;;  %p3639_p12 = scmp.lt.s32.totalorder %s3633_s1, %s3633_s1 }
  0x22   :  { %p3640_p13 = por %p3639_p12, %p3638_p11 }
  0x24   :  { %p3641_p0 = pnand %p3640_p13, %p3634_p10 }
  0x26   :  { %3644 = shalt.err (!%p3641_p0)
}
  0x27   :  { %s3825_s14 = smov 128   ;;  %s3826_s15 = smov 8  }
  0x28   :  { %93 = dma.hbm_to_vmem [thread:$0]  %s5024_s5, 12288, %s88_s30, [#allocation12], %s3825_s14, %s3825_s14, %s3826_s15  }
  0x29   :  { %s3653_s17 = scalar_lea.vmem %s111_s13, 64  ;;  %p3658_p2 = scmp.lt.s32.totalorder %s111_s13, %s111_s13 }
  0x2a   :  { %p3654_p1 = scmp.ne.s32.totalorder %s111_s13, %s3653_s17  ;;  %p3659_p3 = scmp.lt.s32.totalorder %s3653_s17, %s3653_s17 }
  0x2c   :  { %p3660_p4 = por %p3659_p3, %p3658_p2 }
  0x2e   :  { %p3661_p5 = pnand %p3660_p4, %p3654_p1 }
  0x30   :  { %3664 = shalt.err (!%p3661_p5)
}
  0x31   :  { %113 = dma.hbm_to_vmem [thread:$0]  %s5026_s7, 64, %s111_s13, [#allocation15]  }
  0x32   :  { %s3827_s20 = smov [#allocation2]   ;;  %s3828_s22 = smov [#allocation7]  }
  0x33   :  { %s29_s21 = sshll.u32 %s3827_s20, 4  ;;  %s53_s23 = sshll.u32 %s3828_s22, 4  ;;  %s30_s21 = int_to_ptr.vmem [resolvable:$true] %s29_s21  ;;  %s54_s23 = int_to_ptr.vmem [resolvable:$true] %s53_s23 }
  0x34   :  { %s3673_s24 = scalar_lea.vmem %s30_s21, 4096  ;;  %p3678_p7 = scmp.lt.s32.totalorder %s30_s21, %s30_s21 }
  0x35   :  { %p3674_p6 = scmp.ne.s32.totalorder %s30_s21, %s3673_s24  ;;  %p3679_p8 = scmp.lt.s32.totalorder %s3673_s24, %s3673_s24 }
  0x37   :  { %p3680_p9 = por %p3679_p8, %p3678_p7 }
  0x39   :  { %p3681_p10 = pnand %p3680_p9, %p3674_p6 }
  0x3b   :  { %3684 = shalt.err (!%p3681_p10)
}
  0x3c   :  { %35 = dma.hbm_to_vmem [thread:$0]  %s5019_s0, 4096, %s30_s21, [#allocation3], %s3825_s14, %s3825_s14, %s3826_s15  }
  0x3d   :  { %s3693_s7 = scalar_lea.vmem %s54_s23, 12288  ;;  %p3698_p12 = scmp.lt.s32.totalorder %s54_s23, %s54_s23 }
  0x3e   :  { %p3694_p11 = scmp.ne.s32.totalorder %s54_s23, %s3693_s7  ;;  %p3699_p13 = scmp.lt.s32.totalorder %s3693_s7, %s3693_s7 }
  0x40   :  { %p3700_p0 = por %p3699_p13, %p3698_p12 }
  0x42   :  { %p3701_p1 = pnand %p3700_p0, %p3694_p11 }
  0x44   :  { %3704 = shalt.err (!%p3701_p1)
}
  0x45   :  { %59 = dma.hbm_to_vmem [thread:$0]  %s5021_s2, 12288, %s54_s23, [#allocation6], %s3825_s14, %s3825_s14, %s3826_s15  }
  0x46   :  { %s3829_s28 = smov [#allocation10]   ;;  %s3830_s30 = smov [#allocation13]  }
  0x47   :  { %s78_s29 = sshll.u32 %s3829_s28, 4  ;;  %s100_s12 = sshll.u32 %s3830_s30, 4  ;;  %s79_s29 = int_to_ptr.vmem [resolvable:$true] %s78_s29  ;;  %s101_s12 = int_to_ptr.vmem [resolvable:$true] %s100_s12 }
  0x48   :  { %s3713_s0 = scalar_lea.vmem %s79_s29, 128  ;;  %p3718_p3 = scmp.lt.s32.totalorder %s79_s29, %s79_s29 }
  0x49   :  { %p3714_p2 = scmp.ne.s32.totalorder %s79_s29, %s3713_s0  ;;  %p3719_p4 = scmp.lt.s32.totalorder %s3713_s0, %s3713_s0 }
  0x4b   :  { %p3720_p5 = por %p3719_p4, %p3718_p3 }
  0x4d   :  { %p3721_p6 = pnand %p3720_p5, %p3714_p2 }
  0x4f   :  { %3724 = shalt.err (!%p3721_p6)
}
  0x50   :  { %81 = dma.hbm_to_vmem [thread:$0]  %s5023_s4, 128, %s79_s29, [#allocation9]  }
  0x51   :  { %s3733_s16 = scalar_lea.vmem %s101_s12, 64  ;;  %p3738_p8 = scmp.lt.s32.totalorder %s101_s12, %s101_s12 }
  0x52   :  { %p3734_p7 = scmp.ne.s32.totalorder %s101_s12, %s3733_s16  ;;  %p3739_p9 = scmp.lt.s32.totalorder %s3733_s16, %s3733_s16 }
  0x54   :  { %p3740_p10 = por %p3739_p9, %p3738_p8 }
  0x56   :  { %p3741_p11 = pnand %p3740_p10, %p3734_p7 }
  0x58   :  { %3744 = shalt.err (!%p3741_p11)
}
  0x59   :  { %103 = dma.hbm_to_vmem [thread:$0]  %s5025_s6, 64, %s101_s12, [#allocation12]  }
  0x5a   :  { %s3831_s17 = smov [#allocation16]  }
  0x5b   :  { %s120_s18 = sshll.u32 %s3831_s17, 4  ;;  %s121_s18 = int_to_ptr.vmem [resolvable:$true] %s120_s18 }
  0x5c   :  { %s3753_s19 = scalar_lea.vmem %s121_s18, 64  ;;  %p3758_p13 = scmp.lt.s32.totalorder %s121_s18, %s121_s18 }
  0x5d   :  { %p3754_p12 = scmp.ne.s32.totalorder %s121_s18, %s3753_s19  ;;  %p3759_p0 = scmp.lt.s32.totalorder %s3753_s19, %s3753_s19 }
  0x5f   :  { %p3760_p1 = por %p3759_p0, %p3758_p13 }
  0x61   :  { %p3761_p2 = pnand %p3760_p1, %p3754_p12 }
  0x63   :  { %3764 = shalt.err (!%p3761_p2)
}
  0x64   :  { %123 = dma.hbm_to_vmem [thread:$0]  %s5027_s8, 64, %s121_s18, [#allocation15]  }
  0x65   :  { %3805 = dma.done.wait [#allocation3], 4096  }
  0x66   :  { %3806 = vsyncadd [#allocation3], 4294963200 }
  0x67   :  { %3807 = dma.done.wait [#allocation6], 20480  }
  0x68   :  { %3808 = vsyncadd [#allocation6], 4294946816 }
  0x69   :  { %3809 = dma.done.wait [#allocation9], 12416  }
  0x6a   :  { %3810 = vsyncadd [#allocation9], 4294954880 }
  0x6b   :  { %3811 = dma.done.wait [#allocation12], 12352  }
  0x6c   :  { %3812 = vsyncadd [#allocation12], 4294954944 }
  0x6d   :  { %3813 = dma.done.wait [#allocation15], 128  }
  0x6e   :  { %3814 = vsyncadd [#allocation15], 4294967168  ;;  %v3832_v0 = vmov 0.0   ;;  %v232_v1 = vld [vmem:[#allocation2 + $0x78] sm:$0xff]  ;;  %v231_v2 = vld [vmem:[#allocation2 + $0x70] sm:$0xff]  ;;  %s3833_s23 = smov [#allocation18]  }
  0x6f   :  { %281 = vmatprep.subr.mxu0 %v3832_v0  ;;  %614 = vmatprep.mubr.f32.mxu1 %v3832_v0  ;;  %v230_v3 = vld [vmem:[#allocation2 + $0x68] sm:$0xff]  ;;  %v229_v4 = vld [vmem:[#allocation2 + $0x60] sm:$0xff]  ;;  %v228_v5 = vld [vmem:[#allocation2 + $0x58] sm:$0xff]  ;;  %s3315_s24 = sshll.u32 %s3833_s23, 4  ;;  %s3316_s24 = int_to_ptr.vmem [resolvable:$true] %s3315_s24 }
  0x70   :  { %282 = vmatpush1.msra.mxu0 %v232_v1  ;;  %v227_v6 = vld [vmem:[#allocation2 + $0x50] sm:$0xff]  ;;  %v226_v7 = vld [vmem:[#allocation2 + $0x48] sm:$0xff]  ;;  %v225_v9 = vld [vmem:[#allocation2 + $0x40] sm:$0xff]  ;;  %s3765_s5 = scalar_lea.vmem %s3316_s24, 4096  ;;  %p3770_p4 = scmp.lt.s32.totalorder %s3316_s24, %s3316_s24 }
  0x71   :  { %283 = vmatprep.subr.mxu0 %v3832_v0  ;;  %v3938_v8 = vld [vmem:[#allocation5 + $0x8] sm:$0xff]  ;;  %v224_v10 = vld [vmem:[#allocation2 + $0x38] sm:$0xff]  ;;  %v223_v11 = vld [vmem:[#allocation2 + $0x30] sm:$0xff]  ;;  %p3766_p3 = scmp.ne.s32.totalorder %s3316_s24, %s3765_s5  ;;  %p3771_p5 = scmp.lt.s32.totalorder %s3765_s5, %s3765_s5 }
  0x72   :  { %284 = vmatpush1.msra.mxu0 %v231_v2  ;;  %345 = vmatprep.mubr.f32.mxu0 %v3938_v8  ;;  %v222_v12 = vld [vmem:[#allocation2 + $0x28] sm:$0xff]  ;;  %v221_v13 = vld [vmem:[#allocation2 + $0x20] sm:$0xff]  ;;  %v220_v14 = vld [vmem:[#allocation2 + $0x18] sm:$0xff] }
  0x73   :  { %285 = vmatprep.subr.mxu0 %v3832_v0  ;;  %v219_v15 = vld [vmem:[#allocation2 + $0x10] sm:$0xff]  ;;  %v218_v16 = vld [vmem:[#allocation2 + $0x8] sm:$0xff]  ;;  %v217_v17 = vld [vmem:[#allocation2] sm:$0xff]  ;;  %p3772_p6 = por %p3771_p5, %p3770_p4 }
  0x74   :  { %286 = vmatpush1.msra.mxu0 %v230_v3  ;;  %v248_v18 = vld [vmem:[#allocation2 + $0xf8] sm:$0xff]  ;;  %v247_v19 = vld [vmem:[#allocation2 + $0xf0] sm:$0xff]  ;;  %v246_v20 = vld [vmem:[#allocation2 + $0xe8] sm:$0xff] }
  0x75   :  { %287 = vmatprep.subr.mxu0 %v3832_v0  ;;  %v245_v21 = vld [vmem:[#allocation2 + $0xe0] sm:$0xff]  ;;  %v244_v22 = vld [vmem:[#allocation2 + $0xd8] sm:$0xff]  ;;  %v243_v23 = vld [vmem:[#allocation2 + $0xd0] sm:$0xff]  ;;  %p3773_p7 = pnand %p3772_p6, %p3766_p3 }
  0x76   :  { %288 = vmatpush1.msra.mxu0 %v229_v4  ;;  %v242_v24 = vld [vmem:[#allocation2 + $0xc8] sm:$0xff]  ;;  %v241_v25 = vld [vmem:[#allocation2 + $0xc0] sm:$0xff]  ;;  %v240_v26 = vld [vmem:[#allocation2 + $0xb8] sm:$0xff] }
  0x77   :  { %289 = vmatprep.subr.mxu0 %v3832_v0  ;;  %v239_v27 = vld [vmem:[#allocation2 + $0xb0] sm:$0xff]  ;;  %v238_v28 = vld [vmem:[#allocation2 + $0xa8] sm:$0xff]  ;;  %v237_v29 = vld [vmem:[#allocation2 + $0xa0] sm:$0xff] }
  0x78   :  { %290 = vmatpush1.msra.mxu0 %v228_v5  ;;  %v236_v30 = vld [vmem:[#allocation2 + $0x98] sm:$0xff]  ;;  %v235_v31 = vld [vmem:[#allocation2 + $0x90] sm:$0xff]  ;;  %v234_v32 = vld [vmem:[#allocation2 + $0x88] sm:$0xff] }
  0x79   :  { %291 = vmatprep.subr.mxu0 %v3832_v0  ;;  %v233_v33 = vld [vmem:[#allocation2 + $0x80] sm:$0xff]  ;;  %v537_v34 = vld [vmem:[#allocation8 + $0xf8] sm:$0xff]  ;;  %v536_v35 = vld [vmem:[#allocation8 + $0xf0] sm:$0xff] }
  0x7a   :  { %292 = vmatpush1.msra.mxu0 %v227_v6  ;;  %v535_v36 = vld [vmem:[#allocation8 + $0xe8] sm:$0xff]  ;;  %v153_v37 = vld [vmem:[#allocation5] sm:$0xff]  ;;  %550 = vmatprep.subr.mxu1 %v537_v34  ;;  %v156_v39 = vld [vmem:[#allocation5 + $0x18] sm:$0xff] }
  0x7b   :  { %293 = vmatprep.subr.mxu0 %v3832_v0  ;;  %v534_v38 = vld [vmem:[#allocation8 + $0xe0] sm:$0xff]  ;;  %551 = vmatpush1.msra.mxu1 %v536_v35  ;;  %v533_v40 = vld [vmem:[#allocation8 + $0xd8] sm:$0xff]  ;;  %v532_v41 = vld [vmem:[#allocation8 + $0xd0] sm:$0xff] }
  0x7c   :  { %294 = vmatpush1.msra.mxu0 %v226_v7  ;;  %552 = vmatprep.subr.mxu1 %v535_v36  ;;  %v531_v42 = vld [vmem:[#allocation8 + $0xc8] sm:$0xff]  ;;  %v155_v43 = vld [vmem:[#allocation5 + $0x10] sm:$0xff]  ;;  %v530_v44 = vld [vmem:[#allocation8 + $0xc0] sm:$0xff] }
  0x7d   :  { %295 = vmatprep.subr.mxu0 %v3832_v0  ;;  %553 = vmatpush1.msra.mxu1 %v534_v38  ;;  %v158_v45 = vld [vmem:[#allocation5 + $0x28] sm:$0xff]  ;;  %v529_v46 = vld [vmem:[#allocation8 + $0xb8] sm:$0xff]  ;;  %v528_v47 = vld [vmem:[#allocation8 + $0xb0] sm:$0xff] }
  0x7e   :  { %296 = vmatpush1.msra.mxu0 %v225_v9  ;;  %554 = vmatprep.subr.mxu1 %v533_v40  ;;  %v527_v48 = vld [vmem:[#allocation8 + $0xa8] sm:$0xff]  ;;  %v157_v49 = vld [vmem:[#allocation5 + $0x20] sm:$0xff]  ;;  %v160_v51 = vld [vmem:[#allocation5 + $0x38] sm:$0xff] }
  0x7f   :  { %297 = vmatprep.subr.mxu0 %v3832_v0  ;;  %555 = vmatpush1.msra.mxu1 %v532_v41  ;;  %v526_v50 = vld [vmem:[#allocation8 + $0xa0] sm:$0xff]  ;;  %v525_v52 = vld [vmem:[#allocation8 + $0x98] sm:$0xff]  ;;  %v524_v53 = vld [vmem:[#allocation8 + $0x90] sm:$0xff] }
  0x80   :  { %298 = vmatpush1.msra.mxu0 %v224_v10  ;;  %556 = vmatprep.subr.mxu1 %v531_v42  ;;  %v523_v54 = vld [vmem:[#allocation8 + $0x88] sm:$0xff]  ;;  %v159_v55 = vld [vmem:[#allocation5 + $0x30] sm:$0xff]  ;;  %v522_v56 = vld [vmem:[#allocation8 + $0x80] sm:$0xff] }
  0x81   :  { %299 = vmatprep.subr.mxu0 %v3832_v0  ;;  %557 = vmatpush1.msra.mxu1 %v530_v44  ;;  %v162_v57 = vld [vmem:[#allocation5 + $0x48] sm:$0xff]  ;;  %v521_v58 = vld [vmem:[#allocation8 + $0x78] sm:$0xff]  ;;  %v520_v59 = vld [vmem:[#allocation8 + $0x70] sm:$0xff] }
  0x82   :  { %300 = vmatpush1.msra.mxu0 %v223_v11  ;;  %558 = vmatprep.subr.mxu1 %v529_v46  ;;  %v519_v60 = vld [vmem:[#allocation8 + $0x68] sm:$0xff]  ;;  %v161_v61 = vld [vmem:[#allocation5 + $0x40] sm:$0xff]  ;;  %v164_v63 = vld [vmem:[#allocation5 + $0x58] sm:$0xff] }
  0x83   :  { %301 = vmatprep.subr.mxu0 %v3832_v0  ;;  %559 = vmatpush1.msra.mxu1 %v528_v47  ;;  %v518_v62 = vld [vmem:[#allocation8 + $0x60] sm:$0xff]  ;;  %v517_v1 = vld [vmem:[#allocation8 + $0x58] sm:$0xff]  ;;  %v516_v2 = vld [vmem:[#allocation8 + $0x50] sm:$0xff] }
  0x84   :  { %302 = vmatpush1.msra.mxu0 %v222_v12  ;;  %560 = vmatprep.subr.mxu1 %v527_v48  ;;  %v515_v3 = vld [vmem:[#allocation8 + $0x48] sm:$0xff]  ;;  %v163_v4 = vld [vmem:[#allocation5 + $0x50] sm:$0xff]  ;;  %v514_v5 = vld [vmem:[#allocation8 + $0x40] sm:$0xff] }
  0x85   :  { %303 = vmatprep.subr.mxu0 %v3832_v0  ;;  %561 = vmatpush1.msra.mxu1 %v526_v50  ;;  %v166_v6 = vld [vmem:[#allocation5 + $0x68] sm:$0xff]  ;;  %v513_v7 = vld [vmem:[#allocation8 + $0x38] sm:$0xff]  ;;  %v512_v9 = vld [vmem:[#allocation8 + $0x30] sm:$0xff] }
  0x86   :  { %304 = vmatpush1.msra.mxu0 %v221_v13  ;;  %562 = vmatprep.subr.mxu1 %v525_v52  ;;  %v511_v10 = vld [vmem:[#allocation8 + $0x28] sm:$0xff]  ;;  %v165_v11 = vld [vmem:[#allocation5 + $0x60] sm:$0xff]  ;;  %v168_v13 = vld [vmem:[#allocation5 + $0x78] sm:$0xff] }
  0x87   :  { %305 = vmatprep.subr.mxu0 %v3832_v0  ;;  %563 = vmatpush1.msra.mxu1 %v524_v53  ;;  %v510_v12 = vld [vmem:[#allocation8 + $0x20] sm:$0xff]  ;;  %v188_v34 = vld [vmem:[#allocation5 + $0x118] sm:$0xff]  ;;  %v508_v35 = vld [vmem:[#allocation8 + $0x10] sm:$0xff] }
  0x88   :  { %306 = vmatpush1.msra.mxu0 %v220_v14  ;;  %564 = vmatprep.subr.mxu1 %v523_v54  ;;  %v509_v14 = vld [vmem:[#allocation8 + $0x18] sm:$0xff]  ;;  %v507_v36 = vld [vmem:[#allocation8 + $0x8] sm:$0xff]  ;;  %v506_v38 = vld [vmem:[#allocation8] sm:$0xff] }
  0x89   :  { %307 = vmatprep.subr.mxu0 %v3832_v0  ;;  %565 = vmatpush1.msra.mxu1 %v522_v56  ;;  %v189_v40 = vld [vmem:[#allocation5 + $0x120] sm:$0xff]  ;;  %v192_v41 = vld [vmem:[#allocation5 + $0x138] sm:$0xff]  ;;  %v191_v42 = vld [vmem:[#allocation5 + $0x130] sm:$0xff] }
  0x8a   :  { %308 = vmatpush1.msra.mxu0 %v219_v15  ;;  %566 = vmatprep.subr.mxu1 %v521_v58  ;;  %v167_v15 = vld [vmem:[#allocation5 + $0x70] sm:$0xff]  ;;  %v193_v44 = vld [vmem:[#allocation5 + $0x140] sm:$0xff]  ;;  %v198_v47 = vld [vmem:[#allocation5 + $0x168] sm:$0xff] }
  0x8b   :  { %309 = vmatprep.subr.mxu0 %v3832_v0  ;;  %567 = vmatpush1.msra.mxu1 %v520_v59  ;;  %v195_v46 = vld [vmem:[#allocation5 + $0x150] sm:$0xff]  ;;  %v197_v48 = vld [vmem:[#allocation5 + $0x160] sm:$0xff]  ;;  %v204_v53 = vld [vmem:[#allocation5 + $0x198] sm:$0xff] }
  0x8c   :  { %310 = vmatpush1.msra.mxu0 %v218_v16  ;;  %568 = vmatprep.subr.mxu1 %v519_v60  ;;  %v170_v16 = vld [vmem:[#allocation5 + $0x88] sm:$0xff]  ;;  %v199_v50 = vld [vmem:[#allocation5 + $0x170] sm:$0xff]  ;;  %v201_v52 = vld [vmem:[#allocation5 + $0x180] sm:$0xff] }
  0x8d   :  { %311 = vmatprep.subr.mxu0 %v3832_v0  ;;  %569 = vmatpush1.msra.mxu1 %v518_v62  ;;  %v203_v54 = vld [vmem:[#allocation5 + $0x190] sm:$0xff]  ;;  %v205_v56 = vld [vmem:[#allocation5 + $0x1a0] sm:$0xff]  ;;  %v210_v59 = vld [vmem:[#allocation5 + $0x1c8] sm:$0xff] }
  0x8e   :  { %312 = vmatpush1.msra.mxu0 %v217_v17  ;;  %570 = vmatprep.subr.mxu1 %v517_v1  ;;  %v169_v17 = vld [vmem:[#allocation5 + $0x80] sm:$0xff]  ;;  %v207_v58 = vld [vmem:[#allocation5 + $0x1b0] sm:$0xff] }
  0x8f   :  { %313 = vmatprep.subr.mxu0 %v3832_v0  ;;  %571 = vmatpush1.msra.mxu1 %v516_v2  ;;  %v209_v60 = vld [vmem:[#allocation5 + $0x1c0] sm:$0xff]  ;;  %v211_v62 = vld [vmem:[#allocation5 + $0x1d0] sm:$0xff]  ;;  %v216_v2 = vld [vmem:[#allocation5 + $0x1f8] sm:$0xff] }
  0x90   :  { %314 = vmatpush2.msra.mxu0 %v248_v18  ;;  %572 = vmatprep.subr.mxu1 %v515_v3  ;;  %v172_v18 = vld [vmem:[#allocation5 + $0x98] sm:$0xff]  ;;  %v213_v1 = vld [vmem:[#allocation5 + $0x1e0] sm:$0xff]  ;;  %v215_v3 = vld [vmem:[#allocation5 + $0x1f0] sm:$0xff] }
  0x91   :  { %315 = vmatprep.subr.mxu0 %v3832_v0  ;;  %573 = vmatpush1.msra.mxu1 %v514_v5 }
  0x92   :  { %316 = vmatpush2.msra.mxu0 %v247_v19  ;;  %574 = vmatprep.subr.mxu1 %v513_v7  ;;  %v171_v19 = vld [vmem:[#allocation5 + $0x90] sm:$0xff]  ;;  %v886_v7 = vld [vmem:[#allocation11 + $0x78] sm:$0xff] }
  0x93   :  { %317 = vmatprep.subr.mxu0 %v3832_v0  ;;  %575 = vmatpush1.msra.mxu1 %v512_v9 }
  0x94   :  { %318 = vmatpush2.msra.mxu0 %v246_v20  ;;  %576 = vmatprep.subr.mxu1 %v511_v10  ;;  %v174_v20 = vld [vmem:[#allocation5 + $0xa8] sm:$0xff] }
  0x95   :  { %319 = vmatprep.subr.mxu0 %v3832_v0  ;;  %577 = vmatpush1.msra.mxu1 %v510_v12  ;;  %v250_v10 = vld [vmem:[#allocation7 + $0x8] sm:$0xff] }
  0x96   :  { %320 = vmatpush2.msra.mxu0 %v245_v21  ;;  %578 = vmatprep.subr.mxu1 %v509_v14  ;;  %v173_v21 = vld [vmem:[#allocation5 + $0xa0] sm:$0xff]  ;;  %v884_v14 = vld [vmem:[#allocation11 + $0x68] sm:$0xff] }
  0x97   :  { %321 = vmatprep.subr.mxu0 %v3832_v0  ;;  %579 = vmatpush1.msra.mxu1 %v508_v35 }
  0x98   :  { %322 = vmatpush2.msra.mxu0 %v244_v22  ;;  %v176_v22 = vld [vmem:[#allocation5 + $0xb8] sm:$0xff]  ;;  %580 = vmatprep.subr.mxu1 %v507_v36 }
  0x99   :  { %323 = vmatprep.subr.mxu0 %v3832_v0  ;;  %581 = vmatpush1.msra.mxu1 %v506_v38 }
  0x9a   :  { %324 = vmatpush2.msra.mxu0 %v243_v23  ;;  %v175_v23 = vld [vmem:[#allocation5 + $0xb0] sm:$0xff]  ;;  %908 = vmatprep.subr.mxu1 %v3832_v0 }
  0x9b   :  { %325 = vmatprep.subr.mxu0 %v3832_v0 }
  0x9c   :  { %326 = vmatpush2.msra.mxu0 %v242_v24  ;;  %v178_v24 = vld [vmem:[#allocation5 + $0xc8] sm:$0xff] }
  0x9d   :  { %327 = vmatprep.subr.mxu0 %v3832_v0 }
  0x9e   :  { %328 = vmatpush2.msra.mxu0 %v241_v25  ;;  %v177_v25 = vld [vmem:[#allocation5 + $0xc0] sm:$0xff] }
  0x9f   :  { %329 = vmatprep.subr.mxu0 %v3832_v0 }
  0xa0   :  { %330 = vmatpush2.msra.mxu0 %v240_v26  ;;  %v180_v26 = vld [vmem:[#allocation5 + $0xd8] sm:$0xff] }
  0xa1   :  { %331 = vmatprep.subr.mxu0 %v3832_v0 }
  0xa2   :  { %332 = vmatpush2.msra.mxu0 %v239_v27  ;;  %v179_v27 = vld [vmem:[#allocation5 + $0xd0] sm:$0xff] }
  0xa3   :  { %333 = vmatprep.subr.mxu0 %v3832_v0 }
  0xa4   :  { %334 = vmatpush2.msra.mxu0 %v238_v28  ;;  %v182_v28 = vld [vmem:[#allocation5 + $0xe8] sm:$0xff] }
  0xa5   :  { %335 = vmatprep.subr.mxu0 %v3832_v0 }
  0xa6   :  { %336 = vmatpush2.msra.mxu0 %v237_v29  ;;  %v181_v29 = vld [vmem:[#allocation5 + $0xe0] sm:$0xff] }
  0xa7   :  { %337 = vmatprep.subr.mxu0 %v3832_v0 }
  0xa8   :  { %338 = vmatpush2.msra.mxu0 %v236_v30  ;;  %v184_v30 = vld [vmem:[#allocation5 + $0xf8] sm:$0xff] }
  0xa9   :  { %339 = vmatprep.subr.mxu0 %v3832_v0 }
  0xaa   :  { %340 = vmatpush2.msra.mxu0 %v235_v31  ;;  %v183_v31 = vld [vmem:[#allocation5 + $0xf0] sm:$0xff] }
  0xab   :  { %341 = vmatprep.subr.mxu0 %v3832_v0 }
  0xac   :  { %342 = vmatpush2.msra.mxu0 %v234_v32  ;;  %v186_v32 = vld [vmem:[#allocation5 + $0x108] sm:$0xff] }
  0xad   :  { %343 = vmatprep.subr.mxu0 %v3832_v0 }
  0xae   :  { %344 = vmatpush2.msra.mxu0 %v233_v33  ;;  %v185_v33 = vld [vmem:[#allocation5 + $0x100] sm:$0xff] }
  0xaf   :  { %346 = vmatmul.mubr.f32.vlgmr.msra.gmra.mxu0 %v153_v37  ;;  %1272 = vmatprep.subr.mxu0 %v3832_v0  ;;  %v187_v37 = vld [vmem:[#allocation5 + $0x110] sm:$0xff] }
  0xb0   :  { %350 = vmatprep.mubr.f32.mxu0 %v156_v39  ;;  %v190_v39 = vld [vmem:[#allocation5 + $0x128] sm:$0xff] }
  0xb3   :  { %351 = vmatmul.mubr.f32.gmra.mxu0 %v155_v43  ;;  %v194_v43 = vld [vmem:[#allocation5 + $0x148] sm:$0xff] }
  0xb4   :  { %355 = vmatprep.mubr.f32.mxu0 %v158_v45  ;;  %v196_v45 = vld [vmem:[#allocation5 + $0x158] sm:$0xff] }
  0xb7   :  { %356 = vmatmul.mubr.f32.gmra.mxu0 %v157_v49  ;;  %v200_v49 = vld [vmem:[#allocation5 + $0x178] sm:$0xff] }
  0xb8   :  { %360 = vmatprep.mubr.f32.mxu0 %v160_v51  ;;  %v202_v51 = vld [vmem:[#allocation5 + $0x188] sm:$0xff] }
  0xbb   :  { %361 = vmatmul.mubr.f32.gmra.mxu0 %v159_v55  ;;  %v206_v55 = vld [vmem:[#allocation5 + $0x1a8] sm:$0xff] }
  0xbc   :  { %365 = vmatprep.mubr.f32.mxu0 %v162_v57  ;;  %v208_v57 = vld [vmem:[#allocation5 + $0x1b8] sm:$0xff] }
  0xbf   :  { %366 = vmatmul.mubr.f32.gmra.mxu0 %v161_v61  ;;  %v212_v61 = vld [vmem:[#allocation5 + $0x1d8] sm:$0xff] }
  0xc0   :  { %370 = vmatprep.mubr.f32.mxu0 %v164_v63  ;;  %v214_v63 = vld [vmem:[#allocation5 + $0x1e8] sm:$0xff] }
  0xc3   :  { %371 = vmatmul.mubr.f32.gmra.mxu0 %v163_v4  ;;  %v249_v4 = vld [vmem:[#allocation7] sm:$0xff] }
  0xc4   :  { %375 = vmatprep.mubr.f32.mxu0 %v166_v6 }
  0xc7   :  { %376 = vmatmul.mubr.f32.gmra.mxu0 %v165_v11  ;;  %v885_v11 = vld [vmem:[#allocation11 + $0x70] sm:$0xff] }
  0xc8   :  { %380 = vmatprep.mubr.f32.mxu0 %v168_v13 }
  0xcb   :  { %381 = vmatmul.mubr.f32.gmra.mxu0 %v167_v15 }
  0xcc   :  { %385 = vmatprep.mubr.f32.mxu0 %v170_v16  ;;  %v251_v16 = vld [vmem:[#allocation7 + $0x10] sm:$0xff] }
  0xcf   :  { %386 = vmatmul.mubr.f32.gmra.mxu0 %v169_v17 }
  0xd0   :  { %390 = vmatprep.mubr.f32.mxu0 %v172_v18 }
  0xd3   :  { %391 = vmatmul.mubr.f32.gmra.mxu0 %v171_v19  ;;  %v882_v19 = vld [vmem:[#allocation11 + $0x58] sm:$0xff] }
  0xd4   :  { %395 = vmatprep.mubr.f32.mxu0 %v174_v20 }
  0xd7   :  { %396 = vmatmul.mubr.f32.gmra.mxu0 %v173_v21  ;;  %v252_v21 = vld [vmem:[#allocation7 + $0x18] sm:$0xff] }
  0xd8   :  { %400 = vmatprep.mubr.f32.mxu0 %v176_v22  ;;  %v881_v22 = vld [vmem:[#allocation11 + $0x50] sm:$0xff] }
  0xdb   :  { %401 = vmatmul.mubr.f32.gmra.mxu0 %v175_v23 }
  0xdc   :  { %405 = vmatprep.mubr.f32.mxu0 %v178_v24 }
  0xdf   :  { %406 = vmatmul.mubr.f32.gmra.mxu0 %v177_v25  ;;  %v880_v25 = vld [vmem:[#allocation11 + $0x48] sm:$0xff] }
  0xe0   :  { %410 = vmatprep.mubr.f32.mxu0 %v180_v26 }
  0xe3   :  { %411 = vmatmul.mubr.f32.gmra.mxu0 %v179_v27  ;;  %v253_v27 = vld [vmem:[#allocation7 + $0x20] sm:$0xff] }
  0xe4   :  { %415 = vmatprep.mubr.f32.mxu0 %v182_v28  ;;  %v879_v28 = vld [vmem:[#allocation11 + $0x40] sm:$0xff] }
  0xe7   :  { %416 = vmatmul.mubr.f32.gmra.mxu0 %v181_v29 }
  0xe8   :  { %420 = vmatprep.mubr.f32.mxu0 %v184_v30 }
  0xeb   :  { %421 = vmatmul.mubr.f32.gmra.mxu0 %v183_v31  ;;  %v878_v31 = vld [vmem:[#allocation11 + $0x38] sm:$0xff] }
  0xec   :  { %425 = vmatprep.mubr.f32.mxu0 %v186_v32 }
  0xef   :  { %426 = vmatmul.mubr.f32.gmra.mxu0 %v185_v33  ;;  %v254_v33 = vld [vmem:[#allocation7 + $0x28] sm:$0xff] }
  0xf0   :  { %430 = vmatprep.mubr.f32.mxu0 %v188_v34  ;;  %v877_v34 = vld [vmem:[#allocation11 + $0x30] sm:$0xff] }
  0xf3   :  { %431 = vmatmul.mubr.f32.gmra.mxu0 %v187_v37  ;;  %v876_v37 = vld [vmem:[#allocation11 + $0x28] sm:$0xff] }
  0xf4   :  { %435 = vmatprep.mubr.f32.mxu0 %v190_v39  ;;  %v255_v39 = vld [vmem:[#allocation7 + $0x30] sm:$0xff] }
  0xf7   :  { %436 = vmatmul.mubr.f32.gmra.mxu0 %v189_v40  ;;  %v875_v40 = vld [vmem:[#allocation11 + $0x20] sm:$0xff] }
  0xf8   :  { %440 = vmatprep.mubr.f32.mxu0 %v192_v41 }
  0xfb   :  { %441 = vmatmul.mubr.f32.gmra.mxu0 %v191_v42 }
  0xfc   :  { %445 = vmatprep.mubr.f32.mxu0 %v194_v43  ;;  %v874_v43 = vld [vmem:[#allocation11 + $0x18] sm:$0xff] }
  0xff   :  { %446 = vmatmul.mubr.f32.gmra.mxu0 %v193_v44 }
 0x100   :  { %450 = vmatprep.mubr.f32.mxu0 %v196_v45  ;;  %v256_v45 = vld [vmem:[#allocation7 + $0x38] sm:$0xff] }
 0x103   :  { %451 = vmatmul.mubr.f32.gmra.mxu0 %v195_v46  ;;  %v873_v46 = vld [vmem:[#allocation11 + $0x10] sm:$0xff] }
 0x104   :  { %455 = vmatprep.mubr.f32.mxu0 %v198_v47 }
 0x107   :  { %456 = vmatmul.mubr.f32.gmra.mxu0 %v197_v48 }
 0x108   :  { %460 = vmatprep.mubr.f32.mxu0 %v200_v49  ;;  %v872_v49 = vld [vmem:[#allocation11 + $0x8] sm:$0xff] }
 0x10b   :  { %461 = vmatmul.mubr.f32.gmra.mxu0 %v199_v50 }
 0x10c   :  { %465 = vmatprep.mubr.f32.mxu0 %v202_v51  ;;  %v257_v51 = vld [vmem:[#allocation7 + $0x40] sm:$0xff] }
 0x10f   :  { %466 = vmatmul.mubr.f32.gmra.mxu0 %v201_v52  ;;  %v871_v52 = vld [vmem:[#allocation11] sm:$0xff] }
 0x110   :  { %470 = vmatprep.mubr.f32.mxu0 %v204_v53 }
 0x113   :  { %471 = vmatmul.mubr.f32.gmra.mxu0 %v203_v54 }
 0x114   :  { %475 = vmatprep.mubr.f32.mxu0 %v206_v55  ;;  %v902_v55 = vld [vmem:[#allocation11 + $0xf8] sm:$0xff] }
 0x117   :  { %476 = vmatmul.mubr.f32.gmra.mxu0 %v205_v56 }
 0x118   :  { %480 = vmatprep.mubr.f32.mxu0 %v208_v57  ;;  %v258_v57 = vld [vmem:[#allocation7 + $0x48] sm:$0xff] }
 0x11b   :  { %481 = vmatmul.mubr.f32.gmra.mxu0 %v207_v58  ;;  %v901_v58 = vld [vmem:[#allocation11 + $0xf0] sm:$0xff] }
 0x11c   :  { %485 = vmatprep.mubr.f32.mxu0 %v210_v59 }
 0x11f   :  { %486 = vmatmul.mubr.f32.gmra.mxu0 %v209_v60 }
 0x120   :  { %490 = vmatprep.mubr.f32.mxu0 %v212_v61  ;;  %v900_v61 = vld [vmem:[#allocation11 + $0xe8] sm:$0xff] }
 0x123   :  { %491 = vmatmul.mubr.f32.gmra.mxu0 %v211_v62 }
 0x124   :  { %495 = vmatprep.mubr.f32.mxu0 %v214_v63  ;;  %v259_v63 = vld [vmem:[#allocation7 + $0x50] sm:$0xff] }
 0x127   :  { %496 = vmatmul.mubr.f32.gmra.mxu0 %v213_v1  ;;  %v899_v1 = vld [vmem:[#allocation11 + $0xe0] sm:$0xff] }
 0x128   :  { %500 = vmatprep.mubr.f32.mxu0 %v216_v2 }
 0x12b   :  { %501 = vmatmul.mubr.f32.gmra.mxu0 %v215_v3 }
 0x12c   :  { %1336 = vmatprep.mubr.f32.mxu0 %v3938_v8  ;;  %v883_v8 = vld [vmem:[#allocation11 + $0x60] sm:$0xff] }
 0x16f   :  { %v347_v5 = vpop.f32.mrf.mxu0 }
 0x170   :  { %v348_v6 = vadd.f32 %v347_v5, %v249_v4  ;;  %v898_v4 = vld [vmem:[#allocation11 + $0xd8] sm:$0xff] }
 0x171   :  { %v349_v9 = vpop.f32.mrf.mxu0 }
 0x172   :  { %615 = vmatmul.mubr.f32.vlgmr.msra.gmra.mxu1 %v348_v6  ;;  %v260_v6 = vld [vmem:[#allocation7 + $0x58] sm:$0xff] }
 0x173   :  { %v352_v12 = vpop.f32.mrf.mxu0  ;;  %620 = vmatprep.mubr.f32.mxu1 %v3832_v0  ;;  %909 = vmatpush1.msra.mxu1 %v886_v7  ;;  %v897_v7 = vld [vmem:[#allocation11 + $0xd0] sm:$0xff] }
 0x174   :  { %v353_v13 = vadd.f32 %v352_v12, %v250_v10  ;;  %910 = vmatprep.subr.mxu1 %v3832_v0 }
 0x175   :  { %v354_v15 = vpop.f32.mrf.mxu0  ;;  %911 = vmatpush1.msra.mxu1 %v885_v11  ;;  %v896_v11 = vld [vmem:[#allocation11 + $0xc8] sm:$0xff] }
 0x176   :  { %621 = vmatmul.mubr.f32.gmra.mxu1 %v353_v13  ;;  %912 = vmatprep.subr.mxu1 %v3832_v0  ;;  %v261_v13 = vld [vmem:[#allocation7 + $0x60] sm:$0xff] }
 0x177   :  { %v357_v17 = vpop.f32.mrf.mxu0  ;;  %626 = vmatprep.mubr.f32.mxu1 %v3832_v0  ;;  %913 = vmatpush1.msra.mxu1 %v884_v14  ;;  %v895_v14 = vld [vmem:[#allocation11 + $0xc0] sm:$0xff] }
 0x178   :  { %v358_v18 = vadd.f32 %v357_v17, %v251_v16  ;;  %914 = vmatprep.subr.mxu1 %v3832_v0 }
 0x179   :  { %v359_v20 = vpop.f32.mrf.mxu0  ;;  %915 = vmatpush1.msra.mxu1 %v883_v8  ;;  %v894_v8 = vld [vmem:[#allocation11 + $0xb8] sm:$0xff] }
 0x17a   :  { %627 = vmatmul.mubr.f32.gmra.mxu1 %v358_v18  ;;  %916 = vmatprep.subr.mxu1 %v3832_v0  ;;  %v262_v18 = vld [vmem:[#allocation7 + $0x68] sm:$0xff] }
 0x17b   :  { %v362_v23 = vpop.f32.mrf.mxu0  ;;  %632 = vmatprep.mubr.f32.mxu1 %v3832_v0  ;;  %917 = vmatpush1.msra.mxu1 %v882_v19  ;;  %v893_v19 = vld [vmem:[#allocation11 + $0xb0] sm:$0xff] }
 0x17c   :  { %v363_v24 = vadd.f32 %v362_v23, %v252_v21  ;;  %918 = vmatprep.subr.mxu1 %v3832_v0 }
 0x17d   :  { %v364_v26 = vpop.f32.mrf.mxu0  ;;  %919 = vmatpush1.msra.mxu1 %v881_v22  ;;  %v892_v22 = vld [vmem:[#allocation11 + $0xa8] sm:$0xff] }
 0x17e   :  { %633 = vmatmul.mubr.f32.gmra.mxu1 %v363_v24  ;;  %920 = vmatprep.subr.mxu1 %v3832_v0  ;;  %v263_v24 = vld [vmem:[#allocation7 + $0x70] sm:$0xff] }
 0x17f   :  { %v367_v29 = vpop.f32.mrf.mxu0  ;;  %638 = vmatprep.mubr.f32.mxu1 %v3832_v0  ;;  %921 = vmatpush1.msra.mxu1 %v880_v25  ;;  %v891_v25 = vld [vmem:[#allocation11 + $0xa0] sm:$0xff] }
 0x180   :  { %v368_v30 = vadd.f32 %v367_v29, %v253_v27  ;;  %922 = vmatprep.subr.mxu1 %v3832_v0  ;;  %v264_v29 = vld [vmem:[#allocation7 + $0x78] sm:$0xff] }
 0x181   :  { %v369_v32 = vpop.f32.mrf.mxu0  ;;  %923 = vmatpush1.msra.mxu1 %v879_v28 }
 0x182   :  { %639 = vmatmul.mubr.f32.gmra.mxu1 %v368_v30  ;;  %924 = vmatprep.subr.mxu1 %v3832_v0 }
 0x183   :  { %v372_v35 = vpop.f32.mrf.mxu0  ;;  %644 = vmatprep.mubr.f32.mxu1 %v3832_v0  ;;  %925 = vmatpush1.msra.mxu1 %v878_v31 }
 0x184   :  { %v373_v36 = vadd.f32 %v372_v35, %v254_v33  ;;  %926 = vmatprep.subr.mxu1 %v3832_v0  ;;  %v265_v33 = vld [vmem:[#allocation7 + $0x80] sm:$0xff] }
 0x185   :  { %v374_v38 = vpop.f32.mrf.mxu0  ;;  %927 = vmatpush1.msra.mxu1 %v877_v34 }
 0x186   :  { %645 = vmatmul.mubr.f32.gmra.mxu1 %v373_v36  ;;  %928 = vmatprep.subr.mxu1 %v3832_v0  ;;  %v890_v38 = vld [vmem:[#allocation11 + $0x98] sm:$0xff] }
 0x187   :  { %v377_v41 = vpop.f32.mrf.mxu0  ;;  %650 = vmatprep.mubr.f32.mxu1 %v3832_v0  ;;  %929 = vmatpush1.msra.mxu1 %v876_v37  ;;  %v266_v37 = vld [vmem:[#allocation7 + $0x88] sm:$0xff] }
 0x188   :  { %v378_v42 = vadd.f32 %v377_v41, %v255_v39  ;;  %930 = vmatprep.subr.mxu1 %v3832_v0  ;;  %v889_v41 = vld [vmem:[#allocation11 + $0x90] sm:$0xff] }
 0x189   :  { %v379_v44 = vpop.f32.mrf.mxu0  ;;  %931 = vmatpush1.msra.mxu1 %v875_v40 }
 0x18a   :  { %651 = vmatmul.mubr.f32.gmra.mxu1 %v378_v42  ;;  %932 = vmatprep.subr.mxu1 %v3832_v0  ;;  %v888_v44 = vld [vmem:[#allocation11 + $0x88] sm:$0xff] }
 0x18b   :  { %v382_v47 = vpop.f32.mrf.mxu0  ;;  %656 = vmatprep.mubr.f32.mxu1 %v3832_v0  ;;  %933 = vmatpush1.msra.mxu1 %v874_v43  ;;  %v267_v43 = vld [vmem:[#allocation7 + $0x90] sm:$0xff] }
 0x18c   :  { %v383_v48 = vadd.f32 %v382_v47, %v256_v45  ;;  %934 = vmatprep.subr.mxu1 %v3832_v0  ;;  %v887_v47 = vld [vmem:[#allocation11 + $0x80] sm:$0xff] }
 0x18d   :  { %v384_v50 = vpop.f32.mrf.mxu0  ;;  %935 = vmatpush1.msra.mxu1 %v873_v46 }
 0x18e   :  { %657 = vmatmul.mubr.f32.gmra.mxu1 %v383_v48  ;;  %936 = vmatprep.subr.mxu1 %v3832_v0 }
 0x18f   :  { %v387_v53 = vpop.f32.mrf.mxu0  ;;  %662 = vmatprep.mubr.f32.mxu1 %v3832_v0  ;;  %937 = vmatpush1.msra.mxu1 %v872_v49  ;;  %v268_v49 = vld [vmem:[#allocation7 + $0x98] sm:$0xff] }
 0x190   :  { %v388_v54 = vadd.f32 %v387_v53, %v257_v51  ;;  %938 = vmatprep.subr.mxu1 %v3832_v0  ;;  %v269_v53 = vld [vmem:[#allocation7 + $0xa0] sm:$0xff] }
 0x191   :  { %v389_v56 = vpop.f32.mrf.mxu0  ;;  %939 = vmatpush1.msra.mxu1 %v871_v52 }
 0x192   :  { %663 = vmatmul.mubr.f32.gmra.mxu1 %v388_v54  ;;  %940 = vmatprep.subr.mxu1 %v3832_v0 }
 0x193   :  { %v392_v59 = vpop.f32.mrf.mxu0  ;;  %668 = vmatprep.mubr.f32.mxu1 %v3832_v0  ;;  %941 = vmatpush2.msra.mxu1 %v902_v55 }
 0x194   :  { %v393_v60 = vadd.f32 %v392_v59, %v258_v57  ;;  %942 = vmatprep.subr.mxu1 %v3832_v0  ;;  %v270_v57 = vld [vmem:[#allocation7 + $0xa8] sm:$0xff] }
 0x195   :  { %v394_v62 = vpop.f32.mrf.mxu0  ;;  %943 = vmatpush2.msra.mxu1 %v901_v58 }
 0x196   :  { %669 = vmatmul.mubr.f32.gmra.mxu1 %v393_v60  ;;  %944 = vmatprep.subr.mxu1 %v3832_v0 }
 0x197   :  { %v397_v2 = vpop.f32.mrf.mxu0  ;;  %674 = vmatprep.mubr.f32.mxu1 %v3832_v0  ;;  %945 = vmatpush2.msra.mxu1 %v900_v61  ;;  %v271_v61 = vld [vmem:[#allocation7 + $0xb0] sm:$0xff] }
 0x198   :  { %v398_v3 = vadd.f32 %v397_v2, %v259_v63  ;;  %946 = vmatprep.subr.mxu1 %v3832_v0  ;;  %v272_v2 = vld [vmem:[#allocation7 + $0xb8] sm:$0xff] }
 0x199   :  { %v399_v5 = vpop.f32.mrf.mxu0  ;;  %947 = vmatpush2.msra.mxu1 %v899_v1 }
 0x19a   :  { %675 = vmatmul.mubr.f32.gmra.mxu1 %v398_v3  ;;  %948 = vmatprep.subr.mxu1 %v3832_v0 }
 0x19b   :  { %v402_v9 = vpop.f32.mrf.mxu0  ;;  %680 = vmatprep.mubr.f32.mxu1 %v3832_v0  ;;  %949 = vmatpush2.msra.mxu1 %v898_v4 }
 0x19c   :  { %v403_v10 = vadd.f32 %v402_v9, %v260_v6  ;;  %950 = vmatprep.subr.mxu1 %v3832_v0  ;;  %v273_v6 = vld [vmem:[#allocation7 + $0xc0] sm:$0xff] }
 0x19d   :  { %v404_v12 = vpop.f32.mrf.mxu0  ;;  %951 = vmatpush2.msra.mxu1 %v897_v7 }
 0x19e   :  { %681 = vmatmul.mubr.f32.gmra.mxu1 %v403_v10  ;;  %952 = vmatprep.subr.mxu1 %v3832_v0 }
 0x19f   :  { %v407_v15 = vpop.f32.mrf.mxu0  ;;  %686 = vmatprep.mubr.f32.mxu1 %v3832_v0  ;;  %953 = vmatpush2.msra.mxu1 %v896_v11  ;;  %v274_v11 = vld [vmem:[#allocation7 + $0xc8] sm:$0xff] }
 0x1a0   :  { %v408_v16 = vadd.f32 %v407_v15, %v261_v13  ;;  %954 = vmatprep.subr.mxu1 %v3832_v0  ;;  %v275_v15 = vld [vmem:[#allocation7 + $0xd0] sm:$0xff] }
 0x1a1   :  { %v409_v17 = vpop.f32.mrf.mxu0  ;;  %955 = vmatpush2.msra.mxu1 %v895_v14 }
 0x1a2   :  { %687 = vmatmul.mubr.f32.gmra.mxu1 %v408_v16  ;;  %956 = vmatprep.subr.mxu1 %v3832_v0 }
 0x1a3   :  { %v412_v20 = vpop.f32.mrf.mxu0  ;;  %692 = vmatprep.mubr.f32.mxu1 %v3832_v0  ;;  %957 = vmatpush2.msra.mxu1 %v894_v8 }
 0x1a4   :  { %v413_v21 = vadd.f32 %v412_v20, %v262_v18  ;;  %958 = vmatprep.subr.mxu1 %v3832_v0  ;;  %v276_v18 = vld [vmem:[#allocation7 + $0xd8] sm:$0xff] }
 0x1a5   :  { %v414_v23 = vpop.f32.mrf.mxu0  ;;  %959 = vmatpush2.msra.mxu1 %v893_v19 }
 0x1a6   :  { %693 = vmatmul.mubr.f32.gmra.mxu1 %v413_v21  ;;  %960 = vmatprep.subr.mxu1 %v3832_v0 }
 0x1a7   :  { %v417_v26 = vpop.f32.mrf.mxu0  ;;  %698 = vmatprep.mubr.f32.mxu1 %v3832_v0  ;;  %961 = vmatpush2.msra.mxu1 %v892_v22  ;;  %v277_v22 = vld [vmem:[#allocation7 + $0xe0] sm:$0xff] }
 0x1a8   :  { %v418_v27 = vadd.f32 %v417_v26, %v263_v24  ;;  %962 = vmatprep.subr.mxu1 %v3832_v0  ;;  %v278_v26 = vld [vmem:[#allocation7 + $0xe8] sm:$0xff] }
 0x1a9   :  { %v419_v28 = vpop.f32.mrf.mxu0  ;;  %963 = vmatpush2.msra.mxu1 %v891_v25 }
 0x1aa   :  { %699 = vmatmul.mubr.f32.gmra.mxu1 %v418_v27  ;;  %964 = vmatprep.subr.mxu1 %v3832_v0 }
 0x1ab   :  { %v422_v30 = vpop.f32.mrf.mxu0  ;;  %704 = vmatprep.mubr.f32.mxu1 %v3832_v0  ;;  %965 = vmatpush2.msra.mxu1 %v890_v38  ;;  %v540_v38 = vlaneseq }
 0x1ac   :  { %v423_v31 = vadd.f32 %v422_v30, %v264_v29  ;;  %966 = vmatprep.subr.mxu1 %v3832_v0  ;;  %v279_v30 = vld [vmem:[#allocation7 + $0xf0] sm:$0xff] }
 0x1ad   :  { %v424_v32 = vpop.f32.mrf.mxu0  ;;  %967 = vmatpush2.msra.mxu1 %v889_v41  ;;  %v538_v41 = vld [vmem:[#allocation10] ss:$4 sm:$0x3] }
 0x1ae   :  { %705 = vmatmul.mubr.f32.gmra.mxu1 %v423_v31  ;;  %968 = vmatprep.subr.mxu1 %v3832_v0 }
 0x1af   :  { %v427_v34 = vpop.f32.mrf.mxu0  ;;  %710 = vmatprep.mubr.f32.mxu1 %v3832_v0  ;;  %969 = vmatpush2.msra.mxu1 %v888_v44 }
 0x1b0   :  { %v428_v35 = vadd.f32 %v427_v34, %v265_v33  ;;  %970 = vmatprep.subr.mxu1 %v3832_v0  ;;  %v280_v34 = vld [vmem:[#allocation7 + $0xf8] sm:$0xff] }
 0x1b1   :  { %v429_v36 = vpop.f32.mrf.mxu0  ;;  %971 = vmatpush2.msra.mxu1 %v887_v47 }
 0x1b2   :  { %711 = vmatmul.mubr.f32.gmra.mxu1 %v428_v35 }
 0x1b3   :  { %v432_v39 = vpop.f32.mrf.mxu0  ;;  %716 = vmatprep.mubr.f32.mxu1 %v3832_v0 }
 0x1b4   :  { %v433_v40 = vadd.f32 %v432_v39, %v266_v37  ;;  %v541_v39 = vshrl.u32 %v540_v38, 7 }
 0x1b5   :  { %v434_v42 = vpop.f32.mrf.mxu0 }
 0x1b6   :  { %717 = vmatmul.mubr.f32.gmra.mxu1 %v433_v40  ;;  %v4032_v40 = vsub.s32 0, %v541_v39  ;;  %v4034_v42 = vsub.s32 1, %v541_v39 }
 0x1b7   :  { %v437_v45 = vpop.f32.mrf.mxu0  ;;  %722 = vmatprep.mubr.f32.mxu1 %v3832_v0 }
 0x1b8   :  { %v438_v46 = vadd.f32 %v437_v45, %v267_v43  ;;  %v4037_v43 = vrot.slane %v538_v41, %v4032_v40  ;;  %v4040_v44 = vrot.slane %v538_v41, %v4034_v42 }
 0x1b9   :  { %v439_v48 = vpop.f32.mrf.mxu0 }
 0x1ba   :  { %723 = vmatmul.mubr.f32.gmra.mxu1 %v438_v46 }
 0x1bb   :  { %v442_v50 = vpop.f32.mrf.mxu0  ;;  %728 = vmatprep.mubr.f32.mxu1 %v3832_v0 }
 0x1bc   :  { %v443_v51 = vadd.f32 %v442_v50, %v268_v49 }
 0x1bd   :  { %v444_v52 = vpop.f32.mrf.mxu0 }
 0x1be   :  { %729 = vmatmul.mubr.f32.gmra.mxu1 %v443_v51 }
 0x1bf   :  { %v447_v54 = vpop.f32.mrf.mxu0  ;;  %734 = vmatprep.mubr.f32.mxu1 %v3832_v0 }
 0x1c0   :  { %v448_v55 = vadd.f32 %v447_v54, %v269_v53 }
 0x1c1   :  { %v449_v56 = vpop.f32.mrf.mxu0 }
 0x1c2   :  { %735 = vmatmul.mubr.f32.gmra.mxu1 %v448_v55 }
 0x1c3   :  { %v452_v58 = vpop.f32.mrf.mxu0  ;;  %740 = vmatprep.mubr.f32.mxu1 %v3832_v0 }
 0x1c4   :  { %v453_v59 = vadd.f32 %v452_v58, %v270_v57 }
 0x1c5   :  { %v454_v60 = vpop.f32.mrf.mxu0 }
 0x1c6   :  { %741 = vmatmul.mubr.f32.gmra.mxu1 %v453_v59 }
 0x1c7   :  { %v457_v62 = vpop.f32.mrf.mxu0  ;;  %746 = vmatprep.mubr.f32.mxu1 %v3832_v0 }
 0x1c8   :  { %v458_v63 = vadd.f32 %v457_v62, %v271_v61 }
 0x1c9   :  { %v459_v1 = vpop.f32.mrf.mxu0 }
 0x1ca   :  { %747 = vmatmul.mubr.f32.gmra.mxu1 %v458_v63 }
 0x1cb   :  { %v462_v3 = vpop.f32.mrf.mxu0  ;;  %752 = vmatprep.mubr.f32.mxu1 %v3832_v0 }
 0x1cc   :  { %v463_v4 = vadd.f32 %v462_v3, %v272_v2 }
 0x1cd   :  { %v464_v5 = vpop.f32.mrf.mxu0 }
 0x1ce   :  { %753 = vmatmul.mubr.f32.gmra.mxu1 %v463_v4 }
 0x1cf   :  { %v467_v7 = vpop.f32.mrf.mxu0  ;;  %758 = vmatprep.mubr.f32.mxu1 %v3832_v0 }
 0x1d0   :  { %v468_v9 = vadd.f32 %v467_v7, %v273_v6 }
 0x1d1   :  { %v469_v10 = vpop.f32.mrf.mxu0 }
 0x1d2   :  { %759 = vmatmul.mubr.f32.gmra.mxu1 %v468_v9 }
 0x1d3   :  { %v472_v12 = vpop.f32.mrf.mxu0  ;;  %764 = vmatprep.mubr.f32.mxu1 %v3832_v0 }
 0x1d4   :  { %v473_v13 = vadd.f32 %v472_v12, %v274_v11 }
 0x1d5   :  { %v474_v14 = vpop.f32.mrf.mxu0 }
 0x1d6   :  { %765 = vmatmul.mubr.f32.gmra.mxu1 %v473_v13 }
 0x1d7   :  { %v477_v16 = vpop.f32.mrf.mxu0  ;;  %770 = vmatprep.mubr.f32.mxu1 %v3832_v0 }
 0x1d8   :  { %v478_v8 = vadd.f32 %v477_v16, %v275_v15 }
 0x1d9   :  { %v479_v17 = vpop.f32.mrf.mxu0 }
 0x1da   :  { %771 = vmatmul.mubr.f32.gmra.mxu1 %v478_v8 }
 0x1db   :  { %v482_v19 = vpop.f32.mrf.mxu0  ;;  %776 = vmatprep.mubr.f32.mxu1 %v3832_v0 }
 0x1dc   :  { %v483_v20 = vadd.f32 %v482_v19, %v276_v18 }
 0x1dd   :  { %v484_v21 = vpop.f32.mrf.mxu0 }
 0x1de   :  { %777 = vmatmul.mubr.f32.gmra.mxu1 %v483_v20 }
 0x1df   :  { %v487_v23 = vpop.f32.mrf.mxu0  ;;  %782 = vmatprep.mubr.f32.mxu1 %v3832_v0 }
 0x1e0   :  { %v488_v24 = vadd.f32 %v487_v23, %v277_v22 }
 0x1e1   :  { %v489_v25 = vpop.f32.mrf.mxu0 }
 0x1e2   :  { %783 = vmatmul.mubr.f32.gmra.mxu1 %v488_v24 }
 0x1e3   :  { %v492_v27 = vpop.f32.mrf.mxu0  ;;  %788 = vmatprep.mubr.f32.mxu1 %v3832_v0 }
 0x1e4   :  { %v493_v28 = vadd.f32 %v492_v27, %v278_v26 }
 0x1e5   :  { %v494_v29 = vpop.f32.mrf.mxu0 }
 0x1e6   :  { %789 = vmatmul.mubr.f32.gmra.mxu1 %v493_v28 }
 0x1e7   :  { %v497_v31 = vpop.f32.mrf.mxu0  ;;  %794 = vmatprep.mubr.f32.mxu1 %v3832_v0 }
 0x1e8   :  { %v498_v32 = vadd.f32 %v497_v31, %v279_v30 }
 0x1e9   :  { %v499_v33 = vpop.f32.mrf.mxu0 }
 0x1ea   :  { %795 = vmatmul.mubr.f32.gmra.mxu1 %v498_v32 }
 0x1eb   :  { %v502_v35 = vpop.f32.mrf.mxu0  ;;  %800 = vmatprep.mubr.f32.mxu1 %v3832_v0 }
 0x1ec   :  { %v503_v36 = vadd.f32 %v502_v35, %v280_v34 }
 0x1ed   :  { %v504_v37 = vpop.f32.mrf.mxu0 }
 0x1ee   :  { %801 = vmatmul.mubr.f32.gmra.mxu1 %v503_v36 }
 0x232   :  { %v616_v45 = vpop.f32.mrf.mxu1 }
 0x233   :  { %v617_v46 = vadd.f32 %v616_v45, %v4037_v43 }
 0x234   :  { %v618_v47 = vpop.f32.mrf.mxu1 }
 0x235   :  { %v619_v48 = vadd.f32 %v618_v47, %v4040_v44  ;;  %v807_v51 = vmax.f32 %v617_v46, 0.0 }
 0x236   :  { %v622_v49 = vpop.f32.mrf.mxu1 }
 0x237   :  { %v808_v50 = vmax.f32 %v619_v48, 0.0  ;;  %v623_v52 = vadd.f32 %v622_v49, %v4037_v43 }
 0x238   :  { %v624_v53 = vpop.f32.mrf.mxu1 }
 0x239   :  { %v625_v54 = vadd.f32 %v624_v53, %v4040_v44  ;;  %972 = vmatprep.mubr.f32.mxu1 %v808_v50  ;;  %v809_v57 = vmax.f32 %v623_v52, 0.0 }
 0x23a   :  { %v628_v55 = vpop.f32.mrf.mxu1  ;;  %973 = vmatmul.mubr.f32.vlgmr.msra.gmra.mxu1 %v807_v51 }
 0x23b   :  { %v810_v56 = vmax.f32 %v625_v54, 0.0  ;;  %v629_v58 = vadd.f32 %v628_v55, %v4037_v43 }
 0x23c   :  { %v630_v59 = vpop.f32.mrf.mxu1 }
 0x23d   :  { %v631_v60 = vadd.f32 %v630_v59, %v4040_v44  ;;  %977 = vmatprep.mubr.f32.mxu1 %v810_v56  ;;  %v811_v63 = vmax.f32 %v629_v58, 0.0 }
 0x23e   :  { %v634_v61 = vpop.f32.mrf.mxu1  ;;  %978 = vmatmul.mubr.f32.gmra.mxu1 %v809_v57 }
 0x23f   :  { %v812_v62 = vmax.f32 %v631_v60, 0.0  ;;  %v635_v1 = vadd.f32 %v634_v61, %v4037_v43 }
 0x240   :  { %v636_v2 = vpop.f32.mrf.mxu1 }
 0x241   :  { %v637_v3 = vadd.f32 %v636_v2, %v4040_v44  ;;  %982 = vmatprep.mubr.f32.mxu1 %v812_v62  ;;  %v813_v6 = vmax.f32 %v635_v1, 0.0 }
 0x242   :  { %v640_v4 = vpop.f32.mrf.mxu1  ;;  %983 = vmatmul.mubr.f32.gmra.mxu1 %v811_v63 }
 0x243   :  { %v814_v5 = vmax.f32 %v637_v3, 0.0  ;;  %v641_v7 = vadd.f32 %v640_v4, %v4037_v43 }
 0x244   :  { %v642_v9 = vpop.f32.mrf.mxu1 }
 0x245   :  { %v643_v10 = vadd.f32 %v642_v9, %v4040_v44  ;;  %987 = vmatprep.mubr.f32.mxu1 %v814_v5  ;;  %v815_v13 = vmax.f32 %v641_v7, 0.0 }
 0x246   :  { %v646_v11 = vpop.f32.mrf.mxu1  ;;  %988 = vmatmul.mubr.f32.gmra.mxu1 %v813_v6 }
 0x247   :  { %v816_v12 = vmax.f32 %v643_v10, 0.0  ;;  %v647_v14 = vadd.f32 %v646_v11, %v4037_v43 }
 0x248   :  { %v648_v15 = vpop.f32.mrf.mxu1 }
 0x249   :  { %v649_v16 = vadd.f32 %v648_v15, %v4040_v44  ;;  %992 = vmatprep.mubr.f32.mxu1 %v816_v12  ;;  %v817_v18 = vmax.f32 %v647_v14, 0.0 }
 0x24a   :  { %v652_v8 = vpop.f32.mrf.mxu1  ;;  %993 = vmatmul.mubr.f32.gmra.mxu1 %v815_v13 }
 0x24b   :  { %v818_v17 = vmax.f32 %v649_v16, 0.0  ;;  %v653_v19 = vadd.f32 %v652_v8, %v4037_v43 }
 0x24c   :  { %v654_v20 = vpop.f32.mrf.mxu1 }
 0x24d   :  { %v655_v21 = vadd.f32 %v654_v20, %v4040_v44  ;;  %997 = vmatprep.mubr.f32.mxu1 %v818_v17  ;;  %v819_v24 = vmax.f32 %v653_v19, 0.0 }
 0x24e   :  { %v658_v22 = vpop.f32.mrf.mxu1  ;;  %998 = vmatmul.mubr.f32.gmra.mxu1 %v817_v18 }
 0x24f   :  { %v820_v23 = vmax.f32 %v655_v21, 0.0  ;;  %v659_v25 = vadd.f32 %v658_v22, %v4037_v43 }
 0x250   :  { %v660_v26 = vpop.f32.mrf.mxu1 }
 0x251   :  { %v661_v27 = vadd.f32 %v660_v26, %v4040_v44  ;;  %1002 = vmatprep.mubr.f32.mxu1 %v820_v23  ;;  %v821_v30 = vmax.f32 %v659_v25, 0.0 }
 0x252   :  { %v664_v28 = vpop.f32.mrf.mxu1  ;;  %1003 = vmatmul.mubr.f32.gmra.mxu1 %v819_v24 }
 0x253   :  { %v822_v29 = vmax.f32 %v661_v27, 0.0  ;;  %v665_v31 = vadd.f32 %v664_v28, %v4037_v43 }
 0x254   :  { %v666_v32 = vpop.f32.mrf.mxu1 }
 0x255   :  { %v667_v33 = vadd.f32 %v666_v32, %v4040_v44  ;;  %1007 = vmatprep.mubr.f32.mxu1 %v822_v29  ;;  %v823_v36 = vmax.f32 %v665_v31, 0.0 }
 0x256   :  { %v670_v34 = vpop.f32.mrf.mxu1  ;;  %1008 = vmatmul.mubr.f32.gmra.mxu1 %v821_v30 }
 0x257   :  { %v824_v35 = vmax.f32 %v667_v33, 0.0  ;;  %v671_v37 = vadd.f32 %v670_v34, %v4037_v43 }
 0x258   :  { %v672_v38 = vpop.f32.mrf.mxu1 }
 0x259   :  { %v673_v39 = vadd.f32 %v672_v38, %v4040_v44  ;;  %1012 = vmatprep.mubr.f32.mxu1 %v824_v35  ;;  %v825_v46 = vmax.f32 %v671_v37, 0.0 }
 0x25a   :  { %v676_v41 = vpop.f32.mrf.mxu1  ;;  %1013 = vmatmul.mubr.f32.gmra.mxu1 %v823_v36 }
 0x25b   :  { %v826_v45 = vmax.f32 %v673_v39, 0.0  ;;  %v677_v47 = vadd.f32 %v676_v41, %v4037_v43 }
 0x25c   :  { %v678_v48 = vpop.f32.mrf.mxu1 }
 0x25d   :  { %v679_v49 = vadd.f32 %v678_v48, %v4040_v44  ;;  %1017 = vmatprep.mubr.f32.mxu1 %v826_v45  ;;  %v827_v52 = vmax.f32 %v677_v47, 0.0 }
 0x25e   :  { %v682_v50 = vpop.f32.mrf.mxu1  ;;  %1018 = vmatmul.mubr.f32.gmra.mxu1 %v825_v46 }
 0x25f   :  { %v828_v51 = vmax.f32 %v679_v49, 0.0  ;;  %v683_v53 = vadd.f32 %v682_v50, %v4037_v43 }
 0x260   :  { %v684_v54 = vpop.f32.mrf.mxu1 }
 0x261   :  { %v685_v55 = vadd.f32 %v684_v54, %v4040_v44  ;;  %1022 = vmatprep.mubr.f32.mxu1 %v828_v51  ;;  %v829_v58 = vmax.f32 %v683_v53, 0.0 }
 0x262   :  { %v688_v56 = vpop.f32.mrf.mxu1  ;;  %1023 = vmatmul.mubr.f32.gmra.mxu1 %v827_v52 }
 0x263   :  { %v830_v57 = vmax.f32 %v685_v55, 0.0  ;;  %v689_v59 = vadd.f32 %v688_v56, %v4037_v43 }
 0x264   :  { %v690_v60 = vpop.f32.mrf.mxu1 }
 0x265   :  { %v691_v61 = vadd.f32 %v690_v60, %v4040_v44  ;;  %1027 = vmatprep.mubr.f32.mxu1 %v830_v57  ;;  %v831_v1 = vmax.f32 %v689_v59, 0.0 }
 0x266   :  { %v694_v62 = vpop.f32.mrf.mxu1  ;;  %1028 = vmatmul.mubr.f32.gmra.mxu1 %v829_v58 }
 0x267   :  { %v832_v63 = vmax.f32 %v691_v61, 0.0  ;;  %v695_v2 = vadd.f32 %v694_v62, %v4037_v43 }
 0x268   :  { %v696_v3 = vpop.f32.mrf.mxu1 }
 0x269   :  { %v697_v4 = vadd.f32 %v696_v3, %v4040_v44  ;;  %1032 = vmatprep.mubr.f32.mxu1 %v832_v63  ;;  %v833_v7 = vmax.f32 %v695_v2, 0.0 }
 0x26a   :  { %v700_v5 = vpop.f32.mrf.mxu1  ;;  %1033 = vmatmul.mubr.f32.gmra.mxu1 %v831_v1 }
 0x26b   :  { %v834_v6 = vmax.f32 %v697_v4, 0.0  ;;  %v701_v9 = vadd.f32 %v700_v5, %v4037_v43 }
 0x26c   :  { %v702_v10 = vpop.f32.mrf.mxu1 }
 0x26d   :  { %v703_v11 = vadd.f32 %v702_v10, %v4040_v44  ;;  %1037 = vmatprep.mubr.f32.mxu1 %v834_v6  ;;  %v835_v14 = vmax.f32 %v701_v9, 0.0 }
 0x26e   :  { %v706_v12 = vpop.f32.mrf.mxu1  ;;  %1038 = vmatmul.mubr.f32.gmra.mxu1 %v833_v7 }
 0x26f   :  { %v836_v13 = vmax.f32 %v703_v11, 0.0  ;;  %v707_v15 = vadd.f32 %v706_v12, %v4037_v43 }
 0x270   :  { %v708_v16 = vpop.f32.mrf.mxu1 }
 0x271   :  { %v709_v8 = vadd.f32 %v708_v16, %v4040_v44  ;;  %1042 = vmatprep.mubr.f32.mxu1 %v836_v13  ;;  %v837_v19 = vmax.f32 %v707_v15, 0.0 }
 0x272   :  { %v712_v17 = vpop.f32.mrf.mxu1  ;;  %1043 = vmatmul.mubr.f32.gmra.mxu1 %v835_v14 }
 0x273   :  { %v838_v18 = vmax.f32 %v709_v8, 0.0  ;;  %v713_v20 = vadd.f32 %v712_v17, %v4037_v43 }
 0x274   :  { %v714_v21 = vpop.f32.mrf.mxu1 }
 0x275   :  { %v715_v22 = vadd.f32 %v714_v21, %v4040_v44  ;;  %1047 = vmatprep.mubr.f32.mxu1 %v838_v18  ;;  %v839_v25 = vmax.f32 %v713_v20, 0.0 }
 0x276   :  { %v718_v23 = vpop.f32.mrf.mxu1  ;;  %1048 = vmatmul.mubr.f32.gmra.mxu1 %v837_v19 }
 0x277   :  { %v840_v24 = vmax.f32 %v715_v22, 0.0  ;;  %v719_v26 = vadd.f32 %v718_v23, %v4037_v43 }
 0x278   :  { %v720_v27 = vpop.f32.mrf.mxu1 }
 0x279   :  { %v721_v28 = vadd.f32 %v720_v27, %v4040_v44  ;;  %1052 = vmatprep.mubr.f32.mxu1 %v840_v24  ;;  %v841_v31 = vmax.f32 %v719_v26, 0.0 }
 0x27a   :  { %v724_v29 = vpop.f32.mrf.mxu1  ;;  %1053 = vmatmul.mubr.f32.gmra.mxu1 %v839_v25 }
 0x27b   :  { %v842_v30 = vmax.f32 %v721_v28, 0.0  ;;  %v725_v32 = vadd.f32 %v724_v29, %v4037_v43 }
 0x27c   :  { %v726_v33 = vpop.f32.mrf.mxu1 }
 0x27d   :  { %v727_v34 = vadd.f32 %v726_v33, %v4040_v44  ;;  %1057 = vmatprep.mubr.f32.mxu1 %v842_v30  ;;  %v843_v37 = vmax.f32 %v725_v32, 0.0 }
 0x27e   :  { %v730_v35 = vpop.f32.mrf.mxu1  ;;  %1058 = vmatmul.mubr.f32.gmra.mxu1 %v841_v31 }
 0x27f   :  { %v844_v36 = vmax.f32 %v727_v34, 0.0  ;;  %v731_v38 = vadd.f32 %v730_v35, %v4037_v43 }
 0x280   :  { %v732_v39 = vpop.f32.mrf.mxu1 }
 0x281   :  { %v733_v41 = vadd.f32 %v732_v39, %v4040_v44  ;;  %1062 = vmatprep.mubr.f32.mxu1 %v844_v36  ;;  %v845_v47 = vmax.f32 %v731_v38, 0.0 }
 0x282   :  { %v736_v45 = vpop.f32.mrf.mxu1  ;;  %1063 = vmatmul.mubr.f32.gmra.mxu1 %v843_v37 }
 0x283   :  { %v846_v46 = vmax.f32 %v733_v41, 0.0  ;;  %v737_v48 = vadd.f32 %v736_v45, %v4037_v43 }
 0x284   :  { %v738_v49 = vpop.f32.mrf.mxu1 }
 0x285   :  { %v739_v50 = vadd.f32 %v738_v49, %v4040_v44  ;;  %1067 = vmatprep.mubr.f32.mxu1 %v846_v46  ;;  %v847_v53 = vmax.f32 %v737_v48, 0.0 }
 0x286   :  { %v742_v51 = vpop.f32.mrf.mxu1  ;;  %1068 = vmatmul.mubr.f32.gmra.mxu1 %v845_v47 }
 0x287   :  { %v848_v52 = vmax.f32 %v739_v50, 0.0  ;;  %v743_v54 = vadd.f32 %v742_v51, %v4037_v43 }
 0x288   :  { %v744_v55 = vpop.f32.mrf.mxu1 }
 0x289   :  { %v745_v56 = vadd.f32 %v744_v55, %v4040_v44  ;;  %1072 = vmatprep.mubr.f32.mxu1 %v848_v52  ;;  %v849_v59 = vmax.f32 %v743_v54, 0.0 }
 0x28a   :  { %v748_v57 = vpop.f32.mrf.mxu1  ;;  %1073 = vmatmul.mubr.f32.gmra.mxu1 %v847_v53 }
 0x28b   :  { %v850_v58 = vmax.f32 %v745_v56, 0.0  ;;  %v749_v60 = vadd.f32 %v748_v57, %v4037_v43 }
 0x28c   :  { %v750_v61 = vpop.f32.mrf.mxu1 }
 0x28d   :  { %v751_v62 = vadd.f32 %v750_v61, %v4040_v44  ;;  %1077 = vmatprep.mubr.f32.mxu1 %v850_v58  ;;  %v851_v2 = vmax.f32 %v749_v60, 0.0 }
 0x28e   :  { %v754_v63 = vpop.f32.mrf.mxu1  ;;  %1078 = vmatmul.mubr.f32.gmra.mxu1 %v849_v59 }
 0x28f   :  { %v852_v1 = vmax.f32 %v751_v62, 0.0  ;;  %v755_v3 = vadd.f32 %v754_v63, %v4037_v43 }
 0x290   :  { %v756_v4 = vpop.f32.mrf.mxu1 }
 0x291   :  { %v757_v5 = vadd.f32 %v756_v4, %v4040_v44  ;;  %1082 = vmatprep.mubr.f32.mxu1 %v852_v1  ;;  %v853_v9 = vmax.f32 %v755_v3, 0.0 }
 0x292   :  { %v760_v6 = vpop.f32.mrf.mxu1  ;;  %1083 = vmatmul.mubr.f32.gmra.mxu1 %v851_v2 }
 0x293   :  { %v854_v7 = vmax.f32 %v757_v5, 0.0  ;;  %v761_v10 = vadd.f32 %v760_v6, %v4037_v43 }
 0x294   :  { %v762_v11 = vpop.f32.mrf.mxu1 }
 0x295   :  { %v763_v12 = vadd.f32 %v762_v11, %v4040_v44  ;;  %1087 = vmatprep.mubr.f32.mxu1 %v854_v7  ;;  %v855_v15 = vmax.f32 %v761_v10, 0.0 }
 0x296   :  { %v766_v13 = vpop.f32.mrf.mxu1  ;;  %1088 = vmatmul.mubr.f32.gmra.mxu1 %v853_v9 }
 0x297   :  { %v856_v14 = vmax.f32 %v763_v12, 0.0  ;;  %v767_v16 = vadd.f32 %v766_v13, %v4037_v43 }
 0x298   :  { %v768_v8 = vpop.f32.mrf.mxu1 }
 0x299   :  { %v769_v17 = vadd.f32 %v768_v8, %v4040_v44  ;;  %1092 = vmatprep.mubr.f32.mxu1 %v856_v14  ;;  %v857_v20 = vmax.f32 %v767_v16, 0.0 }
 0x29a   :  { %v772_v18 = vpop.f32.mrf.mxu1  ;;  %1093 = vmatmul.mubr.f32.gmra.mxu1 %v855_v15 }
 0x29b   :  { %v858_v19 = vmax.f32 %v769_v17, 0.0  ;;  %v773_v21 = vadd.f32 %v772_v18, %v4037_v43 }
 0x29c   :  { %v774_v22 = vpop.f32.mrf.mxu1 }
 0x29d   :  { %v775_v23 = vadd.f32 %v774_v22, %v4040_v44  ;;  %1097 = vmatprep.mubr.f32.mxu1 %v858_v19  ;;  %v859_v26 = vmax.f32 %v773_v21, 0.0 }
 0x29e   :  { %v778_v24 = vpop.f32.mrf.mxu1  ;;  %1098 = vmatmul.mubr.f32.gmra.mxu1 %v857_v20 }
 0x29f   :  { %v860_v25 = vmax.f32 %v775_v23, 0.0  ;;  %v779_v27 = vadd.f32 %v778_v24, %v4037_v43  ;;  %v4119_v23 = vld [vmem:[#allocation13] ss:$0 sm:$0xff] }
 0x2a0   :  { %v780_v28 = vpop.f32.mrf.mxu1 }
 0x2a1   :  { %v781_v29 = vadd.f32 %v780_v28, %v4040_v44  ;;  %1102 = vmatprep.mubr.f32.mxu1 %v860_v25  ;;  %v861_v32 = vmax.f32 %v779_v27, 0.0  ;;  %v4123_v28 = vld [vmem:[#allocation14] ss:$0 sm:$0xff] }
 0x2a2   :  { %v784_v30 = vpop.f32.mrf.mxu1  ;;  %1103 = vmatmul.mubr.f32.gmra.mxu1 %v859_v26 }
 0x2a3   :  { %v862_v31 = vmax.f32 %v781_v29, 0.0  ;;  %v785_v33 = vadd.f32 %v784_v30, %v4037_v43 }
 0x2a4   :  { %v786_v34 = vpop.f32.mrf.mxu1 }
 0x2a5   :  { %v787_v35 = vadd.f32 %v786_v34, %v4040_v44  ;;  %1107 = vmatprep.mubr.f32.mxu1 %v862_v31  ;;  %v863_v38 = vmax.f32 %v785_v33, 0.0 }
 0x2a6   :  { %v790_v36 = vpop.f32.mrf.mxu1  ;;  %1108 = vmatmul.mubr.f32.gmra.mxu1 %v861_v32 }
 0x2a7   :  { %v864_v37 = vmax.f32 %v787_v35, 0.0  ;;  %v791_v39 = vadd.f32 %v790_v36, %v4037_v43 }
 0x2a8   :  { %v792_v41 = vpop.f32.mrf.mxu1 }
 0x2a9   :  { %v793_v45 = vadd.f32 %v792_v41, %v4040_v44  ;;  %1112 = vmatprep.mubr.f32.mxu1 %v864_v37  ;;  %v865_v48 = vmax.f32 %v791_v39, 0.0  ;;  %v4131_v37 = vld [vmem:[#allocation16] ss:$0 sm:$0xff] }
 0x2aa   :  { %v796_v46 = vpop.f32.mrf.mxu1  ;;  %1113 = vmatmul.mubr.f32.gmra.mxu1 %v863_v38 }
 0x2ab   :  { %v866_v47 = vmax.f32 %v793_v45, 0.0  ;;  %v797_v49 = vadd.f32 %v796_v46, %v4037_v43 }
 0x2ac   :  { %v798_v50 = vpop.f32.mrf.mxu1 }
 0x2ad   :  { %v799_v51 = vadd.f32 %v798_v50, %v4040_v44  ;;  %1117 = vmatprep.mubr.f32.mxu1 %v866_v47  ;;  %v867_v54 = vmax.f32 %v797_v49, 0.0 }
 0x2ae   :  { %v802_v52 = vpop.f32.mrf.mxu1  ;;  %1118 = vmatmul.mubr.f32.gmra.mxu1 %v865_v48 }
 0x2af   :  { %v868_v53 = vmax.f32 %v799_v51, 0.0  ;;  %v803_v55 = vadd.f32 %v802_v52, %v4037_v43 }
 0x2b0   :  { %v804_v56 = vpop.f32.mrf.mxu1 }
 0x2b1   :  { %v805_v57 = vadd.f32 %v804_v56, %v4040_v44  ;;  %1122 = vmatprep.mubr.f32.mxu1 %v868_v53  ;;  %v869_v59 = vmax.f32 %v803_v55, 0.0 }
 0x2b2   :  { %1123 = vmatmul.mubr.f32.gmra.mxu1 %v867_v54 }
 0x2b3   :  { %v870_v58 = vmax.f32 %v805_v57, 0.0 }
 0x2b5   :  { %1127 = vmatprep.mubr.f32.mxu1 %v870_v58 }
 0x2b6   :  { %1128 = vmatmul.mubr.f32.gmra.mxu1 %v869_v59 }
 0x2b7   :  { %1607 = vmatprep.mubr.f32.mxu1 %v3832_v0 }
 0x2fa   :  { %v4107_v60 = vpop.f32.mrf.mxu1 }
 0x2fc   :  { %v976_v61 = vpop.f32.mrf.mxu1 }
 0x2fe   :  { %v4109_v62 = vpop.f32.mrf.mxu1 }
 0x300   :  { %v981_v63 = vpop.f32.mrf.mxu1 }
 0x302   :  { %v4111_v1 = vpop.f32.mrf.mxu1 }
 0x304   :  { %v986_v43 = vpop.f32.mrf.mxu1 }
 0x306   :  { %v4113_v2 = vpop.f32.mrf.mxu1 }
 0x308   :  { %v991_v44 = vpop.f32.mrf.mxu1 }
 0x30a   :  { %v4115_v3 = vpop.f32.mrf.mxu1 }
 0x30c   :  { %v996_v4 = vpop.f32.mrf.mxu1 }
 0x30e   :  { %v4117_v5 = vpop.f32.mrf.mxu1 }
 0x310   :  { %v1001_v6 = vpop.f32.mrf.mxu1 }
 0x312   :  { %v1004_v7 = vpop.f32.mrf.mxu1 }
 0x313   :  { %v1005_v44 = vadd.f32 %v4119_v23, %v1004_v7  ;;  %v995_v7 = vadd.f32 %v4119_v23, %v4115_v3  ;;  %v985_v3 = vadd.f32 %v4119_v23, %v4111_v1  ;;  %v975_v1 = vadd.f32 %v4119_v23, %v4107_v60 }
 0x314   :  { %v1006_v9 = vpop.f32.mrf.mxu1 }
 0x315   :  { %v1138_v60 = vmul.f32 %v4123_v28, %v975_v1 }
 0x316   :  { %v1009_v10 = vpop.f32.mrf.mxu1 }
 0x317   :  { %v1010_v58 = vadd.f32 %v4119_v23, %v1009_v10  ;;  %v1000_v10 = vadd.f32 %v4119_v23, %v4117_v5 }
 0x318   :  { %v1011_v11 = vpop.f32.mrf.mxu1 }
 0x31a   :  { %v1014_v12 = vpop.f32.mrf.mxu1 }
 0x31b   :  { %v1015_v53 = vadd.f32 %v4119_v23, %v1014_v12  ;;  %v1145_v12 = vmul.f32 %v4123_v28, %v1010_v58 }
 0x31c   :  { %v1016_v13 = vpop.f32.mrf.mxu1 }
 0x31d   :  { %v1146_v4 = vmul.f32 %v4123_v28, %v1015_v53  ;;  %v1175_v53 = vadd.f32 %v4131_v37, %v1138_v60 }
 0x31e   :  { %v1019_v14 = vpop.f32.mrf.mxu1 }
 0x31f   :  { %v1020_v48 = vadd.f32 %v4119_v23, %v1019_v14  ;;  %v1207_v58 = vmax.f32 %v1175_v53, 0.0 }
 0x320   :  { %v1021_v15 = vpop.f32.mrf.mxu1 }
 0x321   :  { %v1147_v59 = vmul.f32 %v4123_v28, %v1020_v48 }
 0x322   :  { %v1024_v16 = vpop.f32.mrf.mxu1 }
 0x323   :  { %v1025_v39 = vadd.f32 %v4119_v23, %v1024_v16  ;;  %v1184_v13 = vadd.f32 %v4131_v37, %v1147_v59  ;;  %v1144_v16 = vmul.f32 %v4123_v28, %v1005_v44 }
 0x324   :  { %v1026_v8 = vpop.f32.mrf.mxu1 }
 0x325   :  { %v1148_v54 = vmul.f32 %v4123_v28, %v1025_v39  ;;  %v1183_v8 = vadd.f32 %v4131_v37, %v1146_v4 }
 0x326   :  { %v1029_v17 = vpop.f32.mrf.mxu1 }
 0x327   :  { %v1030_v34 = vadd.f32 %v4119_v23, %v1029_v17  ;;  %v1185_v6 = vadd.f32 %v4131_v37, %v1148_v54 }
 0x328   :  { %v1031_v18 = vpop.f32.mrf.mxu1 }
 0x329   :  { %v1149_v49 = vmul.f32 %v4123_v28, %v1030_v34  ;;  %v1217_v17 = vmax.f32 %v1185_v6, 0.0  ;;  %v990_v18 = vadd.f32 %v4119_v23, %v4113_v2 }
 0x32a   :  { %v1034_v19 = vpop.f32.mrf.mxu1 }
 0x32b   :  { %v1035_v30 = vadd.f32 %v4119_v23, %v1034_v19  ;;  %v1186_v61 = vadd.f32 %v4131_v37, %v1149_v49  ;;  %v1143_v19 = vmul.f32 %v4123_v28, %v1000_v10 }
 0x32c   :  { %v1036_v20 = vpop.f32.mrf.mxu1 }
 0x32d   :  { %v1150_v41 = vmul.f32 %v4123_v28, %v1035_v30  ;;  %v1218_v14 = vmax.f32 %v1186_v61, 0.0  ;;  %v1182_v20 = vadd.f32 %v4131_v37, %v1145_v12  ;;  %v1180_v30 = vadd.f32 %v4131_v37, %v1143_v19 }
 0x32e   :  { %v1039_v21 = vpop.f32.mrf.mxu1 }
 0x32f   :  { %v1040_v27 = vadd.f32 %v4119_v23, %v1039_v21  ;;  %v1187_v55 = vadd.f32 %v4131_v37, %v1150_v41  ;;  %v1216_v21 = vmax.f32 %v1184_v13, 0.0  ;;  %v1212_v41 = vmax.f32 %v1180_v30, 0.0 }
 0x330   :  { %v1041_v22 = vpop.f32.mrf.mxu1 }
 0x331   :  { %v1151_v35 = vmul.f32 %v4123_v28, %v1040_v27  ;;  %v1219_v9 = vmax.f32 %v1187_v55, 0.0  ;;  %v980_v27 = vadd.f32 %v4119_v23, %v4109_v62 }
 0x332   :  { %v1044_v24 = vpop.f32.mrf.mxu1 }
 0x333   :  { %v1045_v25 = vadd.f32 %v4119_v23, %v1044_v24  ;;  %v1188_v50 = vadd.f32 %v4131_v37, %v1151_v35  ;;  %v1142_v24 = vmul.f32 %v4123_v28, %v995_v7 }
 0x334   :  { %v1046_v26 = vpop.f32.mrf.mxu1 }
 0x335   :  { %v1152_v31 = vmul.f32 %v4123_v28, %v1045_v25  ;;  %v1220_v63 = vmax.f32 %v1188_v50, 0.0  ;;  %v1181_v25 = vadd.f32 %v4131_v37, %v1144_v16  ;;  %v1215_v26 = vmax.f32 %v1183_v8, 0.0 }
 0x336   :  { %v1049_v29 = vpop.f32.mrf.mxu1  ;;  %v1179_v34 = vadd.f32 %v4131_v37, %v1142_v24 }
 0x337   :  { %v1050_v32 = vadd.f32 %v4119_v23, %v1049_v29  ;;  %v1189_v45 = vadd.f32 %v4131_v37, %v1152_v31  ;;  %v1141_v29 = vmul.f32 %v4123_v28, %v990_v18  ;;  %v1214_v31 = vmax.f32 %v1182_v20, 0.0 }
 0x338   :  { %v1051_v33 = vpop.f32.mrf.mxu1  ;;  %v1213_v35 = vmax.f32 %v1181_v25, 0.0 }
 0x339   :  { %v1153_v36 = vmul.f32 %v4123_v28, %v1050_v32  ;;  %v1221_v56 = vmax.f32 %v1189_v45, 0.0  ;;  %v1140_v33 = vmul.f32 %v4123_v28, %v985_v3  ;;  %v1178_v39 = vadd.f32 %v4131_v37, %v1141_v29 }
 0x33a   :  { %v4133_v38 = vpop.f32.mrf.mxu1 }
 0x33b   :  { %v1190_v46 = vadd.f32 %v4131_v37, %v1153_v36  ;;  %v1139_v36 = vmul.f32 %v4123_v28, %v980_v27  ;;  %v1210_v50 = vmax.f32 %v1178_v39, 0.0 }
 0x33c   :  { %v1056_v47 = vpop.f32.mrf.mxu1 }
 0x33d   :  { %v1222_v51 = vmax.f32 %v1190_v46, 0.0  ;;  %v1177_v46 = vadd.f32 %v4131_v37, %v1140_v33  ;;  %v1211_v47 = vmax.f32 %v1179_v34, 0.0  ;;  %v1176_v49 = vadd.f32 %v4131_v37, %v1139_v36 }
 0x33e   :  { %v4142_v52 = vpop.f32.mrf.mxu1 }
 0x33f   :  { %1273 = vmatpush1.msra.mxu0 %v1222_v51  ;;  %v1209_v54 = vmax.f32 %v1177_v46, 0.0 }
 0x340   :  { %v1061_v57 = vpop.f32.mrf.mxu1  ;;  %1274 = vmatprep.subr.mxu0 %v3832_v0 }
 0x341   :  { %1275 = vmatpush1.msra.mxu0 %v1221_v56  ;;  %v1208_v56 = vmax.f32 %v1176_v49, 0.0 }
 0x342   :  { %v4151_v43 = vpop.f32.mrf.mxu1  ;;  %1276 = vmatprep.subr.mxu0 %v3832_v0 }
 0x343   :  { %1277 = vmatpush1.msra.mxu0 %v1220_v63 }
 0x344   :  { %v1066_v11 = vpop.f32.mrf.mxu1  ;;  %1278 = vmatprep.subr.mxu0 %v3832_v0 }
 0x345   :  { %1279 = vmatpush1.msra.mxu0 %v1219_v9 }
 0x346   :  { %v4162_v15 = vpop.f32.mrf.mxu1  ;;  %1280 = vmatprep.subr.mxu0 %v3832_v0 }
 0x347   :  { %1281 = vmatpush1.msra.mxu0 %v1218_v14 }
 0x348   :  { %v1071_v5 = vpop.f32.mrf.mxu1  ;;  %1282 = vmatprep.subr.mxu0 %v3832_v0 }
 0x349   :  { %1283 = vmatpush1.msra.mxu0 %v1217_v17 }
 0x34a   :  { %v4174_v22 = vpop.f32.mrf.mxu1  ;;  %1284 = vmatprep.subr.mxu0 %v3832_v0 }
 0x34b   :  { %1285 = vmatpush1.msra.mxu0 %v1216_v21 }
 0x34c   :  { %v1076_v2 = vpop.f32.mrf.mxu1  ;;  %1286 = vmatprep.subr.mxu0 %v3832_v0 }
 0x34d   :  { %1287 = vmatpush1.msra.mxu0 %v1215_v26 }
 0x34e   :  { %v4186_v32 = vpop.f32.mrf.mxu1  ;;  %1288 = vmatprep.subr.mxu0 %v3832_v0 }
 0x34f   :  { %1289 = vmatpush1.msra.mxu0 %v1214_v31 }
 0x350   :  { %v1081_v62 = vpop.f32.mrf.mxu1  ;;  %1290 = vmatprep.subr.mxu0 %v3832_v0 }
 0x351   :  { %1291 = vmatpush1.msra.mxu0 %v1213_v35 }
 0x352   :  { %v4196_v45 = vpop.f32.mrf.mxu1  ;;  %1292 = vmatprep.subr.mxu0 %v3832_v0 }
 0x353   :  { %1293 = vmatpush1.msra.mxu0 %v1212_v41  ;;  %v1085_v46 = vadd.f32 %v4119_v23, %v4196_v45  ;;  %v1075_v45 = vadd.f32 %v4119_v23, %v4174_v22  ;;  %v1065_v22 = vadd.f32 %v4119_v23, %v4151_v43  ;;  %v1055_v43 = vadd.f32 %v4119_v23, %v4133_v38 }
 0x354   :  { %v1086_v48 = vpop.f32.mrf.mxu1  ;;  %1294 = vmatprep.subr.mxu0 %v3832_v0 }
 0x355   :  { %1295 = vmatpush1.msra.mxu0 %v1211_v47 }
 0x356   :  { %v1089_v51 = vpop.f32.mrf.mxu1  ;;  %1296 = vmatprep.subr.mxu0 %v3832_v0 }
 0x357   :  { %1297 = vmatpush1.msra.mxu0 %v1210_v50  ;;  %v1090_v36 = vadd.f32 %v4119_v23, %v1089_v51  ;;  %v1080_v50 = vadd.f32 %v4119_v23, %v4186_v32  ;;  %v1070_v32 = vadd.f32 %v4119_v23, %v4162_v15  ;;  %v1060_v15 = vadd.f32 %v4119_v23, %v4142_v52 }
 0x358   :  { %v1091_v55 = vpop.f32.mrf.mxu1  ;;  %1298 = vmatprep.subr.mxu0 %v3832_v0 }
 0x359   :  { %1299 = vmatpush1.msra.mxu0 %v1209_v54  ;;  %v1161_v51 = vmul.f32 %v4123_v28, %v1090_v36  ;;  %v1160_v55 = vmul.f32 %v4123_v28, %v1085_v46  ;;  %v1155_v52 = vmul.f32 %v4123_v28, %v1060_v15  ;;  %v1516_v36 = vld [vmem:[#allocation8 + $0x190] sm:$0xff]  ;;  %v1514_v46 = vld [vmem:[#allocation8 + $0x180] sm:$0xff] }
 0x35a   :  { %v1094_v57 = vpop.f32.mrf.mxu1  ;;  %1300 = vmatprep.subr.mxu0 %v3832_v0  ;;  %v3471_v15 = vld [vmem:[#allocation5 + $0x60] sm:$0xff] }
 0x35b   :  { %1301 = vmatpush1.msra.mxu0 %v1208_v56  ;;  %v1095_v33 = vadd.f32 %v4119_v23, %v1094_v57 }
 0x35c   :  { %v1096_v59 = vpop.f32.mrf.mxu1  ;;  %1302 = vmatprep.subr.mxu0 %v3832_v0 }
 0x35d   :  { %1303 = vmatpush1.msra.mxu0 %v1207_v58  ;;  %v1162_v47 = vmul.f32 %v4123_v28, %v1095_v33  ;;  %v1159_v58 = vmul.f32 %v4123_v28, %v1080_v50  ;;  %v1198_v59 = vadd.f32 %v4131_v37, %v1161_v51  ;;  %v1519_v33 = vld [vmem:[#allocation8 + $0x1a8] sm:$0xff] }
 0x35e   :  { %v1099_v61 = vpop.f32.mrf.mxu1  ;;  %1304 = vmatprep.subr.mxu0 %v3832_v0  ;;  %v1511_v50 = vld [vmem:[#allocation8 + $0x168] sm:$0xff] }
 0x35f   :  { %v1100_v29 = vadd.f32 %v4119_v23, %v1099_v61  ;;  %v1199_v56 = vadd.f32 %v4131_v37, %v1162_v47  ;;  %v1513_v47 = vld [vmem:[#allocation8 + $0x178] sm:$0xff]  ;;  %v3466_v51 = vld [vmem:[#allocation5 + $0x48] sm:$0xff] }
 0x360   :  { %v1101_v63 = vpop.f32.mrf.mxu1 }
 0x361   :  { %v1163_v39 = vmul.f32 %v4123_v28, %v1100_v29  ;;  %v1158_v63 = vmul.f32 %v4123_v28, %v1075_v45  ;;  %v1522_v29 = vld [vmem:[#allocation8 + $0x1c0] sm:$0xff]  ;;  %v1508_v45 = vld [vmem:[#allocation8 + $0x150] sm:$0xff] }
 0x362   :  { %v1104_v44 = vpop.f32.mrf.mxu1 }
 0x363   :  { %v1105_v25 = vadd.f32 %v4119_v23, %v1104_v44  ;;  %v1200_v53 = vadd.f32 %v4131_v37, %v1163_v39  ;;  %v1197_v44 = vadd.f32 %v4131_v37, %v1160_v55  ;;  %v3463_v39 = vld [vmem:[#allocation5 + $0x20] sm:$0xff] }
 0x364   :  { %v1106_v4 = vpop.f32.mrf.mxu1  ;;  %v3467_v55 = vld [vmem:[#allocation5 + $0x40] sm:$0xff] }
 0x365   :  { %v1164_v34 = vmul.f32 %v4123_v28, %v1105_v25  ;;  %v1232_v61 = vmax.f32 %v1200_v53, 0.0  ;;  %v1231_v4 = vmax.f32 %v1199_v56, 0.0  ;;  %v1525_v25 = vld [vmem:[#allocation8 + $0x1d8] sm:$0xff]  ;;  %v1510_v53 = vld [vmem:[#allocation8 + $0x160] sm:$0xff]  ;;  %v1507_v56 = vld [vmem:[#allocation8 + $0x148] sm:$0xff] }
 0x366   :  { %v1109_v6 = vpop.f32.mrf.mxu1 }
 0x367   :  { %v1110_v21 = vadd.f32 %v4119_v23, %v1109_v6  ;;  %v1201_v48 = vadd.f32 %v4131_v37, %v1164_v34  ;;  %v1157_v6 = vmul.f32 %v4123_v28, %v1070_v32  ;;  %v3462_v34 = vld [vmem:[#allocation5 + $0x28] sm:$0xff]  ;;  %v1506_v32 = vld [vmem:[#allocation8 + $0x140] sm:$0xff] }
 0x368   :  { %v1111_v9 = vpop.f32.mrf.mxu1 }
 0x369   :  { %v1165_v30 = vmul.f32 %v4123_v28, %v1110_v21  ;;  %v1233_v57 = vmax.f32 %v1201_v48, 0.0  ;;  %v1196_v9 = vadd.f32 %v4131_v37, %v1159_v58  ;;  %v1527_v21 = vld [vmem:[#allocation8 + $0x1e8] sm:$0xff]  ;;  %v1512_v48 = vld [vmem:[#allocation8 + $0x170] sm:$0xff]  ;;  %v1505_v58 = vld [vmem:[#allocation8 + $0x138] sm:$0xff] }
 0x36a   :  { %v1114_v11 = vpop.f32.mrf.mxu1 }
 0x36b   :  { %v1115_v5 = vadd.f32 %v4119_v23, %v1114_v11  ;;  %v1202_v41 = vadd.f32 %v4131_v37, %v1165_v30  ;;  %v1230_v11 = vmax.f32 %v1198_v59, 0.0  ;;  %v1521_v30 = vld [vmem:[#allocation8 + $0x1b8] sm:$0xff]  ;;  %v1504_v59 = vld [vmem:[#allocation8 + $0x130] sm:$0xff] }
 0x36c   :  { %v1116_v10 = vpop.f32.mrf.mxu1 }
 0x36d   :  { %v1166_v26 = vmul.f32 %v4123_v28, %v1115_v5  ;;  %v1234_v54 = vmax.f32 %v1202_v41, 0.0  ;;  %v1156_v10 = vmul.f32 %v4123_v28, %v1065_v22  ;;  %v1515_v41 = vld [vmem:[#allocation8 + $0x188] sm:$0xff] }
 0x36e   :  { %v1119_v12 = vpop.f32.mrf.mxu1  ;;  %v1503_v22 = vld [vmem:[#allocation8 + $0x128] sm:$0xff] }
 0x36f   :  { %v1120_v8 = vadd.f32 %v4119_v23, %v1119_v12  ;;  %v1203_v35 = vadd.f32 %v4131_v37, %v1166_v26  ;;  %v1195_v12 = vadd.f32 %v4131_v37, %v1158_v63  ;;  %v3459_v26 = vld [vmem:[#allocation5] sm:$0xff]  ;;  %v3470_v63 = vld [vmem:[#allocation5 + $0x68] sm:$0xff] }
 0x370   :  { %v1121_v13 = vpop.f32.mrf.mxu1 }
 0x371   :  { %v1167_v3 = vmul.f32 %v4123_v28, %v1120_v8  ;;  %v1235_v49 = vmax.f32 %v1203_v35, 0.0  ;;  %v1229_v13 = vmax.f32 %v1197_v44, 0.0  ;;  %v1227_v38 = vmax.f32 %v1195_v12, 0.0  ;;  %v1518_v35 = vld [vmem:[#allocation8 + $0x1a0] sm:$0xff]  ;;  %v3477_v12 = vld [vmem:[#allocation5 + $0x90] sm:$0xff] }
 0x372   :  { %v1124_v14 = vpop.f32.mrf.mxu1  ;;  %v1192_v8 = vadd.f32 %v4131_v37, %v1155_v52  ;;  %v1502_v44 = vld [vmem:[#allocation8 + $0x120] sm:$0xff] }
 0x373   :  { %v1125_v7 = vadd.f32 %v4119_v23, %v1124_v14  ;;  %v1204_v31 = vadd.f32 %v4131_v37, %v1167_v3  ;;  %v1194_v14 = vadd.f32 %v4131_v37, %v1157_v6  ;;  %v3472_v6 = vld [vmem:[#allocation5 + $0x78] sm:$0xff]  ;;  %v3479_v52 = vld [vmem:[#allocation5 + $0xa0] sm:$0xff] }
 0x374   :  { %v1126_v16 = vpop.f32.mrf.mxu1 }
 0x375   :  { %v1168_v18 = vmul.f32 %v4123_v28, %v1125_v7  ;;  %v1236_v60 = vmax.f32 %v1204_v31, 0.0  ;;  %v1228_v7 = vmax.f32 %v1196_v9, 0.0  ;;  %v1154_v16 = vmul.f32 %v4123_v28, %v1055_v43  ;;  %v1520_v31 = vld [vmem:[#allocation8 + $0x1b0] sm:$0xff]  ;;  %v3475_v43 = vld [vmem:[#allocation5 + $0x80] sm:$0xff] }
 0x376   :  { %v1129_v17 = vpop.f32.mrf.mxu1  ;;  %v3473_v9 = vld [vmem:[#allocation5 + $0x70] sm:$0xff] }
 0x377   :  { %v1130_v19 = vadd.f32 %v4119_v23, %v1129_v17  ;;  %v1205_v2 = vadd.f32 %v4131_v37, %v1168_v18  ;;  %v1193_v23 = vadd.f32 %v4131_v37, %v1156_v10  ;;  %v1226_v17 = vmax.f32 %v1194_v14, 0.0  ;;  %v3476_v10 = vld [vmem:[#allocation5 + $0x98] sm:$0xff] }
 0x378   :  { %v1131_v20 = vpop.f32.mrf.mxu1  ;;  %v1191_v5 = vadd.f32 %v4131_v37, %v1154_v16  ;;  %v4280_v14 = vld [vmem:[#allocation5 + $0xb8] sm:$0xff]  ;;  %v3482_v16 = vld [vmem:[#allocation5 + $0xc8] sm:$0xff] }
 0x379   :  { %v1169_v24 = vmul.f32 %v4123_v28, %v1130_v19  ;;  %v1237_v62 = vmax.f32 %v1205_v2, 0.0  ;;  %v1225_v18 = vmax.f32 %v1193_v23, 0.0  ;;  %v1224_v19 = vmax.f32 %v1192_v8, 0.0  ;;  %v1529_v28 = vld [vmem:[#allocation8 + $0x1f8] sm:$0xff]  ;;  %v1528_v20 = vld [vmem:[#allocation8 + $0x1f0] sm:$0xff]  ;;  %v1523_v2 = vld [vmem:[#allocation8 + $0x1c8] sm:$0xff] }
 0x37a   :  { %v1223_v3 = vmax.f32 %v1191_v5, 0.0  ;;  %1543 = vmatprep.subr.mxu1 %v1529_v28  ;;  %v3483_v23 = vld [vmem:[#allocation5 + $0xc0] sm:$0xff]  ;;  %v3485_v8 = vld [vmem:[#allocation5 + $0xd0] sm:$0xff]  ;;  %v3490_v28 = vld [vmem:[#allocation5 + $0x108] sm:$0xff] }
 0x37b   :  { %v1206_v27 = vadd.f32 %v4131_v37, %v1169_v24  ;;  %v1526_v24 = vld [vmem:[#allocation8 + $0x1e0] sm:$0xff]  ;;  %1544 = vmatpush1.msra.mxu1 %v1528_v20  ;;  %v1524_v37 = vld [vmem:[#allocation8 + $0x1d0] sm:$0xff] }
 0x37c   :  { %1545 = vmatprep.subr.mxu1 %v1527_v21  ;;  %v3487_v5 = vld [vmem:[#allocation5 + $0xe0] sm:$0xff]  ;;  %v1500_v20 = vld [vmem:[#allocation8 + $0x110] sm:$0xff] }
 0x37d   :  { %v1238_v1 = vmax.f32 %v1206_v27, 0.0  ;;  %1546 = vmatpush1.msra.mxu1 %v1526_v24  ;;  %v3460_v27 = vld [vmem:[#allocation5 + $0x18] sm:$0xff]  ;;  %v3491_v21 = vld [vmem:[#allocation5 + $0x100] sm:$0xff] }
 0x37e   :  { %1547 = vmatprep.subr.mxu1 %v1525_v25  ;;  %v3492_v24 = vld [vmem:[#allocation5 + $0x118] sm:$0xff]  ;;  %v1498_v25 = vld [vmem:[#allocation8 + $0x100] sm:$0xff] }
 0x37f   :  { %1305 = vmatpush2.msra.mxu0 %v1238_v1  ;;  %1548 = vmatpush1.msra.mxu1 %v1524_v37  ;;  %v3461_v1 = vld [vmem:[#allocation5 + $0x10] sm:$0xff] }
 0x380   :  { %1306 = vmatprep.subr.mxu0 %v3832_v0  ;;  %1549 = vmatprep.subr.mxu1 %v1523_v2  ;;  %v3493_v37 = vld [vmem:[#allocation5 + $0x110] sm:$0xff]  ;;  %v3495_v2 = vld [vmem:[#allocation5 + $0x120] sm:$0xff] }
 0x381   :  { %1307 = vmatpush2.msra.mxu0 %v1237_v62  ;;  %1550 = vmatpush1.msra.mxu1 %v1522_v29  ;;  %v1517_v62 = vld [vmem:[#allocation8 + $0x198] sm:$0xff]  ;;  %v3497_v29 = vld [vmem:[#allocation5 + $0x130] sm:$0xff] }
 0x382   :  { %1308 = vmatprep.subr.mxu0 %v3832_v0  ;;  %1551 = vmatprep.subr.mxu1 %v1521_v30  ;;  %v3498_v30 = vld [vmem:[#allocation5 + $0x148] sm:$0xff] }
 0x383   :  { %1309 = vmatpush2.msra.mxu0 %v1236_v60  ;;  %1552 = vmatpush1.msra.mxu1 %v1520_v31  ;;  %v3464_v60 = vld [vmem:[#allocation5 + $0x38] sm:$0xff]  ;;  %v3499_v31 = vld [vmem:[#allocation5 + $0x140] sm:$0xff] }
 0x384   :  { %1310 = vmatprep.subr.mxu0 %v3832_v0  ;;  %1553 = vmatprep.subr.mxu1 %v1519_v33  ;;  %v3501_v33 = vld [vmem:[#allocation5 + $0x150] sm:$0xff] }
 0x385   :  { %1311 = vmatpush2.msra.mxu0 %v1235_v49  ;;  %1554 = vmatpush1.msra.mxu1 %v1518_v35  ;;  %v3465_v49 = vld [vmem:[#allocation5 + $0x30] sm:$0xff]  ;;  %v3503_v35 = vld [vmem:[#allocation5 + $0x160] sm:$0xff] }
 0x386   :  { %1312 = vmatprep.subr.mxu0 %v3832_v0  ;;  %1555 = vmatprep.subr.mxu1 %v1517_v62  ;;  %v3504_v62 = vld [vmem:[#allocation5 + $0x178] sm:$0xff] }
 0x387   :  { %1313 = vmatpush2.msra.mxu0 %v1234_v54  ;;  %1556 = vmatpush1.msra.mxu1 %v1516_v36  ;;  %v1509_v54 = vld [vmem:[#allocation8 + $0x158] sm:$0xff]  ;;  %v3505_v36 = vld [vmem:[#allocation5 + $0x170] sm:$0xff] }
 0x388   :  { %1314 = vmatprep.subr.mxu0 %v3832_v0  ;;  %1557 = vmatprep.subr.mxu1 %v1515_v41  ;;  %v3507_v41 = vld [vmem:[#allocation5 + $0x180] sm:$0xff] }
 0x389   :  { %1315 = vmatpush2.msra.mxu0 %v1233_v57  ;;  %1558 = vmatpush1.msra.mxu1 %v1514_v46  ;;  %v3468_v57 = vld [vmem:[#allocation5 + $0x58] sm:$0xff]  ;;  %v3509_v46 = vld [vmem:[#allocation5 + $0x190] sm:$0xff] }
 0x38a   :  { %1316 = vmatprep.subr.mxu0 %v3832_v0  ;;  %1559 = vmatprep.subr.mxu1 %v1513_v47  ;;  %v3510_v47 = vld [vmem:[#allocation5 + $0x1a8] sm:$0xff] }
 0x38b   :  { %1317 = vmatpush2.msra.mxu0 %v1232_v61  ;;  %1560 = vmatpush1.msra.mxu1 %v1512_v48  ;;  %v3469_v61 = vld [vmem:[#allocation5 + $0x50] sm:$0xff]  ;;  %v3511_v48 = vld [vmem:[#allocation5 + $0x1a0] sm:$0xff] }
 0x38c   :  { %1318 = vmatprep.subr.mxu0 %v3832_v0  ;;  %1561 = vmatprep.subr.mxu1 %v1511_v50  ;;  %v3513_v50 = vld [vmem:[#allocation5 + $0x1b0] sm:$0xff] }
 0x38d   :  { %1319 = vmatpush2.msra.mxu0 %v1231_v4  ;;  %1562 = vmatpush1.msra.mxu1 %v1510_v53  ;;  %v1501_v4 = vld [vmem:[#allocation8 + $0x118] sm:$0xff]  ;;  %v3515_v53 = vld [vmem:[#allocation5 + $0x1c0] sm:$0xff] }
 0x38e   :  { %1320 = vmatprep.subr.mxu0 %v3832_v0  ;;  %1563 = vmatprep.subr.mxu1 %v1509_v54  ;;  %v3516_v54 = vld [vmem:[#allocation5 + $0x1d8] sm:$0xff] }
 0x38f   :  { %1321 = vmatpush2.msra.mxu0 %v1230_v11  ;;  %1564 = vmatpush1.msra.mxu1 %v1508_v45  ;;  %v3474_v11 = vld [vmem:[#allocation5 + $0x88] sm:$0xff]  ;;  %v3517_v45 = vld [vmem:[#allocation5 + $0x1d0] sm:$0xff] }
 0x390   :  { %1322 = vmatprep.subr.mxu0 %v3832_v0  ;;  %1565 = vmatprep.subr.mxu1 %v1507_v56  ;;  %v3519_v56 = vld [vmem:[#allocation5 + $0x1e0] sm:$0xff] }
 0x391   :  { %1323 = vmatpush2.msra.mxu0 %v1229_v13  ;;  %1566 = vmatpush1.msra.mxu1 %v1506_v32  ;;  %v3478_v13 = vld [vmem:[#allocation5 + $0xa8] sm:$0xff]  ;;  %v3521_v32 = vld [vmem:[#allocation5 + $0x1f0] sm:$0xff] }
 0x392   :  { %1324 = vmatprep.subr.mxu0 %v3832_v0  ;;  %1567 = vmatprep.subr.mxu1 %v1505_v58  ;;  %v1240_v58 = vld [vmem:[#allocation7 + $0x100] sm:$0xff] }
 0x393   :  { %1325 = vmatpush2.msra.mxu0 %v1228_v7  ;;  %1568 = vmatpush1.msra.mxu1 %v1504_v59  ;;  %v3481_v7 = vld [vmem:[#allocation5 + $0xb0] sm:$0xff]  ;;  %v1880_v59 = vld [vmem:[#allocation11 + $0x178] sm:$0xff] }
 0x394   :  { %1326 = vmatprep.subr.mxu0 %v3832_v0  ;;  %1569 = vmatprep.subr.mxu1 %v1503_v22 }
 0x395   :  { %1327 = vmatpush2.msra.mxu0 %v1227_v38  ;;  %1570 = vmatpush1.msra.mxu1 %v1502_v44  ;;  %v3484_v38 = vld [vmem:[#allocation5 + $0xd8] sm:$0xff]  ;;  %v1878_v44 = vld [vmem:[#allocation11 + $0x168] sm:$0xff] }
 0x396   :  { %1328 = vmatprep.subr.mxu0 %v3832_v0  ;;  %1571 = vmatprep.subr.mxu1 %v1501_v4 }
 0x397   :  { %1329 = vmatpush2.msra.mxu0 %v1226_v17  ;;  %v3486_v17 = vld [vmem:[#allocation5 + $0xe8] sm:$0xff]  ;;  %1572 = vmatpush1.msra.mxu1 %v1500_v20  ;;  %v1871_v20 = vld [vmem:[#allocation11 + $0x130] sm:$0xff] }
 0x398   :  { %1330 = vmatprep.subr.mxu0 %v3832_v0 }
 0x399   :  { %1331 = vmatpush2.msra.mxu0 %v1225_v18  ;;  %v3488_v18 = vld [vmem:[#allocation5 + $0xf8] sm:$0xff] }
 0x39a   :  { %1332 = vmatprep.subr.mxu0 %v3832_v0 }
 0x39b   :  { %1333 = vmatpush2.msra.mxu0 %v1224_v19  ;;  %v3489_v19 = vld [vmem:[#allocation5 + $0xf0] sm:$0xff] }
 0x39c   :  { %1334 = vmatprep.subr.mxu0 %v3832_v0 }
 0x39d   :  { %1335 = vmatpush2.msra.mxu0 %v1223_v3  ;;  %v1499_v3 = vld [vmem:[#allocation8 + $0x108] sm:$0xff] }
 0x39e   :  { %1337 = vmatmul.mubr.f32.vlgmr.msra.gmra.mxu0 %v3459_v26  ;;  %1902 = vmatprep.subr.mxu0 %v3832_v0  ;;  %v3494_v26 = vld [vmem:[#allocation5 + $0x128] sm:$0xff] }
 0x39f   :  { %1341 = vmatprep.mubr.f32.mxu0 %v3460_v27  ;;  %1573 = vmatprep.subr.mxu1 %v1499_v3  ;;  %v3496_v27 = vld [vmem:[#allocation5 + $0x138] sm:$0xff] }
 0x3a0   :  { %1574 = vmatpush1.msra.mxu1 %v1498_v25  ;;  %1903 = vmatpush1.msra.mxu0 %v1880_v59  ;;  %v1250_v59 = vld [vmem:[#allocation7 + $0x150] sm:$0xff] }
 0x3a1   :  { %3379 = vmatprep.subr.mxu1 %v3832_v0  ;;  %1904 = vmatprep.subr.mxu0 %v3832_v0 }
 0x3a2   :  { %1342 = vmatmul.mubr.f32.gmra.mxu0 %v3461_v1  ;;  %v3500_v1 = vld [vmem:[#allocation5 + $0x158] sm:$0xff] }
 0x3a3   :  { %1346 = vmatprep.mubr.f32.mxu0 %v3462_v34  ;;  %v3502_v34 = vld [vmem:[#allocation5 + $0x168] sm:$0xff] }
 0x3a6   :  { %1347 = vmatmul.mubr.f32.gmra.mxu0 %v3463_v39  ;;  %v3506_v39 = vld [vmem:[#allocation5 + $0x188] sm:$0xff] }
 0x3a7   :  { %1351 = vmatprep.mubr.f32.mxu0 %v3464_v60  ;;  %v3508_v60 = vld [vmem:[#allocation5 + $0x198] sm:$0xff] }
 0x3aa   :  { %1352 = vmatmul.mubr.f32.gmra.mxu0 %v3465_v49  ;;  %v3512_v49 = vld [vmem:[#allocation5 + $0x1b8] sm:$0xff] }
 0x3ab   :  { %1356 = vmatprep.mubr.f32.mxu0 %v3466_v51  ;;  %v3514_v51 = vld [vmem:[#allocation5 + $0x1c8] sm:$0xff] }
 0x3ae   :  { %1357 = vmatmul.mubr.f32.gmra.mxu0 %v3467_v55  ;;  %v3518_v55 = vld [vmem:[#allocation5 + $0x1e8] sm:$0xff] }
 0x3af   :  { %1361 = vmatprep.mubr.f32.mxu0 %v3468_v57  ;;  %v3520_v57 = vld [vmem:[#allocation5 + $0x1f8] sm:$0xff] }
 0x3b2   :  { %1362 = vmatmul.mubr.f32.gmra.mxu0 %v3469_v61  ;;  %v1879_v61 = vld [vmem:[#allocation11 + $0x170] sm:$0xff] }
 0x3b3   :  { %1366 = vmatprep.mubr.f32.mxu0 %v3470_v63  ;;  %1905 = vmatpush1.msra.mxu0 %v1879_v61  ;;  %v1891_v61 = vld [vmem:[#allocation11 + $0x1d0] sm:$0xff] }
 0x3b4   :  { %1906 = vmatprep.subr.mxu0 %v3832_v0 }
 0x3b5   :  { %1907 = vmatpush1.msra.mxu0 %v1878_v44  ;;  %v1890_v44 = vld [vmem:[#allocation11 + $0x1c8] sm:$0xff] }
 0x3b6   :  { %1367 = vmatmul.mubr.f32.gmra.mxu0 %v3471_v15  ;;  %v1241_v15 = vld [vmem:[#allocation7 + $0x108] sm:$0xff]  ;;  %1908 = vmatprep.subr.mxu0 %v3832_v0 }
 0x3b7   :  { %1371 = vmatprep.mubr.f32.mxu0 %v3472_v6  ;;  %v1877_v6 = vld [vmem:[#allocation11 + $0x160] sm:$0xff] }
 0x3b8   :  { %1909 = vmatpush1.msra.mxu0 %v1877_v6  ;;  %v1889_v6 = vld [vmem:[#allocation11 + $0x1c0] sm:$0xff] }
 0x3b9   :  { %1910 = vmatprep.subr.mxu0 %v3832_v0 }
 0x3ba   :  { %1372 = vmatmul.mubr.f32.gmra.mxu0 %v3473_v9 }
 0x3bb   :  { %1376 = vmatprep.mubr.f32.mxu0 %v3474_v11 }
 0x3be   :  { %1377 = vmatmul.mubr.f32.gmra.mxu0 %v3475_v43  ;;  %v1876_v43 = vld [vmem:[#allocation11 + $0x158] sm:$0xff] }
 0x3bf   :  { %1381 = vmatprep.mubr.f32.mxu0 %v3476_v10  ;;  %1911 = vmatpush1.msra.mxu0 %v1876_v43  ;;  %v1888_v43 = vld [vmem:[#allocation11 + $0x1b8] sm:$0xff] }
 0x3c0   :  { %1912 = vmatprep.subr.mxu0 %v3832_v0 }
 0x3c2   :  { %1382 = vmatmul.mubr.f32.gmra.mxu0 %v3477_v12  ;;  %v1242_v12 = vld [vmem:[#allocation7 + $0x110] sm:$0xff] }
 0x3c3   :  { %1386 = vmatprep.mubr.f32.mxu0 %v3478_v13  ;;  %v1875_v13 = vld [vmem:[#allocation11 + $0x150] sm:$0xff] }
 0x3c4   :  { %1913 = vmatpush1.msra.mxu0 %v1875_v13  ;;  %v1887_v13 = vld [vmem:[#allocation11 + $0x1b0] sm:$0xff] }
 0x3c5   :  { %1914 = vmatprep.subr.mxu0 %v3832_v0 }
 0x3c6   :  { %1387 = vmatmul.mubr.f32.gmra.mxu0 %v3479_v52 }
 0x3c7   :  { %1391 = vmatprep.mubr.f32.mxu0 %v4280_v14 }
 0x3ca   :  { %1392 = vmatmul.mubr.f32.gmra.mxu0 %v3481_v7 }
 0x3cb   :  { %1396 = vmatprep.mubr.f32.mxu0 %v3482_v16  ;;  %v1874_v16 = vld [vmem:[#allocation11 + $0x148] sm:$0xff] }
 0x3cc   :  { %1915 = vmatpush1.msra.mxu0 %v1874_v16  ;;  %v1886_v16 = vld [vmem:[#allocation11 + $0x1a8] sm:$0xff] }
 0x3cd   :  { %1916 = vmatprep.subr.mxu0 %v3832_v0 }
 0x3ce   :  { %1397 = vmatmul.mubr.f32.gmra.mxu0 %v3483_v23 }
 0x3cf   :  { %1401 = vmatprep.mubr.f32.mxu0 %v3484_v38  ;;  %v1243_v38 = vld [vmem:[#allocation7 + $0x118] sm:$0xff] }
 0x3d2   :  { %1402 = vmatmul.mubr.f32.gmra.mxu0 %v3485_v8  ;;  %v1873_v8 = vld [vmem:[#allocation11 + $0x140] sm:$0xff] }
 0x3d3   :  { %1406 = vmatprep.mubr.f32.mxu0 %v3486_v17  ;;  %1917 = vmatpush1.msra.mxu0 %v1873_v8  ;;  %v1885_v8 = vld [vmem:[#allocation11 + $0x1a0] sm:$0xff] }
 0x3d4   :  { %1918 = vmatprep.subr.mxu0 %v3832_v0 }
 0x3d6   :  { %1407 = vmatmul.mubr.f32.gmra.mxu0 %v3487_v5 }
 0x3d7   :  { %1411 = vmatprep.mubr.f32.mxu0 %v3488_v18  ;;  %v1872_v18 = vld [vmem:[#allocation11 + $0x138] sm:$0xff] }
 0x3d8   :  { %1919 = vmatpush1.msra.mxu0 %v1872_v18 }
 0x3d9   :  { %1920 = vmatprep.subr.mxu0 %v3832_v0 }
 0x3da   :  { %1412 = vmatmul.mubr.f32.gmra.mxu0 %v3489_v19 }
 0x3db   :  { %1416 = vmatprep.mubr.f32.mxu0 %v3490_v28  ;;  %v1244_v28 = vld [vmem:[#allocation7 + $0x120] sm:$0xff]  ;;  %1921 = vmatpush1.msra.mxu0 %v1871_v20 }
 0x3dc   :  { %1922 = vmatprep.subr.mxu0 %v3832_v0 }
 0x3de   :  { %1417 = vmatmul.mubr.f32.gmra.mxu0 %v3491_v21 }
 0x3df   :  { %1421 = vmatprep.mubr.f32.mxu0 %v3492_v24  ;;  %v1870_v24 = vld [vmem:[#allocation11 + $0x128] sm:$0xff] }
 0x3e0   :  { %1923 = vmatpush1.msra.mxu0 %v1870_v24 }
 0x3e1   :  { %1924 = vmatprep.subr.mxu0 %v3832_v0 }
 0x3e2   :  { %1422 = vmatmul.mubr.f32.gmra.mxu0 %v3493_v37  ;;  %v1245_v37 = vld [vmem:[#allocation7 + $0x128] sm:$0xff] }
 0x3e3   :  { %1426 = vmatprep.mubr.f32.mxu0 %v3494_v26  ;;  %v1869_v26 = vld [vmem:[#allocation11 + $0x120] sm:$0xff] }
 0x3e4   :  { %1925 = vmatpush1.msra.mxu0 %v1869_v26  ;;  %v1256_v26 = vld [vmem:[#allocation7 + $0x180] sm:$0xff] }
 0x3e5   :  { %1926 = vmatprep.subr.mxu0 %v3832_v0 }
 0x3e6   :  { %1427 = vmatmul.mubr.f32.gmra.mxu0 %v3495_v2 }
 0x3e7   :  { %1431 = vmatprep.mubr.f32.mxu0 %v3496_v27 }
 0x3ea   :  { %1432 = vmatmul.mubr.f32.gmra.mxu0 %v3497_v29  ;;  %v1868_v29 = vld [vmem:[#allocation11 + $0x118] sm:$0xff] }
 0x3eb   :  { %1436 = vmatprep.mubr.f32.mxu0 %v3498_v30  ;;  %1927 = vmatpush1.msra.mxu0 %v1868_v29 }
 0x3ec   :  { %1928 = vmatprep.subr.mxu0 %v3832_v0 }
 0x3ee   :  { %1437 = vmatmul.mubr.f32.gmra.mxu0 %v3499_v31  ;;  %v1246_v31 = vld [vmem:[#allocation7 + $0x130] sm:$0xff] }
 0x3ef   :  { %1441 = vmatprep.mubr.f32.mxu0 %v3500_v1  ;;  %v1867_v1 = vld [vmem:[#allocation11 + $0x110] sm:$0xff] }
 0x3f0   :  { %1929 = vmatpush1.msra.mxu0 %v1867_v1 }
 0x3f1   :  { %1930 = vmatprep.subr.mxu0 %v3832_v0 }
 0x3f2   :  { %1442 = vmatmul.mubr.f32.gmra.mxu0 %v3501_v33 }
 0x3f3   :  { %1446 = vmatprep.mubr.f32.mxu0 %v3502_v34 }
 0x3f6   :  { %1447 = vmatmul.mubr.f32.gmra.mxu0 %v3503_v35  ;;  %v1866_v35 = vld [vmem:[#allocation11 + $0x108] sm:$0xff] }
 0x3f7   :  { %1451 = vmatprep.mubr.f32.mxu0 %v3504_v62  ;;  %1931 = vmatpush1.msra.mxu0 %v1866_v35 }
 0x3f8   :  { %1932 = vmatprep.subr.mxu0 %v3832_v0 }
 0x3fa   :  { %1452 = vmatmul.mubr.f32.gmra.mxu0 %v3505_v36  ;;  %v1247_v36 = vld [vmem:[#allocation7 + $0x138] sm:$0xff] }
 0x3fb   :  { %1456 = vmatprep.mubr.f32.mxu0 %v3506_v39  ;;  %v1865_v39 = vld [vmem:[#allocation11 + $0x100] sm:$0xff] }
 0x3fc   :  { %1933 = vmatpush1.msra.mxu0 %v1865_v39 }
 0x3fd   :  { %1934 = vmatprep.subr.mxu0 %v3832_v0 }
 0x3fe   :  { %1457 = vmatmul.mubr.f32.gmra.mxu0 %v3507_v41 }
 0x3ff   :  { %1461 = vmatprep.mubr.f32.mxu0 %v3508_v60 }
 0x402   :  { %1462 = vmatmul.mubr.f32.gmra.mxu0 %v3509_v46  ;;  %v1896_v46 = vld [vmem:[#allocation11 + $0x1f8] sm:$0xff] }
 0x403   :  { %1466 = vmatprep.mubr.f32.mxu0 %v3510_v47  ;;  %1935 = vmatpush2.msra.mxu0 %v1896_v46 }
 0x404   :  { %1936 = vmatprep.subr.mxu0 %v3832_v0 }
 0x406   :  { %1467 = vmatmul.mubr.f32.gmra.mxu0 %v3511_v48  ;;  %v1248_v48 = vld [vmem:[#allocation7 + $0x140] sm:$0xff] }
 0x407   :  { %1471 = vmatprep.mubr.f32.mxu0 %v3512_v49  ;;  %v1895_v49 = vld [vmem:[#allocation11 + $0x1f0] sm:$0xff] }
 0x408   :  { %1937 = vmatpush2.msra.mxu0 %v1895_v49 }
 0x409   :  { %1938 = vmatprep.subr.mxu0 %v3832_v0 }
 0x40a   :  { %1472 = vmatmul.mubr.f32.gmra.mxu0 %v3513_v50 }
 0x40b   :  { %1476 = vmatprep.mubr.f32.mxu0 %v3514_v51 }
 0x40e   :  { %1477 = vmatmul.mubr.f32.gmra.mxu0 %v3515_v53  ;;  %v1894_v53 = vld [vmem:[#allocation11 + $0x1e8] sm:$0xff] }
 0x40f   :  { %1481 = vmatprep.mubr.f32.mxu0 %v3516_v54  ;;  %1939 = vmatpush2.msra.mxu0 %v1894_v53 }
 0x410   :  { %1940 = vmatprep.subr.mxu0 %v3832_v0 }
 0x412   :  { %1482 = vmatmul.mubr.f32.gmra.mxu0 %v3517_v45  ;;  %v1249_v45 = vld [vmem:[#allocation7 + $0x148] sm:$0xff] }
 0x413   :  { %1486 = vmatprep.mubr.f32.mxu0 %v3518_v55  ;;  %v1893_v55 = vld [vmem:[#allocation11 + $0x1e0] sm:$0xff] }
 0x414   :  { %1941 = vmatpush2.msra.mxu0 %v1893_v55  ;;  %v1261_v55 = vld [vmem:[#allocation7 + $0x1a8] sm:$0xff] }
 0x415   :  { %1942 = vmatprep.subr.mxu0 %v3832_v0 }
 0x416   :  { %1487 = vmatmul.mubr.f32.gmra.mxu0 %v3519_v56 }
 0x417   :  { %1491 = vmatprep.mubr.f32.mxu0 %v3520_v57 }
 0x41a   :  { %1492 = vmatmul.mubr.f32.gmra.mxu0 %v3521_v32  ;;  %v1892_v32 = vld [vmem:[#allocation11 + $0x1d8] sm:$0xff] }
 0x41b   :  { %1943 = vmatpush2.msra.mxu0 %v1892_v32 }
 0x41c   :  { %1944 = vmatprep.subr.mxu0 %v3832_v0 }
 0x41d   :  { %1945 = vmatpush2.msra.mxu0 %v1891_v61 }
 0x41e   :  { %1946 = vmatprep.subr.mxu0 %v3832_v0 }
 0x41f   :  { %1947 = vmatpush2.msra.mxu0 %v1890_v44 }
 0x420   :  { %1948 = vmatprep.subr.mxu0 %v3832_v0 }
 0x421   :  { %1949 = vmatpush2.msra.mxu0 %v1889_v6  ;;  %v1264_v6 = vld [vmem:[#allocation7 + $0x1c0] sm:$0xff] }
 0x422   :  { %1950 = vmatprep.subr.mxu0 %v3832_v0 }
 0x423   :  { %1951 = vmatpush2.msra.mxu0 %v1888_v43 }
 0x424   :  { %1952 = vmatprep.subr.mxu0 %v3832_v0 }
 0x425   :  { %1953 = vmatpush2.msra.mxu0 %v1887_v13 }
 0x426   :  { %1954 = vmatprep.subr.mxu0 %v3832_v0 }
 0x427   :  { %1955 = vmatpush2.msra.mxu0 %v1886_v16 }
 0x428   :  { %1956 = vmatprep.subr.mxu0 %v3832_v0 }
 0x429   :  { %1957 = vmatpush2.msra.mxu0 %v1885_v8  ;;  %v1267_v8 = vld [vmem:[#allocation7 + $0x1d8] sm:$0xff] }
 0x42a   :  { %1958 = vmatprep.subr.mxu0 %v3832_v0 }
 0x45e   :  { %v1338_v22 = vpop.f32.mrf.mxu0 }
 0x45f   :  { %v1339_v63 = vadd.f32 %v1338_v22, %v1240_v58 }
 0x460   :  { %v1340_v4 = vpop.f32.mrf.mxu0 }
 0x461   :  { %1608 = vmatmul.mubr.f32.vlgmr.msra.gmra.mxu1 %v1339_v63 }
 0x462   :  { %v1343_v9 = vpop.f32.mrf.mxu0  ;;  %1613 = vmatprep.mubr.f32.mxu1 %v3832_v0 }
 0x463   :  { %v1344_v11 = vadd.f32 %v1343_v9, %v1241_v15  ;;  %v1251_v15 = vld [vmem:[#allocation7 + $0x158] sm:$0xff] }
 0x464   :  { %v1345_v10 = vpop.f32.mrf.mxu0 }
 0x465   :  { %1614 = vmatmul.mubr.f32.gmra.mxu1 %v1344_v11 }
 0x466   :  { %v1348_v52 = vpop.f32.mrf.mxu0  ;;  %1619 = vmatprep.mubr.f32.mxu1 %v3832_v0 }
 0x467   :  { %v1349_v7 = vadd.f32 %v1348_v52, %v1242_v12  ;;  %v1252_v12 = vld [vmem:[#allocation7 + $0x160] sm:$0xff] }
 0x468   :  { %v1350_v23 = vpop.f32.mrf.mxu0 }
 0x469   :  { %1620 = vmatmul.mubr.f32.gmra.mxu1 %v1349_v7 }
 0x46a   :  { %v1353_v17 = vpop.f32.mrf.mxu0  ;;  %1625 = vmatprep.mubr.f32.mxu1 %v3832_v0 }
 0x46b   :  { %v1354_v5 = vadd.f32 %v1353_v17, %v1243_v38  ;;  %v1253_v38 = vld [vmem:[#allocation7 + $0x168] sm:$0xff] }
 0x46c   :  { %v1355_v19 = vpop.f32.mrf.mxu0 }
 0x46d   :  { %1626 = vmatmul.mubr.f32.gmra.mxu1 %v1354_v5  ;;  %v1254_v19 = vld [vmem:[#allocation7 + $0x170] sm:$0xff] }
 0x46e   :  { %v1358_v21 = vpop.f32.mrf.mxu0  ;;  %1631 = vmatprep.mubr.f32.mxu1 %v3832_v0 }
 0x46f   :  { %v1359_v3 = vadd.f32 %v1358_v21, %v1244_v28 }
 0x470   :  { %v1360_v25 = vpop.f32.mrf.mxu0 }
 0x471   :  { %1632 = vmatmul.mubr.f32.gmra.mxu1 %v1359_v3  ;;  %v1255_v3 = vld [vmem:[#allocation7 + $0x178] sm:$0xff] }
 0x472   :  { %v1363_v2 = vpop.f32.mrf.mxu0  ;;  %1637 = vmatprep.mubr.f32.mxu1 %v3832_v0 }
 0x473   :  { %v1364_v27 = vadd.f32 %v1363_v2, %v1245_v37 }
 0x474   :  { %v1365_v30 = vpop.f32.mrf.mxu0 }
 0x475   :  { %1638 = vmatmul.mubr.f32.gmra.mxu1 %v1364_v27  ;;  %v1257_v30 = vld [vmem:[#allocation7 + $0x188] sm:$0xff] }
 0x476   :  { %v1368_v33 = vpop.f32.mrf.mxu0  ;;  %1643 = vmatprep.mubr.f32.mxu1 %v3832_v0 }
 0x477   :  { %v1369_v34 = vadd.f32 %v1368_v33, %v1246_v31  ;;  %v1884_v31 = vld [vmem:[#allocation11 + $0x198] sm:$0xff] }
 0x478   :  { %v1370_v62 = vpop.f32.mrf.mxu0  ;;  %1959 = vmatpush2.msra.mxu0 %v1884_v31 }
 0x479   :  { %1644 = vmatmul.mubr.f32.gmra.mxu1 %v1369_v34  ;;  %1960 = vmatprep.subr.mxu0 %v3832_v0  ;;  %v1883_v34 = vld [vmem:[#allocation11 + $0x190] sm:$0xff]  ;;  %v1258_v62 = vld [vmem:[#allocation7 + $0x190] sm:$0xff] }
 0x47a   :  { %v1373_v41 = vpop.f32.mrf.mxu0  ;;  %1649 = vmatprep.mubr.f32.mxu1 %v3832_v0  ;;  %1961 = vmatpush2.msra.mxu0 %v1883_v34  ;;  %v1531_v34 = vld [vmem:[#allocation10 + $0x1] ss:$4 sm:$0x3] }
 0x47b   :  { %v1374_v60 = vadd.f32 %v1373_v41, %v1247_v36  ;;  %1962 = vmatprep.subr.mxu0 %v3832_v0  ;;  %v1882_v36 = vld [vmem:[#allocation11 + $0x188] sm:$0xff] }
 0x47c   :  { %v1375_v47 = vpop.f32.mrf.mxu0  ;;  %1963 = vmatpush2.msra.mxu0 %v1882_v36 }
 0x47d   :  { %1650 = vmatmul.mubr.f32.gmra.mxu1 %v1374_v60  ;;  %1964 = vmatprep.subr.mxu0 %v3832_v0  ;;  %v1881_v60 = vld [vmem:[#allocation11 + $0x180] sm:$0xff]  ;;  %v1259_v47 = vld [vmem:[#allocation7 + $0x198] sm:$0xff] }
 0x47e   :  { %v1378_v50 = vpop.f32.mrf.mxu0  ;;  %1655 = vmatprep.mubr.f32.mxu1 %v3832_v0  ;;  %1965 = vmatpush2.msra.mxu0 %v1881_v60 }
 0x47f   :  { %v1379_v51 = vadd.f32 %v1378_v50, %v1248_v48  ;;  %2266 = vmatprep.subr.mxu0 %v3832_v0 }
 0x480   :  { %v1380_v54 = vpop.f32.mrf.mxu0 }
 0x481   :  { %1656 = vmatmul.mubr.f32.gmra.mxu1 %v1379_v51  ;;  %v1260_v51 = vld [vmem:[#allocation7 + $0x1a0] sm:$0xff] }
 0x482   :  { %v1383_v56 = vpop.f32.mrf.mxu0  ;;  %1661 = vmatprep.mubr.f32.mxu1 %v3832_v0 }
 0x483   :  { %v1384_v57 = vadd.f32 %v1383_v56, %v1249_v45 }
 0x484   :  { %v1385_v58 = vpop.f32.mrf.mxu0 }
 0x485   :  { %1662 = vmatmul.mubr.f32.gmra.mxu1 %v1384_v57  ;;  %v1262_v58 = vld [vmem:[#allocation7 + $0x1b0] sm:$0xff] }
 0x486   :  { %v1388_v22 = vpop.f32.mrf.mxu0  ;;  %1667 = vmatprep.mubr.f32.mxu1 %v3832_v0 }
 0x487   :  { %v1389_v63 = vadd.f32 %v1388_v22, %v1250_v59 }
 0x488   :  { %v1390_v4 = vpop.f32.mrf.mxu0 }
 0x489   :  { %1668 = vmatmul.mubr.f32.gmra.mxu1 %v1389_v63  ;;  %v1263_v63 = vld [vmem:[#allocation7 + $0x1b8] sm:$0xff] }
 0x48a   :  { %v1393_v9 = vpop.f32.mrf.mxu0  ;;  %1673 = vmatprep.mubr.f32.mxu1 %v3832_v0 }
 0x48b   :  { %v1394_v11 = vadd.f32 %v1393_v9, %v1251_v15 }
 0x48c   :  { %v1395_v10 = vpop.f32.mrf.mxu0 }
 0x48d   :  { %1674 = vmatmul.mubr.f32.gmra.mxu1 %v1394_v11  ;;  %v1265_v10 = vld [vmem:[#allocation7 + $0x1c8] sm:$0xff] }
 0x48e   :  { %v1398_v52 = vpop.f32.mrf.mxu0  ;;  %1679 = vmatprep.mubr.f32.mxu1 %v3832_v0 }
 0x48f   :  { %v1399_v7 = vadd.f32 %v1398_v52, %v1252_v12 }
 0x490   :  { %v1400_v23 = vpop.f32.mrf.mxu0 }
 0x491   :  { %1680 = vmatmul.mubr.f32.gmra.mxu1 %v1399_v7  ;;  %v1266_v7 = vld [vmem:[#allocation7 + $0x1d0] sm:$0xff] }
 0x492   :  { %v1403_v17 = vpop.f32.mrf.mxu0  ;;  %1685 = vmatprep.mubr.f32.mxu1 %v3832_v0 }
 0x493   :  { %v1404_v5 = vadd.f32 %v1403_v17, %v1253_v38 }
 0x494   :  { %v1405_v18 = vpop.f32.mrf.mxu0 }
 0x495   :  { %1686 = vmatmul.mubr.f32.gmra.mxu1 %v1404_v5 }
 0x496   :  { %v1408_v28 = vpop.f32.mrf.mxu0  ;;  %1691 = vmatprep.mubr.f32.mxu1 %v3832_v0 }
 0x497   :  { %v1409_v20 = vadd.f32 %v1408_v28, %v1254_v19  ;;  %v1268_v19 = vld [vmem:[#allocation7 + $0x1e0] sm:$0xff] }
 0x498   :  { %v1410_v21 = vpop.f32.mrf.mxu0 }
 0x499   :  { %1692 = vmatmul.mubr.f32.gmra.mxu1 %v1409_v20 }
 0x49a   :  { %v1413_v24 = vpop.f32.mrf.mxu0  ;;  %1697 = vmatprep.mubr.f32.mxu1 %v3832_v0 }
 0x49b   :  { %v1414_v25 = vadd.f32 %v1413_v24, %v1255_v3  ;;  %v1269_v3 = vld [vmem:[#allocation7 + $0x1e8] sm:$0xff] }
 0x49c   :  { %v1415_v37 = vpop.f32.mrf.mxu0 }
 0x49d   :  { %1698 = vmatmul.mubr.f32.gmra.mxu1 %v1414_v25 }
 0x49e   :  { %v1418_v2 = vpop.f32.mrf.mxu0  ;;  %1703 = vmatprep.mubr.f32.mxu1 %v3832_v0 }
 0x49f   :  { %v1419_v27 = vadd.f32 %v1418_v2, %v1256_v26  ;;  %v1270_v26 = vld [vmem:[#allocation7 + $0x1f0] sm:$0xff] }
 0x4a0   :  { %v1420_v29 = vpop.f32.mrf.mxu0 }
 0x4a1   :  { %1704 = vmatmul.mubr.f32.gmra.mxu1 %v1419_v27 }
 0x4a2   :  { %v1423_v1 = vpop.f32.mrf.mxu0  ;;  %1709 = vmatprep.mubr.f32.mxu1 %v3832_v0 }
 0x4a3   :  { %v1424_v33 = vadd.f32 %v1423_v1, %v1257_v30  ;;  %v1271_v30 = vld [vmem:[#allocation7 + $0x1f8] sm:$0xff] }
 0x4a4   :  { %v1425_v35 = vpop.f32.mrf.mxu0 }
 0x4a5   :  { %1710 = vmatmul.mubr.f32.gmra.mxu1 %v1424_v33  ;;  %v4349_v35 = vrot.slane %v1531_v34, %v4032_v40 }
 0x4a6   :  { %v1428_v39 = vpop.f32.mrf.mxu0  ;;  %1715 = vmatprep.mubr.f32.mxu1 %v3832_v0 }
 0x4a7   :  { %v1429_v41 = vadd.f32 %v1428_v39, %v1258_v62  ;;  %v4352_v62 = vrot.slane %v1531_v34, %v4034_v42 }
 0x4a8   :  { %v1430_v46 = vpop.f32.mrf.mxu0 }
 0x4a9   :  { %1716 = vmatmul.mubr.f32.gmra.mxu1 %v1429_v41 }
 0x4aa   :  { %v1433_v48 = vpop.f32.mrf.mxu0  ;;  %1721 = vmatprep.mubr.f32.mxu1 %v3832_v0 }
 0x4ab   :  { %v1434_v49 = vadd.f32 %v1433_v48, %v1259_v47 }
 0x4ac   :  { %v1435_v50 = vpop.f32.mrf.mxu0 }
 0x4ad   :  { %1722 = vmatmul.mubr.f32.gmra.mxu1 %v1434_v49 }
 0x4ae   :  { %v1438_v53 = vpop.f32.mrf.mxu0  ;;  %1727 = vmatprep.mubr.f32.mxu1 %v3832_v0 }
 0x4af   :  { %v1439_v54 = vadd.f32 %v1438_v53, %v1260_v51 }
 0x4b0   :  { %v1440_v45 = vpop.f32.mrf.mxu0 }
 0x4b1   :  { %1728 = vmatmul.mubr.f32.gmra.mxu1 %v1439_v54 }
 0x4b2   :  { %v1443_v56 = vpop.f32.mrf.mxu0  ;;  %1733 = vmatprep.mubr.f32.mxu1 %v3832_v0 }
 0x4b3   :  { %v1444_v57 = vadd.f32 %v1443_v56, %v1261_v55 }
 0x4b4   :  { %v1445_v32 = vpop.f32.mrf.mxu0 }
 0x4b5   :  { %1734 = vmatmul.mubr.f32.gmra.mxu1 %v1444_v57 }
 0x4b6   :  { %v1448_v59 = vpop.f32.mrf.mxu0  ;;  %1739 = vmatprep.mubr.f32.mxu1 %v3832_v0 }
 0x4b7   :  { %v1449_v61 = vadd.f32 %v1448_v59, %v1262_v58 }
 0x4b8   :  { %v1450_v22 = vpop.f32.mrf.mxu0 }
 0x4b9   :  { %1740 = vmatmul.mubr.f32.gmra.mxu1 %v1449_v61 }
 0x4ba   :  { %v1453_v44 = vpop.f32.mrf.mxu0  ;;  %1745 = vmatprep.mubr.f32.mxu1 %v3832_v0 }
 0x4bb   :  { %v1454_v4 = vadd.f32 %v1453_v44, %v1263_v63 }
 0x4bc   :  { %v1455_v15 = vpop.f32.mrf.mxu0 }
 0x4bd   :  { %1746 = vmatmul.mubr.f32.gmra.mxu1 %v1454_v4 }
 0x4be   :  { %v1458_v9 = vpop.f32.mrf.mxu0  ;;  %1751 = vmatprep.mubr.f32.mxu1 %v3832_v0 }
 0x4bf   :  { %v1459_v11 = vadd.f32 %v1458_v9, %v1264_v6 }
 0x4c0   :  { %v1460_v43 = vpop.f32.mrf.mxu0 }
 0x4c1   :  { %1752 = vmatmul.mubr.f32.gmra.mxu1 %v1459_v11 }
 0x4c2   :  { %v1463_v12 = vpop.f32.mrf.mxu0  ;;  %1757 = vmatprep.mubr.f32.mxu1 %v3832_v0 }
 0x4c3   :  { %v1464_v13 = vadd.f32 %v1463_v12, %v1265_v10 }
 0x4c4   :  { %v1465_v52 = vpop.f32.mrf.mxu0 }
 0x4c5   :  { %1758 = vmatmul.mubr.f32.gmra.mxu1 %v1464_v13 }
 0x4c6   :  { %v1468_v16 = vpop.f32.mrf.mxu0  ;;  %1763 = vmatprep.mubr.f32.mxu1 %v3832_v0 }
 0x4c7   :  { %v1469_v23 = vadd.f32 %v1468_v16, %v1266_v7 }
 0x4c8   :  { %v1470_v38 = vpop.f32.mrf.mxu0 }
 0x4c9   :  { %1764 = vmatmul.mubr.f32.gmra.mxu1 %v1469_v23 }
 0x4ca   :  { %v1473_v17 = vpop.f32.mrf.mxu0  ;;  %1769 = vmatprep.mubr.f32.mxu1 %v3832_v0 }
 0x4cb   :  { %v1474_v5 = vadd.f32 %v1473_v17, %v1267_v8 }
 0x4cc   :  { %v1475_v18 = vpop.f32.mrf.mxu0 }
 0x4cd   :  { %1770 = vmatmul.mubr.f32.gmra.mxu1 %v1474_v5 }
 0x4ce   :  { %v1478_v28 = vpop.f32.mrf.mxu0  ;;  %1775 = vmatprep.mubr.f32.mxu1 %v3832_v0 }
 0x4cf   :  { %v1479_v20 = vadd.f32 %v1478_v28, %v1268_v19 }
 0x4d0   :  { %v1480_v21 = vpop.f32.mrf.mxu0 }
 0x4d1   :  { %1776 = vmatmul.mubr.f32.gmra.mxu1 %v1479_v20 }
 0x4d2   :  { %v1483_v24 = vpop.f32.mrf.mxu0  ;;  %1781 = vmatprep.mubr.f32.mxu1 %v3832_v0 }
 0x4d3   :  { %v1484_v25 = vadd.f32 %v1483_v24, %v1269_v3 }
 0x4d4   :  { %v1485_v37 = vpop.f32.mrf.mxu0 }
 0x4d5   :  { %1782 = vmatmul.mubr.f32.gmra.mxu1 %v1484_v25 }
 0x4d6   :  { %v1488_v2 = vpop.f32.mrf.mxu0  ;;  %1787 = vmatprep.mubr.f32.mxu1 %v3832_v0 }
 0x4d7   :  { %v1489_v27 = vadd.f32 %v1488_v2, %v1270_v26 }
 0x4d8   :  { %v1490_v29 = vpop.f32.mrf.mxu0 }
 0x4d9   :  { %1788 = vmatmul.mubr.f32.gmra.mxu1 %v1489_v27 }
 0x4da   :  { %v1493_v31 = vpop.f32.mrf.mxu0  ;;  %1793 = vmatprep.mubr.f32.mxu1 %v3832_v0 }
 0x4db   :  { %v1494_v1 = vadd.f32 %v1493_v31, %v1271_v30 }
 0x4dc   :  { %v1495_v33 = vpop.f32.mrf.mxu0 }
 0x4dd   :  { %1794 = vmatmul.mubr.f32.gmra.mxu1 %v1494_v1 }
 0x4de   :  { %2385 = vmatprep.mubr.f32.mxu1 %v4280_v14 }
 0x521   :  { %v1609_v36 = vpop.f32.mrf.mxu1 }
 0x522   :  { %v1610_v39 = vadd.f32 %v1609_v36, %v4349_v35 }
 0x523   :  { %v1611_v41 = vpop.f32.mrf.mxu1 }
 0x524   :  { %v1612_v60 = vadd.f32 %v1611_v41, %v4352_v62  ;;  %v1800_v48 = vmax.f32 %v1610_v39, 0.0 }
 0x525   :  { %v1615_v46 = vpop.f32.mrf.mxu1 }
 0x526   :  { %v1801_v47 = vmax.f32 %v1612_v60, 0.0  ;;  %v1616_v49 = vadd.f32 %v1615_v46, %v4349_v35 }
 0x527   :  { %v1617_v50 = vpop.f32.mrf.mxu1 }
 0x528   :  { %v1618_v14 = vadd.f32 %v1617_v50, %v4352_v62  ;;  %1966 = vmatprep.mubr.f32.mxu0 %v1801_v47  ;;  %v1802_v54 = vmax.f32 %v1616_v49, 0.0 }
 0x529   :  { %v1621_v51 = vpop.f32.mrf.mxu1  ;;  %1967 = vmatmul.mubr.f32.vlgmr.msra.gmra.mxu0 %v1800_v48 }
 0x52a   :  { %v1803_v53 = vmax.f32 %v1618_v14, 0.0  ;;  %v1622_v45 = vadd.f32 %v1621_v51, %v4349_v35 }
 0x52b   :  { %v1623_v55 = vpop.f32.mrf.mxu1 }
 0x52c   :  { %v1624_v56 = vadd.f32 %v1623_v55, %v4352_v62  ;;  %1971 = vmatprep.mubr.f32.mxu0 %v1803_v53  ;;  %v1804_v58 = vmax.f32 %v1622_v45, 0.0 }
 0x52d   :  { %v1627_v57 = vpop.f32.mrf.mxu1  ;;  %1972 = vmatmul.mubr.f32.gmra.mxu0 %v1802_v54 }
 0x52e   :  { %v1805_v32 = vmax.f32 %v1624_v56, 0.0  ;;  %v1628_v59 = vadd.f32 %v1627_v57, %v4349_v35 }
 0x52f   :  { %v1629_v61 = vpop.f32.mrf.mxu1 }
 0x530   :  { %v1630_v22 = vadd.f32 %v1629_v61, %v4352_v62  ;;  %1976 = vmatprep.mubr.f32.mxu0 %v1805_v32  ;;  %v1806_v4 = vmax.f32 %v1628_v59, 0.0 }
 0x531   :  { %v1633_v63 = vpop.f32.mrf.mxu1  ;;  %1977 = vmatmul.mubr.f32.gmra.mxu0 %v1804_v58 }
 0x532   :  { %v1807_v44 = vmax.f32 %v1630_v22, 0.0  ;;  %v1634_v15 = vadd.f32 %v1633_v63, %v4349_v35 }
 0x533   :  { %v1635_v6 = vpop.f32.mrf.mxu1 }
 0x534   :  { %v1636_v9 = vadd.f32 %v1635_v6, %v4352_v62  ;;  %1981 = vmatprep.mubr.f32.mxu0 %v1807_v44  ;;  %v1808_v10 = vmax.f32 %v1634_v15, 0.0 }
 0x535   :  { %v1639_v11 = vpop.f32.mrf.mxu1  ;;  %1982 = vmatmul.mubr.f32.gmra.mxu0 %v1806_v4 }
 0x536   :  { %v1809_v43 = vmax.f32 %v1636_v9, 0.0  ;;  %v1640_v12 = vadd.f32 %v1639_v11, %v4349_v35 }
 0x537   :  { %v1641_v13 = vpop.f32.mrf.mxu1 }
 0x538   :  { %v1642_v52 = vadd.f32 %v1641_v13, %v4352_v62  ;;  %1986 = vmatprep.mubr.f32.mxu0 %v1809_v43  ;;  %v1810_v23 = vmax.f32 %v1640_v12, 0.0 }
 0x539   :  { %v1645_v7 = vpop.f32.mrf.mxu1  ;;  %1987 = vmatmul.mubr.f32.gmra.mxu0 %v1808_v10 }
 0x53a   :  { %v1811_v16 = vmax.f32 %v1642_v52, 0.0  ;;  %v1646_v38 = vadd.f32 %v1645_v7, %v4349_v35 }
 0x53b   :  { %v1647_v8 = vpop.f32.mrf.mxu1 }
 0x53c   :  { %v1648_v17 = vadd.f32 %v1647_v8, %v4352_v62  ;;  %1991 = vmatprep.mubr.f32.mxu0 %v1811_v16  ;;  %v1812_v19 = vmax.f32 %v1646_v38, 0.0 }
 0x53d   :  { %v1651_v5 = vpop.f32.mrf.mxu1  ;;  %1992 = vmatmul.mubr.f32.gmra.mxu0 %v1810_v23 }
 0x53e   :  { %v1813_v18 = vmax.f32 %v1648_v17, 0.0  ;;  %v1652_v28 = vadd.f32 %v1651_v5, %v4349_v35 }
 0x53f   :  { %v1653_v20 = vpop.f32.mrf.mxu1 }
 0x540   :  { %v1654_v21 = vadd.f32 %v1653_v20, %v4352_v62  ;;  %1996 = vmatprep.mubr.f32.mxu0 %v1813_v18  ;;  %v1814_v25 = vmax.f32 %v1652_v28, 0.0 }
 0x541   :  { %v1657_v3 = vpop.f32.mrf.mxu1  ;;  %1997 = vmatmul.mubr.f32.gmra.mxu0 %v1812_v19 }
 0x542   :  { %v1815_v24 = vmax.f32 %v1654_v21, 0.0  ;;  %v1658_v37 = vadd.f32 %v1657_v3, %v4349_v35 }
 0x543   :  { %v1659_v26 = vpop.f32.mrf.mxu1 }
 0x544   :  { %v1660_v2 = vadd.f32 %v1659_v26, %v4352_v62  ;;  %2001 = vmatprep.mubr.f32.mxu0 %v1815_v24  ;;  %v1816_v30 = vmax.f32 %v1658_v37, 0.0 }
 0x545   :  { %v1663_v27 = vpop.f32.mrf.mxu1  ;;  %2002 = vmatmul.mubr.f32.gmra.mxu0 %v1814_v25 }
 0x546   :  { %v1817_v29 = vmax.f32 %v1660_v2, 0.0  ;;  %v1664_v31 = vadd.f32 %v1663_v27, %v4349_v35 }
 0x547   :  { %v1665_v1 = vpop.f32.mrf.mxu1 }
 0x548   :  { %v1666_v33 = vadd.f32 %v1665_v1, %v4352_v62  ;;  %2006 = vmatprep.mubr.f32.mxu0 %v1817_v29  ;;  %v1818_v39 = vmax.f32 %v1664_v31, 0.0 }
 0x549   :  { %v1669_v34 = vpop.f32.mrf.mxu1  ;;  %2007 = vmatmul.mubr.f32.gmra.mxu0 %v1816_v30 }
 0x54a   :  { %v1819_v36 = vmax.f32 %v1666_v33, 0.0  ;;  %v1670_v41 = vadd.f32 %v1669_v34, %v4349_v35 }
 0x54b   :  { %v1671_v60 = vpop.f32.mrf.mxu1 }
 0x54c   :  { %v1672_v46 = vadd.f32 %v1671_v60, %v4352_v62  ;;  %2011 = vmatprep.mubr.f32.mxu0 %v1819_v36  ;;  %v1820_v49 = vmax.f32 %v1670_v41, 0.0 }
 0x54d   :  { %v1675_v47 = vpop.f32.mrf.mxu1  ;;  %2012 = vmatmul.mubr.f32.gmra.mxu0 %v1818_v39 }
 0x54e   :  { %v1821_v48 = vmax.f32 %v1672_v46, 0.0  ;;  %v1676_v50 = vadd.f32 %v1675_v47, %v4349_v35 }
 0x54f   :  { %v1677_v14 = vpop.f32.mrf.mxu1 }
 0x550   :  { %v1678_v51 = vadd.f32 %v1677_v14, %v4352_v62  ;;  %2016 = vmatprep.mubr.f32.mxu0 %v1821_v48  ;;  %v1822_v45 = vmax.f32 %v1676_v50, 0.0 }
 0x551   :  { %v1681_v53 = vpop.f32.mrf.mxu1  ;;  %2017 = vmatmul.mubr.f32.gmra.mxu0 %v1820_v49 }
 0x552   :  { %v1823_v54 = vmax.f32 %v1678_v51, 0.0  ;;  %v1682_v55 = vadd.f32 %v1681_v53, %v4349_v35 }
 0x553   :  { %v1683_v56 = vpop.f32.mrf.mxu1 }
 0x554   :  { %v1684_v57 = vadd.f32 %v1683_v56, %v4352_v62  ;;  %2021 = vmatprep.mubr.f32.mxu0 %v1823_v54  ;;  %v1824_v59 = vmax.f32 %v1682_v55, 0.0 }
 0x555   :  { %v1687_v32 = vpop.f32.mrf.mxu1  ;;  %2022 = vmatmul.mubr.f32.gmra.mxu0 %v1822_v45 }
 0x556   :  { %v1825_v58 = vmax.f32 %v1684_v57, 0.0  ;;  %v1688_v61 = vadd.f32 %v1687_v32, %v4349_v35 }
 0x557   :  { %v1689_v22 = vpop.f32.mrf.mxu1 }
 0x558   :  { %v1690_v63 = vadd.f32 %v1689_v22, %v4352_v62  ;;  %2026 = vmatprep.mubr.f32.mxu0 %v1825_v58  ;;  %v1826_v15 = vmax.f32 %v1688_v61, 0.0 }
 0x559   :  { %v1693_v44 = vpop.f32.mrf.mxu1  ;;  %2027 = vmatmul.mubr.f32.gmra.mxu0 %v1824_v59 }
 0x55a   :  { %v1827_v4 = vmax.f32 %v1690_v63, 0.0  ;;  %v1694_v6 = vadd.f32 %v1693_v44, %v4349_v35 }
 0x55b   :  { %v1695_v9 = vpop.f32.mrf.mxu1 }
 0x55c   :  { %v1696_v11 = vadd.f32 %v1695_v9, %v4352_v62  ;;  %2031 = vmatprep.mubr.f32.mxu0 %v1827_v4  ;;  %v1828_v12 = vmax.f32 %v1694_v6, 0.0 }
 0x55d   :  { %v1699_v43 = vpop.f32.mrf.mxu1  ;;  %2032 = vmatmul.mubr.f32.gmra.mxu0 %v1826_v15 }
 0x55e   :  { %v1829_v10 = vmax.f32 %v1696_v11, 0.0  ;;  %v1700_v13 = vadd.f32 %v1699_v43, %v4349_v35 }
 0x55f   :  { %v1701_v52 = vpop.f32.mrf.mxu1 }
 0x560   :  { %v1702_v7 = vadd.f32 %v1701_v52, %v4352_v62  ;;  %2036 = vmatprep.mubr.f32.mxu0 %v1829_v10  ;;  %v1830_v38 = vmax.f32 %v1700_v13, 0.0 }
 0x561   :  { %v1705_v16 = vpop.f32.mrf.mxu1  ;;  %2037 = vmatmul.mubr.f32.gmra.mxu0 %v1828_v12 }
 0x562   :  { %v1831_v23 = vmax.f32 %v1702_v7, 0.0  ;;  %v1706_v8 = vadd.f32 %v1705_v16, %v4349_v35 }
 0x563   :  { %v1707_v17 = vpop.f32.mrf.mxu1 }
 0x564   :  { %v1708_v5 = vadd.f32 %v1707_v17, %v4352_v62  ;;  %2041 = vmatprep.mubr.f32.mxu0 %v1831_v23  ;;  %v1832_v28 = vmax.f32 %v1706_v8, 0.0 }
 0x565   :  { %v1711_v18 = vpop.f32.mrf.mxu1  ;;  %2042 = vmatmul.mubr.f32.gmra.mxu0 %v1830_v38 }
 0x566   :  { %v1833_v19 = vmax.f32 %v1708_v5, 0.0  ;;  %v1712_v20 = vadd.f32 %v1711_v18, %v4349_v35 }
 0x567   :  { %v1713_v21 = vpop.f32.mrf.mxu1 }
 0x568   :  { %v1714_v3 = vadd.f32 %v1713_v21, %v4352_v62  ;;  %2046 = vmatprep.mubr.f32.mxu0 %v1833_v19  ;;  %v1834_v37 = vmax.f32 %v1712_v20, 0.0 }
 0x569   :  { %v1717_v24 = vpop.f32.mrf.mxu1  ;;  %2047 = vmatmul.mubr.f32.gmra.mxu0 %v1832_v28 }
 0x56a   :  { %v1835_v25 = vmax.f32 %v1714_v3, 0.0  ;;  %v1718_v26 = vadd.f32 %v1717_v24, %v4349_v35 }
 0x56b   :  { %v1719_v2 = vpop.f32.mrf.mxu1 }
 0x56c   :  { %v1720_v27 = vadd.f32 %v1719_v2, %v4352_v62  ;;  %2051 = vmatprep.mubr.f32.mxu0 %v1835_v25  ;;  %v1836_v31 = vmax.f32 %v1718_v26, 0.0 }
 0x56d   :  { %v1723_v29 = vpop.f32.mrf.mxu1  ;;  %2052 = vmatmul.mubr.f32.gmra.mxu0 %v1834_v37 }
 0x56e   :  { %v1837_v30 = vmax.f32 %v1720_v27, 0.0  ;;  %v1724_v1 = vadd.f32 %v1723_v29, %v4349_v35 }
 0x56f   :  { %v1725_v33 = vpop.f32.mrf.mxu1 }
 0x570   :  { %v1726_v34 = vadd.f32 %v1725_v33, %v4352_v62  ;;  %2056 = vmatprep.mubr.f32.mxu0 %v1837_v30  ;;  %v1838_v41 = vmax.f32 %v1724_v1, 0.0 }
 0x571   :  { %v1729_v36 = vpop.f32.mrf.mxu1  ;;  %2057 = vmatmul.mubr.f32.gmra.mxu0 %v1836_v31 }
 0x572   :  { %v1839_v39 = vmax.f32 %v1726_v34, 0.0  ;;  %v1730_v60 = vadd.f32 %v1729_v36, %v4349_v35 }
 0x573   :  { %v1731_v46 = vpop.f32.mrf.mxu1 }
 0x574   :  { %v1732_v47 = vadd.f32 %v1731_v46, %v4352_v62  ;;  %2061 = vmatprep.mubr.f32.mxu0 %v1839_v39  ;;  %v1840_v50 = vmax.f32 %v1730_v60, 0.0 }
 0x575   :  { %v1735_v48 = vpop.f32.mrf.mxu1  ;;  %2062 = vmatmul.mubr.f32.gmra.mxu0 %v1838_v41 }
 0x576   :  { %v1841_v49 = vmax.f32 %v1732_v47, 0.0  ;;  %v1736_v14 = vadd.f32 %v1735_v48, %v4349_v35 }
 0x577   :  { %v1737_v51 = vpop.f32.mrf.mxu1 }
 0x578   :  { %v1738_v53 = vadd.f32 %v1737_v51, %v4352_v62  ;;  %2066 = vmatprep.mubr.f32.mxu0 %v1841_v49  ;;  %v1842_v55 = vmax.f32 %v1736_v14, 0.0 }
 0x579   :  { %v1741_v54 = vpop.f32.mrf.mxu1  ;;  %2067 = vmatmul.mubr.f32.gmra.mxu0 %v1840_v50 }
 0x57a   :  { %v1843_v45 = vmax.f32 %v1738_v53, 0.0  ;;  %v1742_v56 = vadd.f32 %v1741_v54, %v4349_v35 }
 0x57b   :  { %v1743_v57 = vpop.f32.mrf.mxu1 }
 0x57c   :  { %v1744_v32 = vadd.f32 %v1743_v57, %v4352_v62  ;;  %2071 = vmatprep.mubr.f32.mxu0 %v1843_v45  ;;  %v1844_v61 = vmax.f32 %v1742_v56, 0.0  ;;  %v3522_v56 = vld [vmem:[#allocation5 + $0x8] sm:$0xff] }
 0x57d   :  { %v1747_v58 = vpop.f32.mrf.mxu1  ;;  %2072 = vmatmul.mubr.f32.gmra.mxu0 %v1842_v55 }
 0x57e   :  { %v1845_v59 = vmax.f32 %v1744_v32, 0.0  ;;  %v1748_v22 = vadd.f32 %v1747_v58, %v4349_v35 }
 0x57f   :  { %v1749_v63 = vpop.f32.mrf.mxu1 }
 0x580   :  { %v1750_v44 = vadd.f32 %v1749_v63, %v4352_v62  ;;  %2076 = vmatprep.mubr.f32.mxu0 %v1845_v59  ;;  %v1846_v6 = vmax.f32 %v1748_v22, 0.0 }
 0x581   :  { %v1753_v4 = vpop.f32.mrf.mxu1  ;;  %2077 = vmatmul.mubr.f32.gmra.mxu0 %v1844_v61 }
 0x582   :  { %v1847_v15 = vmax.f32 %v1750_v44, 0.0  ;;  %v1754_v9 = vadd.f32 %v1753_v4, %v4349_v35 }
 0x583   :  { %v1755_v11 = vpop.f32.mrf.mxu1 }
 0x584   :  { %v1756_v43 = vadd.f32 %v1755_v11, %v4352_v62  ;;  %2081 = vmatprep.mubr.f32.mxu0 %v1847_v15  ;;  %v1848_v13 = vmax.f32 %v1754_v9, 0.0 }
 0x585   :  { %v1759_v10 = vpop.f32.mrf.mxu1  ;;  %2082 = vmatmul.mubr.f32.gmra.mxu0 %v1846_v6 }
 0x586   :  { %v1849_v12 = vmax.f32 %v1756_v43, 0.0  ;;  %v1760_v52 = vadd.f32 %v1759_v10, %v4349_v35 }
 0x587   :  { %v1761_v7 = vpop.f32.mrf.mxu1 }
 0x588   :  { %v1762_v16 = vadd.f32 %v1761_v7, %v4352_v62  ;;  %2086 = vmatprep.mubr.f32.mxu0 %v1849_v12  ;;  %v1850_v8 = vmax.f32 %v1760_v52, 0.0 }
 0x589   :  { %v1765_v23 = vpop.f32.mrf.mxu1  ;;  %2087 = vmatmul.mubr.f32.gmra.mxu0 %v1848_v13 }
 0x58a   :  { %v1851_v38 = vmax.f32 %v1762_v16, 0.0  ;;  %v1766_v17 = vadd.f32 %v1765_v23, %v4349_v35 }
 0x58b   :  { %v1767_v5 = vpop.f32.mrf.mxu1 }
 0x58c   :  { %v1768_v18 = vadd.f32 %v1767_v5, %v4352_v62  ;;  %2091 = vmatprep.mubr.f32.mxu0 %v1851_v38  ;;  %v1852_v20 = vmax.f32 %v1766_v17, 0.0 }
 0x58d   :  { %v1771_v19 = vpop.f32.mrf.mxu1  ;;  %2092 = vmatmul.mubr.f32.gmra.mxu0 %v1850_v8 }
 0x58e   :  { %v1853_v28 = vmax.f32 %v1768_v18, 0.0  ;;  %v1772_v21 = vadd.f32 %v1771_v19, %v4349_v35  ;;  %v4430_v19 = vld [vmem:[#allocation13 + $0x1] ss:$0 sm:$0xff] }
 0x58f   :  { %v1773_v3 = vpop.f32.mrf.mxu1 }
 0x590   :  { %v1774_v24 = vadd.f32 %v1773_v3, %v4352_v62  ;;  %2096 = vmatprep.mubr.f32.mxu0 %v1853_v28  ;;  %v1854_v26 = vmax.f32 %v1772_v21, 0.0 }
 0x591   :  { %v1777_v25 = vpop.f32.mrf.mxu1  ;;  %2097 = vmatmul.mubr.f32.gmra.mxu0 %v1852_v20 }
 0x592   :  { %v1855_v37 = vmax.f32 %v1774_v24, 0.0  ;;  %v1778_v2 = vadd.f32 %v1777_v25, %v4349_v35  ;;  %v4434_v24 = vld [vmem:[#allocation14 + $0x1] ss:$0 sm:$0xff] }
 0x593   :  { %v1779_v27 = vpop.f32.mrf.mxu1 }
 0x594   :  { %v1780_v29 = vadd.f32 %v1779_v27, %v4352_v62  ;;  %2101 = vmatprep.mubr.f32.mxu0 %v1855_v37  ;;  %v1856_v1 = vmax.f32 %v1778_v2, 0.0 }
 0x595   :  { %v1783_v30 = vpop.f32.mrf.mxu1  ;;  %2102 = vmatmul.mubr.f32.gmra.mxu0 %v1854_v26 }
 0x596   :  { %v1857_v31 = vmax.f32 %v1780_v29, 0.0  ;;  %v1784_v33 = vadd.f32 %v1783_v30, %v4349_v35 }
 0x597   :  { %v1785_v34 = vpop.f32.mrf.mxu1 }
 0x598   :  { %v1786_v36 = vadd.f32 %v1785_v34, %v4352_v62  ;;  %2106 = vmatprep.mubr.f32.mxu0 %v1857_v31  ;;  %v1858_v60 = vmax.f32 %v1784_v33, 0.0 }
 0x599   :  { %v1789_v39 = vpop.f32.mrf.mxu1  ;;  %2107 = vmatmul.mubr.f32.gmra.mxu0 %v1856_v1  ;;  %v4442_v1 = vld [vmem:[#allocation16 + $0x1] ss:$0 sm:$0xff] }
 0x59a   :  { %v1859_v41 = vmax.f32 %v1786_v36, 0.0  ;;  %v1790_v46 = vadd.f32 %v1789_v39, %v4349_v35 }
 0x59b   :  { %v1791_v47 = vpop.f32.mrf.mxu1 }
 0x59c   :  { %v1792_v48 = vadd.f32 %v1791_v47, %v4352_v62  ;;  %2111 = vmatprep.mubr.f32.mxu0 %v1859_v41  ;;  %v1860_v14 = vmax.f32 %v1790_v46, 0.0 }
 0x59d   :  { %v1795_v49 = vpop.f32.mrf.mxu1  ;;  %2112 = vmatmul.mubr.f32.gmra.mxu0 %v1858_v60 }
 0x59e   :  { %v1861_v50 = vmax.f32 %v1792_v48, 0.0  ;;  %v1796_v51 = vadd.f32 %v1795_v49, %v4349_v35 }
 0x59f   :  { %v1797_v53 = vpop.f32.mrf.mxu1 }
 0x5a0   :  { %v1798_v54 = vadd.f32 %v1797_v53, %v4352_v62  ;;  %2116 = vmatprep.mubr.f32.mxu0 %v1861_v50  ;;  %v1862_v55 = vmax.f32 %v1796_v51, 0.0 }
 0x5a1   :  { %2117 = vmatmul.mubr.f32.gmra.mxu0 %v1860_v14 }
 0x5a2   :  { %v1863_v45 = vmax.f32 %v1798_v54, 0.0 }
 0x5a4   :  { %2121 = vmatprep.mubr.f32.mxu0 %v1863_v45 }
 0x5a5   :  { %2122 = vmatmul.mubr.f32.gmra.mxu0 %v1862_v55 }
 0x5a6   :  { %2330 = vmatprep.mubr.f32.mxu0 %v3522_v56 }
 0x5e9   :  { %v4418_v57 = vpop.f32.mrf.mxu0 }
 0x5eb   :  { %v1970_v32 = vpop.f32.mrf.mxu0 }
 0x5ed   :  { %v4420_v58 = vpop.f32.mrf.mxu0 }
 0x5ef   :  { %v1975_v59 = vpop.f32.mrf.mxu0 }
 0x5f1   :  { %v4422_v61 = vpop.f32.mrf.mxu0 }
 0x5f3   :  { %v1980_v35 = vpop.f32.mrf.mxu0 }
 0x5f5   :  { %v4424_v22 = vpop.f32.mrf.mxu0 }
 0x5f7   :  { %v1985_v62 = vpop.f32.mrf.mxu0 }
 0x5f9   :  { %v4426_v63 = vpop.f32.mrf.mxu0 }
 0x5fb   :  { %v1990_v44 = vpop.f32.mrf.mxu0 }
 0x5fd   :  { %v4428_v4 = vpop.f32.mrf.mxu0 }
 0x5ff   :  { %v1995_v15 = vpop.f32.mrf.mxu0 }
 0x601   :  { %v1998_v6 = vpop.f32.mrf.mxu0 }
 0x602   :  { %v1999_v62 = vadd.f32 %v4430_v19, %v1998_v6 }
 0x603   :  { %v2000_v9 = vpop.f32.mrf.mxu0 }
 0x605   :  { %v2003_v11 = vpop.f32.mrf.mxu0 }
 0x606   :  { %v2004_v55 = vadd.f32 %v4430_v19, %v2003_v11 }
 0x607   :  { %v2005_v43 = vpop.f32.mrf.mxu0 }
 0x608   :  { %v1994_v43 = vadd.f32 %v4430_v19, %v4428_v4 }
 0x609   :  { %v2008_v10 = vpop.f32.mrf.mxu0 }
 0x60a   :  { %v2009_v14 = vadd.f32 %v4430_v19, %v2008_v10  ;;  %v2139_v10 = vmul.f32 %v4434_v24, %v2004_v55 }
 0x60b   :  { %v2010_v12 = vpop.f32.mrf.mxu0 }
 0x60c   :  { %v2140_v44 = vmul.f32 %v4434_v24, %v2009_v14 }
 0x60d   :  { %v2013_v13 = vpop.f32.mrf.mxu0 }
 0x60e   :  { %v2014_v46 = vadd.f32 %v4430_v19, %v2013_v13  ;;  %v2177_v4 = vadd.f32 %v4442_v1, %v2140_v44 }
 0x60f   :  { %v2015_v52 = vpop.f32.mrf.mxu0 }
 0x610   :  { %v2141_v56 = vmul.f32 %v4434_v24, %v2014_v46  ;;  %v1989_v52 = vadd.f32 %v4430_v19, %v4426_v63 }
 0x611   :  { %v2018_v7 = vpop.f32.mrf.mxu0 }
 0x612   :  { %v2019_v34 = vadd.f32 %v4430_v19, %v2018_v7  ;;  %v2178_v12 = vadd.f32 %v4442_v1, %v2141_v56  ;;  %v2138_v7 = vmul.f32 %v4434_v24, %v1999_v62 }
 0x613   :  { %v2020_v16 = vpop.f32.mrf.mxu0 }
 0x614   :  { %v2142_v51 = vmul.f32 %v4434_v24, %v2019_v34  ;;  %v2210_v63 = vmax.f32 %v2178_v12, 0.0 }
 0x615   :  { %v2023_v23 = vpop.f32.mrf.mxu0 }
 0x616   :  { %v2024_v29 = vadd.f32 %v4430_v19, %v2023_v23  ;;  %v2179_v15 = vadd.f32 %v4442_v1, %v2142_v51 }
 0x617   :  { %v2025_v38 = vpop.f32.mrf.mxu0 }
 0x618   :  { %v2143_v47 = vmul.f32 %v4434_v24, %v2024_v29  ;;  %v2211_v16 = vmax.f32 %v2179_v15, 0.0  ;;  %v1984_v38 = vadd.f32 %v4430_v19, %v4424_v22  ;;  %v2175_v22 = vadd.f32 %v4442_v1, %v2138_v7 }
 0x619   :  { %v2028_v8 = vpop.f32.mrf.mxu0 }
 0x61a   :  { %v2029_v37 = vadd.f32 %v4430_v19, %v2028_v8  ;;  %v2180_v32 = vadd.f32 %v4442_v1, %v2143_v47  ;;  %v2137_v8 = vmul.f32 %v4434_v24, %v1994_v43  ;;  %v2207_v29 = vmax.f32 %v2175_v22, 0.0 }
 0x61b   :  { %v2030_v17 = vpop.f32.mrf.mxu0 }
 0x61c   :  { %v2144_v36 = vmul.f32 %v4434_v24, %v2029_v37  ;;  %v2212_v6 = vmax.f32 %v2180_v32, 0.0  ;;  %v2176_v17 = vadd.f32 %v4442_v1, %v2139_v10  ;;  %v2174_v37 = vadd.f32 %v4442_v1, %v2137_v8 }
 0x61d   :  { %v2033_v5 = vpop.f32.mrf.mxu0 }
 0x61e   :  { %v2034_v3 = vadd.f32 %v4430_v19, %v2033_v5  ;;  %v2181_v53 = vadd.f32 %v4442_v1, %v2144_v36  ;;  %v2206_v36 = vmax.f32 %v2174_v37, 0.0 }
 0x61f   :  { %v2035_v18 = vpop.f32.mrf.mxu0 }
 0x620   :  { %v2145_v30 = vmul.f32 %v4434_v24, %v2034_v3  ;;  %v2213_v9 = vmax.f32 %v2181_v53, 0.0  ;;  %v1979_v18 = vadd.f32 %v4430_v19, %v4422_v61  ;;  %v1974_v3 = vadd.f32 %v4430_v19, %v4420_v58 }
 0x621   :  { %v2038_v28 = vpop.f32.mrf.mxu0  ;;  %v2208_v61 = vmax.f32 %v2176_v17, 0.0 }
 0x622   :  { %v2039_v20 = vadd.f32 %v4430_v19, %v2038_v28  ;;  %v2182_v48 = vadd.f32 %v4442_v1, %v2145_v30  ;;  %v2136_v28 = vmul.f32 %v4434_v24, %v1989_v52 }
 0x623   :  { %v2040_v21 = vpop.f32.mrf.mxu0 }
 0x624   :  { %v2146_v26 = vmul.f32 %v4434_v24, %v2039_v20  ;;  %v2214_v59 = vmax.f32 %v2182_v48, 0.0  ;;  %v2209_v20 = vmax.f32 %v2177_v4, 0.0  ;;  %v2173_v58 = vadd.f32 %v4442_v1, %v2136_v28 }
 0x625   :  { %v2043_v25 = vpop.f32.mrf.mxu0 }
 0x626   :  { %v2044_v2 = vadd.f32 %v4430_v19, %v2043_v25  ;;  %v2183_v39 = vadd.f32 %v4442_v1, %v2146_v26  ;;  %v2135_v25 = vmul.f32 %v4434_v24, %v1984_v38 }
 0x627   :  { %v2045_v27 = vpop.f32.mrf.mxu0 }
 0x628   :  { %v2147_v31 = vmul.f32 %v4434_v24, %v2044_v2  ;;  %v2215_v54 = vmax.f32 %v2183_v39, 0.0  ;;  %v1969_v2 = vadd.f32 %v4430_v19, %v4418_v57  ;;  %v2134_v27 = vmul.f32 %v4434_v24, %v1979_v18 }
 0x629   :  { %v4444_v33 = vpop.f32.mrf.mxu0  ;;  %v2172_v34 = vadd.f32 %v4442_v1, %v2135_v25 }
 0x62a   :  { %v2184_v41 = vadd.f32 %v4442_v1, %v2147_v31  ;;  %v2133_v31 = vmul.f32 %v4434_v24, %v1974_v3  ;;  %v2132_v39 = vmul.f32 %v4434_v24, %v1969_v2 }
 0x62b   :  { %v2050_v60 = vpop.f32.mrf.mxu0  ;;  %v2204_v48 = vmax.f32 %v2172_v34, 0.0 }
 0x62c   :  { %v2216_v49 = vmax.f32 %v2184_v41, 0.0  ;;  %v2171_v41 = vadd.f32 %v4442_v1, %v2134_v27  ;;  %v2205_v60 = vmax.f32 %v2173_v58, 0.0  ;;  %v2170_v47 = vadd.f32 %v4442_v1, %v2133_v31 }
 0x62d   :  { %v4453_v50 = vpop.f32.mrf.mxu0  ;;  %v2169_v14 = vadd.f32 %v4442_v1, %v2132_v39 }
 0x62e   :  { %2267 = vmatpush1.msra.mxu0 %v2216_v49  ;;  %3411 = vmatpush1.msra.mxu1 %v2216_v49  ;;  %v2203_v51 = vmax.f32 %v2171_v41, 0.0 }
 0x62f   :  { %v2055_v45 = vpop.f32.mrf.mxu0  ;;  %2268 = vmatprep.subr.mxu0 %v3832_v0  ;;  %3380 = vmatprep.subr.mxu1 %v3832_v0  ;;  %v2201_v55 = vmax.f32 %v2169_v14, 0.0 }
 0x630   :  { %2269 = vmatpush1.msra.mxu0 %v2215_v54  ;;  %3412 = vmatpush1.msra.mxu1 %v2215_v54  ;;  %v2202_v54 = vmax.f32 %v2170_v47, 0.0 }
 0x631   :  { %v4463_v35 = vpop.f32.mrf.mxu0  ;;  %2270 = vmatprep.subr.mxu0 %v3832_v0  ;;  %3381 = vmatprep.subr.mxu1 %v3832_v0 }
 0x632   :  { %2271 = vmatpush1.msra.mxu0 %v2214_v59  ;;  %3413 = vmatpush1.msra.mxu1 %v2214_v59 }
 0x633   :  { %v2060_v11 = vpop.f32.mrf.mxu0  ;;  %2272 = vmatprep.subr.mxu0 %v3832_v0  ;;  %3382 = vmatprep.subr.mxu1 %v3832_v0 }
 0x634   :  { %2273 = vmatpush1.msra.mxu0 %v2213_v9  ;;  %3414 = vmatpush1.msra.mxu1 %v2213_v9 }
 0x635   :  { %v4476_v13 = vpop.f32.mrf.mxu0  ;;  %2274 = vmatprep.subr.mxu0 %v3832_v0  ;;  %3383 = vmatprep.subr.mxu1 %v3832_v0 }
 0x636   :  { %2275 = vmatpush1.msra.mxu0 %v2212_v6  ;;  %3415 = vmatpush1.msra.mxu1 %v2212_v6 }
 0x637   :  { %v2065_v23 = vpop.f32.mrf.mxu0  ;;  %2276 = vmatprep.subr.mxu0 %v3832_v0  ;;  %3384 = vmatprep.subr.mxu1 %v3832_v0 }
 0x638   :  { %2277 = vmatpush1.msra.mxu0 %v2211_v16  ;;  %3416 = vmatpush1.msra.mxu1 %v2211_v16 }
 0x639   :  { %v4490_v5 = vpop.f32.mrf.mxu0  ;;  %2278 = vmatprep.subr.mxu0 %v3832_v0  ;;  %3385 = vmatprep.subr.mxu1 %v3832_v0 }
 0x63a   :  { %2279 = vmatpush1.msra.mxu0 %v2210_v63  ;;  %3417 = vmatpush1.msra.mxu1 %v2210_v63 }
 0x63b   :  { %v2070_v21 = vpop.f32.mrf.mxu0  ;;  %2280 = vmatprep.subr.mxu0 %v3832_v0  ;;  %3386 = vmatprep.subr.mxu1 %v3832_v0 }
 0x63c   :  { %2281 = vmatpush1.msra.mxu0 %v2209_v20  ;;  %3418 = vmatpush1.msra.mxu1 %v2209_v20 }
 0x63d   :  { %v4504_v26 = vpop.f32.mrf.mxu0  ;;  %2282 = vmatprep.subr.mxu0 %v3832_v0  ;;  %3387 = vmatprep.subr.mxu1 %v3832_v0 }
 0x63e   :  { %2283 = vmatpush1.msra.mxu0 %v2208_v61  ;;  %3419 = vmatpush1.msra.mxu1 %v2208_v61 }
 0x63f   :  { %v2075_v30 = vpop.f32.mrf.mxu0  ;;  %2284 = vmatprep.subr.mxu0 %v3832_v0  ;;  %3388 = vmatprep.subr.mxu1 %v3832_v0 }
 0x640   :  { %2285 = vmatpush1.msra.mxu0 %v2207_v29  ;;  %3420 = vmatpush1.msra.mxu1 %v2207_v29 }
 0x641   :  { %v4516_v57 = vpop.f32.mrf.mxu0  ;;  %2286 = vmatprep.subr.mxu0 %v3832_v0  ;;  %3389 = vmatprep.subr.mxu1 %v3832_v0 }
 0x642   :  { %2287 = vmatpush1.msra.mxu0 %v2206_v36  ;;  %3421 = vmatpush1.msra.mxu1 %v2206_v36  ;;  %v2079_v41 = vadd.f32 %v4430_v19, %v4516_v57  ;;  %v2069_v57 = vadd.f32 %v4430_v19, %v4490_v5  ;;  %v2059_v5 = vadd.f32 %v4430_v19, %v4463_v35 }
 0x643   :  { %v2080_v46 = vpop.f32.mrf.mxu0  ;;  %2288 = vmatprep.subr.mxu0 %v3832_v0  ;;  %3390 = vmatprep.subr.mxu1 %v3832_v0  ;;  %v2049_v35 = vadd.f32 %v4430_v19, %v4444_v33 }
 0x644   :  { %2289 = vmatpush1.msra.mxu0 %v2205_v60  ;;  %3422 = vmatpush1.msra.mxu1 %v2205_v60 }
 0x645   :  { %v4525_v49 = vpop.f32.mrf.mxu0  ;;  %2290 = vmatprep.subr.mxu0 %v3832_v0  ;;  %3391 = vmatprep.subr.mxu1 %v3832_v0 }
 0x646   :  { %2291 = vmatpush1.msra.mxu0 %v2204_v48  ;;  %3423 = vmatpush1.msra.mxu1 %v2204_v48  ;;  %v2084_v31 = vadd.f32 %v4430_v19, %v4525_v49  ;;  %v2074_v48 = vadd.f32 %v4430_v19, %v4504_v26  ;;  %v2064_v26 = vadd.f32 %v4430_v19, %v4476_v13 }
 0x647   :  { %v2085_v53 = vpop.f32.mrf.mxu0  ;;  %2292 = vmatprep.subr.mxu0 %v3832_v0  ;;  %3392 = vmatprep.subr.mxu1 %v3832_v0  ;;  %v2054_v13 = vadd.f32 %v4430_v19, %v4453_v50 }
 0x648   :  { %2293 = vmatpush1.msra.mxu0 %v2203_v51  ;;  %3424 = vmatpush1.msra.mxu1 %v2203_v51  ;;  %v2155_v49 = vmul.f32 %v4434_v24, %v2084_v31  ;;  %v2154_v53 = vmul.f32 %v4434_v24, %v2079_v41  ;;  %v3534_v31 = vld [vmem:[#allocation5 + $0xe8] sm:$0xff]  ;;  %v2516_v41 = vld [vmem:[#allocation8 + $0x2c0] sm:$0xff] }
 0x649   :  { %v2088_v45 = vpop.f32.mrf.mxu0  ;;  %2294 = vmatprep.subr.mxu0 %v3832_v0  ;;  %3393 = vmatprep.subr.mxu1 %v3832_v0  ;;  %v2149_v50 = vmul.f32 %v4434_v24, %v2054_v13  ;;  %v3550_v13 = vld [vmem:[#allocation5 + $0x128] sm:$0xff] }
 0x64a   :  { %2295 = vmatpush1.msra.mxu0 %v2202_v54  ;;  %3425 = vmatpush1.msra.mxu1 %v2202_v54  ;;  %v2089_v27 = vadd.f32 %v4430_v19, %v2088_v45 }
 0x64b   :  { %v2090_v56 = vpop.f32.mrf.mxu0  ;;  %2296 = vmatprep.subr.mxu0 %v3832_v0  ;;  %3394 = vmatprep.subr.mxu1 %v3832_v0 }
 0x64c   :  { %2297 = vmatpush1.msra.mxu0 %v2201_v55  ;;  %3426 = vmatpush1.msra.mxu1 %v2201_v55  ;;  %v2156_v60 = vmul.f32 %v4434_v24, %v2089_v27  ;;  %v2153_v55 = vmul.f32 %v4434_v24, %v2074_v48  ;;  %v2192_v56 = vadd.f32 %v4442_v1, %v2155_v49  ;;  %v3531_v27 = vld [vmem:[#allocation5 + $0x20] sm:$0xff]  ;;  %v3540_v49 = vld [vmem:[#allocation5 + $0xf0] sm:$0xff] }
 0x64d   :  { %v2093_v32 = vpop.f32.mrf.mxu0  ;;  %2298 = vmatprep.subr.mxu0 %v3832_v0  ;;  %3395 = vmatprep.subr.mxu1 %v3832_v0  ;;  %v3539_v48 = vld [vmem:[#allocation5 + $0x40] sm:$0xff] }
 0x64e   :  { %v2094_v25 = vadd.f32 %v4430_v19, %v2093_v32  ;;  %v2193_v54 = vadd.f32 %v4442_v1, %v2156_v60  ;;  %v3537_v60 = vld [vmem:[#allocation5 + $0x48] sm:$0xff] }
 0x64f   :  { %v2095_v59 = vpop.f32.mrf.mxu0 }
 0x650   :  { %v2157_v34 = vmul.f32 %v4434_v24, %v2094_v25  ;;  %v2152_v59 = vmul.f32 %v4434_v24, %v2069_v57  ;;  %v2520_v25 = vld [vmem:[#allocation8 + $0x2e0] sm:$0xff]  ;;  %v3542_v57 = vld [vmem:[#allocation5 + $0x108] sm:$0xff] }
 0x651   :  { %v2098_v62 = vpop.f32.mrf.mxu0 }
 0x652   :  { %v2099_v22 = vadd.f32 %v4430_v19, %v2098_v62  ;;  %v2194_v14 = vadd.f32 %v4442_v1, %v2157_v34  ;;  %v2191_v62 = vadd.f32 %v4442_v1, %v2154_v53  ;;  %v2517_v34 = vld [vmem:[#allocation8 + $0x2c8] sm:$0xff] }
 0x653   :  { %v2100_v44 = vpop.f32.mrf.mxu0  ;;  %v2513_v53 = vld [vmem:[#allocation8 + $0x2a8] sm:$0xff] }
 0x654   :  { %v2158_v58 = vmul.f32 %v4434_v24, %v2099_v22  ;;  %v2226_v32 = vmax.f32 %v2194_v14, 0.0  ;;  %v2225_v44 = vmax.f32 %v2193_v54, 0.0  ;;  %v3526_v22 = vld [vmem:[#allocation5 + $0xc8] sm:$0xff]  ;;  %v2514_v14 = vld [vmem:[#allocation8 + $0x2b0] sm:$0xff] }
 0x655   :  { %v2103_v15 = vpop.f32.mrf.mxu0  ;;  %v3543_v54 = vld [vmem:[#allocation5 + $0x50] sm:$0xff] }
 0x656   :  { %v2104_v63 = vadd.f32 %v4430_v19, %v2103_v15  ;;  %v2195_v46 = vadd.f32 %v4442_v1, %v2158_v58  ;;  %v2151_v15 = vmul.f32 %v4434_v24, %v2064_v26  ;;  %v3532_v58 = vld [vmem:[#allocation5 + $0xd0] sm:$0xff]  ;;  %v2512_v26 = vld [vmem:[#allocation8 + $0x2a0] sm:$0xff] }
 0x657   :  { %v2105_v9 = vpop.f32.mrf.mxu0 }
 0x658   :  { %v2159_v37 = vmul.f32 %v4434_v24, %v2104_v63  ;;  %v2227_v45 = vmax.f32 %v2195_v46, 0.0  ;;  %v2190_v9 = vadd.f32 %v4442_v1, %v2153_v55  ;;  %v3524_v63 = vld [vmem:[#allocation5 + $0xb0] sm:$0xff]  ;;  %v3538_v46 = vld [vmem:[#allocation5 + $0xf8] sm:$0xff]  ;;  %v3545_v55 = vld [vmem:[#allocation5 + $0x68] sm:$0xff] }
 0x659   :  { %v2108_v11 = vpop.f32.mrf.mxu0 }
 0x65a   :  { %v2109_v23 = vadd.f32 %v4430_v19, %v2108_v11  ;;  %v2196_v36 = vadd.f32 %v4442_v1, %v2159_v37  ;;  %v2224_v11 = vmax.f32 %v2192_v56, 0.0  ;;  %v3529_v37 = vld [vmem:[#allocation5 + $0x28] sm:$0xff]  ;;  %v3546_v56 = vld [vmem:[#allocation5 + $0x118] sm:$0xff] }
 0x65b   :  { %v2110_v43 = vpop.f32.mrf.mxu0 }
 0x65c   :  { %v2160_v20 = vmul.f32 %v4434_v24, %v2109_v23  ;;  %v2228_v51 = vmax.f32 %v2196_v36, 0.0  ;;  %v2150_v43 = vmul.f32 %v4434_v24, %v2059_v5  ;;  %v3535_v36 = vld [vmem:[#allocation5 + $0x30] sm:$0xff]  ;;  %v3547_v5 = vld [vmem:[#allocation5 + $0x60] sm:$0xff] }
 0x65d   :  { %v2113_v10 = vpop.f32.mrf.mxu0 }
 0x65e   :  { %v2114_v4 = vadd.f32 %v4430_v19, %v2113_v10  ;;  %v2197_v29 = vadd.f32 %v4442_v1, %v2160_v20  ;;  %v2189_v10 = vadd.f32 %v4442_v1, %v2152_v59  ;;  %v2187_v33 = vadd.f32 %v4442_v1, %v2150_v43  ;;  %v2521_v20 = vld [vmem:[#allocation8 + $0x2e8] sm:$0xff]  ;;  %v3548_v59 = vld [vmem:[#allocation5 + $0x110] sm:$0xff] }
 0x65f   :  { %v2115_v12 = vpop.f32.mrf.mxu0  ;;  %v3553_v43 = vld [vmem:[#allocation5 + $0x88] sm:$0xff] }
 0x660   :  { %v2161_v18 = vmul.f32 %v4434_v24, %v2114_v4  ;;  %v2229_v47 = vmax.f32 %v2197_v29, 0.0  ;;  %v2223_v12 = vmax.f32 %v2191_v62, 0.0  ;;  %v2186_v4 = vadd.f32 %v4442_v1, %v2149_v50  ;;  %v2518_v29 = vld [vmem:[#allocation8 + $0x2d0] sm:$0xff]  ;;  %v3555_v50 = vld [vmem:[#allocation5 + $0x80] sm:$0xff] }
 0x661   :  { %v2118_v6 = vpop.f32.mrf.mxu0  ;;  %v2219_v23 = vmax.f32 %v2187_v33, 0.0  ;;  %v2510_v62 = vld [vmem:[#allocation8 + $0x290] sm:$0xff]  ;;  %v3558_v33 = vld [vmem:[#allocation5 + $0x148] sm:$0xff] }
 0x662   :  { %v2119_v52 = vadd.f32 %v4430_v19, %v2118_v6  ;;  %v2198_v61 = vadd.f32 %v4442_v1, %v2161_v18  ;;  %v2188_v6 = vadd.f32 %v4442_v1, %v2151_v15  ;;  %v2522_v18 = vld [vmem:[#allocation8 + $0x2f0] sm:$0xff]  ;;  %v2509_v15 = vld [vmem:[#allocation8 + $0x288] sm:$0xff] }
 0x663   :  { %v2120_v7 = vpop.f32.mrf.mxu0 }
 0x664   :  { %v2162_v38 = vmul.f32 %v4434_v24, %v2119_v52  ;;  %v2230_v39 = vmax.f32 %v2198_v61, 0.0  ;;  %v2222_v52 = vmax.f32 %v2190_v9, 0.0  ;;  %v2221_v7 = vmax.f32 %v2189_v10, 0.0  ;;  %v3530_v61 = vld [vmem:[#allocation5 + $0xd8] sm:$0xff]  ;;  %v3551_v9 = vld [vmem:[#allocation5 + $0x70] sm:$0xff] }
 0x665   :  { %v2123_v16 = vpop.f32.mrf.mxu0  ;;  %v3554_v10 = vld [vmem:[#allocation5 + $0x138] sm:$0xff] }
 0x666   :  { %v2124_v8 = vadd.f32 %v4430_v19, %v2123_v16  ;;  %v2199_v21 = vadd.f32 %v4442_v1, %v2162_v38  ;;  %v2148_v19 = vmul.f32 %v4434_v24, %v2049_v35  ;;  %v2220_v16 = vmax.f32 %v2188_v6, 0.0  ;;  %v2508_v35 = vld [vmem:[#allocation8 + $0x280] sm:$0xff]  ;;  %v3556_v6 = vld [vmem:[#allocation5 + $0x130] sm:$0xff] }
 0x667   :  { %v2125_v17 = vpop.f32.mrf.mxu0  ;;  %v2218_v38 = vmax.f32 %v2186_v4, 0.0  ;;  %v3559_v4 = vld [vmem:[#allocation5 + $0x90] sm:$0xff] }
 0x668   :  { %v2163_v28 = vmul.f32 %v4434_v24, %v2124_v8  ;;  %v2231_v30 = vmax.f32 %v2199_v21, 0.0  ;;  %v2185_v24 = vadd.f32 %v4442_v1, %v2148_v19  ;;  %v3523_v17 = vld [vmem:[#allocation5] sm:$0xff]  ;;  %v3527_v21 = vld [vmem:[#allocation5 + $0x10] sm:$0xff]  ;;  %v3557_v19 = vld [vmem:[#allocation5 + $0x98] sm:$0xff] }
 0x66a   :  { %v2200_v3 = vadd.f32 %v4442_v1, %v2163_v28  ;;  %v2217_v8 = vmax.f32 %v2185_v24, 0.0  ;;  %v2523_v1 = vld [vmem:[#allocation8 + $0x2f8] sm:$0xff]  ;;  %v2504_v24 = vld [vmem:[#allocation8 + $0x260] sm:$0xff] }
 0x66b   :  { %v3525_v28 = vld [vmem:[#allocation5 + $0x18] sm:$0xff] }
 0x66c   :  { %v2232_v2 = vmax.f32 %v2200_v3, 0.0  ;;  %v3528_v3 = vld [vmem:[#allocation5 + $0xc0] sm:$0xff] }
 0x66e   :  { %2299 = vmatpush2.msra.mxu0 %v2232_v2  ;;  %3427 = vmatpush2.msra.mxu1 %v2232_v2  ;;  %v2519_v2 = vld [vmem:[#allocation8 + $0x2d8] sm:$0xff] }
 0x66f   :  { %2300 = vmatprep.subr.mxu0 %v3832_v0  ;;  %3396 = vmatprep.subr.mxu1 %v3832_v0 }
 0x670   :  { %2301 = vmatpush2.msra.mxu0 %v2231_v30  ;;  %3428 = vmatpush2.msra.mxu1 %v2231_v30  ;;  %v3533_v30 = vld [vmem:[#allocation5 + $0x38] sm:$0xff] }
 0x671   :  { %2302 = vmatprep.subr.mxu0 %v3832_v0  ;;  %3397 = vmatprep.subr.mxu1 %v3832_v0 }
 0x672   :  { %2303 = vmatpush2.msra.mxu0 %v2230_v39  ;;  %3429 = vmatpush2.msra.mxu1 %v2230_v39  ;;  %v3536_v39 = vld [vmem:[#allocation5 + $0xe0] sm:$0xff] }
 0x673   :  { %2304 = vmatprep.subr.mxu0 %v3832_v0  ;;  %3398 = vmatprep.subr.mxu1 %v3832_v0 }
 0x674   :  { %2305 = vmatpush2.msra.mxu0 %v2229_v47  ;;  %3430 = vmatpush2.msra.mxu1 %v2229_v47  ;;  %v2515_v47 = vld [vmem:[#allocation8 + $0x2b8] sm:$0xff] }
 0x675   :  { %2306 = vmatprep.subr.mxu0 %v3832_v0  ;;  %3399 = vmatprep.subr.mxu1 %v3832_v0 }
 0x676   :  { %2307 = vmatpush2.msra.mxu0 %v2228_v51  ;;  %3431 = vmatpush2.msra.mxu1 %v2228_v51  ;;  %v3541_v51 = vld [vmem:[#allocation5 + $0x58] sm:$0xff] }
 0x677   :  { %2308 = vmatprep.subr.mxu0 %v3832_v0  ;;  %3400 = vmatprep.subr.mxu1 %v3832_v0 }
 0x678   :  { %2309 = vmatpush2.msra.mxu0 %v2227_v45  ;;  %3432 = vmatpush2.msra.mxu1 %v2227_v45  ;;  %v3544_v45 = vld [vmem:[#allocation5 + $0x100] sm:$0xff] }
 0x679   :  { %2310 = vmatprep.subr.mxu0 %v3832_v0  ;;  %3401 = vmatprep.subr.mxu1 %v3832_v0 }
 0x67a   :  { %2311 = vmatpush2.msra.mxu0 %v2226_v32  ;;  %3433 = vmatpush2.msra.mxu1 %v2226_v32  ;;  %v2511_v32 = vld [vmem:[#allocation8 + $0x298] sm:$0xff] }
 0x67b   :  { %2312 = vmatprep.subr.mxu0 %v3832_v0  ;;  %3402 = vmatprep.subr.mxu1 %v3832_v0 }
 0x67c   :  { %2313 = vmatpush2.msra.mxu0 %v2225_v44  ;;  %3434 = vmatpush2.msra.mxu1 %v2225_v44  ;;  %v3549_v44 = vld [vmem:[#allocation5 + $0x78] sm:$0xff] }
 0x67d   :  { %2314 = vmatprep.subr.mxu0 %v3832_v0  ;;  %3403 = vmatprep.subr.mxu1 %v3832_v0 }
 0x67e   :  { %2315 = vmatpush2.msra.mxu0 %v2224_v11  ;;  %3435 = vmatpush2.msra.mxu1 %v2224_v11  ;;  %v3552_v11 = vld [vmem:[#allocation5 + $0x120] sm:$0xff] }
 0x67f   :  { %2316 = vmatprep.subr.mxu0 %v3832_v0  ;;  %3404 = vmatprep.subr.mxu1 %v3832_v0 }
 0x680   :  { %2317 = vmatpush2.msra.mxu0 %v2223_v12  ;;  %3436 = vmatpush2.msra.mxu1 %v2223_v12  ;;  %v2507_v12 = vld [vmem:[#allocation8 + $0x278] sm:$0xff] }
 0x681   :  { %2318 = vmatprep.subr.mxu0 %v3832_v0  ;;  %3405 = vmatprep.subr.mxu1 %v3832_v0 }
 0x682   :  { %2319 = vmatpush2.msra.mxu0 %v2222_v52  ;;  %3437 = vmatpush2.msra.mxu1 %v2222_v52  ;;  %v2506_v52 = vld [vmem:[#allocation8 + $0x270] sm:$0xff] }
 0x683   :  { %2320 = vmatprep.subr.mxu0 %v3832_v0  ;;  %3406 = vmatprep.subr.mxu1 %v3832_v0 }
 0x684   :  { %2321 = vmatpush2.msra.mxu0 %v2221_v7  ;;  %3438 = vmatpush2.msra.mxu1 %v2221_v7  ;;  %v2505_v7 = vld [vmem:[#allocation8 + $0x268] sm:$0xff] }
 0x685   :  { %2322 = vmatprep.subr.mxu0 %v3832_v0  ;;  %3407 = vmatprep.subr.mxu1 %v3832_v0 }
 0x686   :  { %2323 = vmatpush2.msra.mxu0 %v2220_v16  ;;  %3439 = vmatpush2.msra.mxu1 %v2220_v16  ;;  %v3560_v16 = vld [vmem:[#allocation5 + $0x140] sm:$0xff] }
 0x687   :  { %2324 = vmatprep.subr.mxu0 %v3832_v0  ;;  %3408 = vmatprep.subr.mxu1 %v3832_v0 }
 0x688   :  { %2325 = vmatpush2.msra.mxu0 %v2219_v23  ;;  %3440 = vmatpush2.msra.mxu1 %v2219_v23  ;;  %v3561_v23 = vld [vmem:[#allocation5 + $0xa8] sm:$0xff] }
 0x689   :  { %2326 = vmatprep.subr.mxu0 %v3832_v0  ;;  %3409 = vmatprep.subr.mxu1 %v3832_v0 }
 0x68a   :  { %2327 = vmatpush2.msra.mxu0 %v2218_v38  ;;  %3441 = vmatpush2.msra.mxu1 %v2218_v38  ;;  %v3562_v38 = vld [vmem:[#allocation5 + $0x158] sm:$0xff] }
 0x68b   :  { %2328 = vmatprep.subr.mxu0 %v3832_v0  ;;  %3410 = vmatprep.subr.mxu1 %v3832_v0 }
 0x68c   :  { %2329 = vmatpush2.msra.mxu0 %v2217_v8  ;;  %3442 = vmatpush2.msra.mxu1 %v2217_v8  ;;  %v2503_v8 = vld [vmem:[#allocation8 + $0x258] sm:$0xff] }
 0x68d   :  { %2331 = vmatmul.mubr.f32.vlgmr.msra.gmra.mxu0 %v3523_v17  ;;  %2386 = vmatmul.mubr.f32.vlgmr.msra.gmra.mxu1 %v3524_v63  ;;  %v3563_v17 = vld [vmem:[#allocation5 + $0xa0] sm:$0xff]  ;;  %v3564_v63 = vld [vmem:[#allocation5 + $0x150] sm:$0xff] }
 0x68e   :  { %2335 = vmatprep.mubr.f32.mxu0 %v3525_v28  ;;  %2390 = vmatprep.mubr.f32.mxu1 %v3526_v22  ;;  %v3565_v28 = vld [vmem:[#allocation5 + $0x168] sm:$0xff]  ;;  %v2500_v22 = vld [vmem:[#allocation8 + $0x240] sm:$0xff] }
 0x68f   :  { %2537 = vmatprep.subr.mxu0 %v2523_v1  ;;  %2896 = vmatprep.subr.mxu1 %v3832_v0  ;;  %v2502_v1 = vld [vmem:[#allocation8 + $0x250] sm:$0xff] }
 0x690   :  { %2538 = vmatpush1.msra.mxu0 %v2522_v18  ;;  %v2501_v18 = vld [vmem:[#allocation8 + $0x248] sm:$0xff] }
 0x691   :  { %2336 = vmatmul.mubr.f32.gmra.mxu0 %v3527_v21  ;;  %2391 = vmatmul.mubr.f32.gmra.mxu1 %v3528_v3  ;;  %v2498_v21 = vld [vmem:[#allocation8 + $0x230] sm:$0xff]  ;;  %v3566_v3 = vld [vmem:[#allocation5 + $0x160] sm:$0xff] }
 0x692   :  { %2340 = vmatprep.mubr.f32.mxu0 %v3529_v37  ;;  %2395 = vmatprep.mubr.f32.mxu1 %v3530_v61  ;;  %v3567_v37 = vld [vmem:[#allocation5 + $0x178] sm:$0xff]  ;;  %v2496_v61 = vld [vmem:[#allocation8 + $0x220] sm:$0xff] }
 0x693   :  { %2539 = vmatprep.subr.mxu0 %v2521_v20  ;;  %v2499_v20 = vld [vmem:[#allocation8 + $0x238] sm:$0xff] }
 0x694   :  { %2540 = vmatpush1.msra.mxu0 %v2520_v25  ;;  %v2497_v25 = vld [vmem:[#allocation8 + $0x228] sm:$0xff] }
 0x695   :  { %2341 = vmatmul.mubr.f32.gmra.mxu0 %v3531_v27  ;;  %2396 = vmatmul.mubr.f32.gmra.mxu1 %v3532_v58  ;;  %v3568_v27 = vld [vmem:[#allocation5 + $0x170] sm:$0xff]  ;;  %v3569_v58 = vld [vmem:[#allocation5 + $0x188] sm:$0xff] }
 0x696   :  { %2345 = vmatprep.mubr.f32.mxu0 %v3533_v30  ;;  %2400 = vmatprep.mubr.f32.mxu1 %v3534_v31  ;;  %v3571_v30 = vld [vmem:[#allocation5 + $0x198] sm:$0xff]  ;;  %v3572_v31 = vld [vmem:[#allocation5 + $0x190] sm:$0xff] }
 0x697   :  { %2541 = vmatprep.subr.mxu0 %v2519_v2  ;;  %v2495_v2 = vld [vmem:[#allocation8 + $0x218] sm:$0xff] }
 0x698   :  { %2542 = vmatpush1.msra.mxu0 %v2518_v29  ;;  %v3570_v29 = vld [vmem:[#allocation5 + $0x180] sm:$0xff] }
 0x699   :  { %2346 = vmatmul.mubr.f32.gmra.mxu0 %v3535_v36  ;;  %2401 = vmatmul.mubr.f32.gmra.mxu1 %v3536_v39  ;;  %v3574_v36 = vld [vmem:[#allocation5 + $0x1a0] sm:$0xff]  ;;  %v3575_v39 = vld [vmem:[#allocation5 + $0x1b8] sm:$0xff] }
 0x69a   :  { %2350 = vmatprep.mubr.f32.mxu0 %v3537_v60  ;;  %2405 = vmatprep.mubr.f32.mxu1 %v3538_v46  ;;  %v3576_v60 = vld [vmem:[#allocation5 + $0x1b0] sm:$0xff]  ;;  %v2493_v46 = vld [vmem:[#allocation8 + $0x208] sm:$0xff] }
 0x69b   :  { %2543 = vmatprep.subr.mxu0 %v2517_v34  ;;  %v3573_v34 = vld [vmem:[#allocation5 + $0x1a8] sm:$0xff] }
 0x69c   :  { %2544 = vmatpush1.msra.mxu0 %v2516_v41  ;;  %v2494_v41 = vld [vmem:[#allocation8 + $0x210] sm:$0xff] }
 0x69d   :  { %2351 = vmatmul.mubr.f32.gmra.mxu0 %v3539_v48  ;;  %2406 = vmatmul.mubr.f32.gmra.mxu1 %v3540_v49  ;;  %v2492_v48 = vld [vmem:[#allocation8 + $0x200] sm:$0xff] }
 0x69e   :  { %2355 = vmatprep.mubr.f32.mxu0 %v3541_v51  ;;  %2410 = vmatprep.mubr.f32.mxu1 %v3542_v57  ;;  %v3578_v49 = vld [vmem:[#allocation5 + $0x1c0] sm:$0xff]  ;;  %v3580_v51 = vld [vmem:[#allocation5 + $0x1d0] sm:$0xff]  ;;  %v3581_v57 = vld [vmem:[#allocation5 + $0x1e8] sm:$0xff] }
 0x69f   :  { %2545 = vmatprep.subr.mxu0 %v2515_v47  ;;  %v3577_v47 = vld [vmem:[#allocation5 + $0x1c8] sm:$0xff] }
 0x6a0   :  { %2546 = vmatpush1.msra.mxu0 %v2514_v14  ;;  %v3579_v14 = vld [vmem:[#allocation5 + $0x1d8] sm:$0xff] }
 0x6a1   :  { %2356 = vmatmul.mubr.f32.gmra.mxu0 %v3543_v54  ;;  %2411 = vmatmul.mubr.f32.gmra.mxu1 %v3544_v45  ;;  %v3583_v54 = vld [vmem:[#allocation5 + $0x1f8] sm:$0xff]  ;;  %v3584_v45 = vld [vmem:[#allocation5 + $0x1f0] sm:$0xff] }
 0x6a2   :  { %2360 = vmatprep.mubr.f32.mxu0 %v3545_v55  ;;  %2415 = vmatprep.mubr.f32.mxu1 %v3546_v56  ;;  %v2874_v55 = vld [vmem:[#allocation11 + $0x278] sm:$0xff]  ;;  %v2873_v56 = vld [vmem:[#allocation11 + $0x270] sm:$0xff] }
 0x6a3   :  { %2547 = vmatprep.subr.mxu0 %v2513_v53  ;;  %v3582_v53 = vld [vmem:[#allocation5 + $0x1e0] sm:$0xff]  ;;  %2897 = vmatpush1.msra.mxu1 %v2874_v55 }
 0x6a4   :  { %2548 = vmatpush1.msra.mxu0 %v2512_v26  ;;  %v2234_v26 = vld [vmem:[#allocation7 + $0x200] sm:$0xff]  ;;  %2898 = vmatprep.subr.mxu1 %v3832_v0 }
 0x6a5   :  { %2361 = vmatmul.mubr.f32.gmra.mxu0 %v3547_v5  ;;  %2416 = vmatmul.mubr.f32.gmra.mxu1 %v3548_v59  ;;  %v2890_v55 = vld [vmem:[#allocation11 + $0x2f8] sm:$0xff] }
 0x6a6   :  { %2365 = vmatprep.mubr.f32.mxu0 %v3549_v44  ;;  %2420 = vmatprep.mubr.f32.mxu1 %v3550_v13  ;;  %v2235_v13 = vld [vmem:[#allocation7 + $0x208] sm:$0xff] }
 0x6a7   :  { %2549 = vmatprep.subr.mxu0 %v2511_v32  ;;  %2899 = vmatpush1.msra.mxu1 %v2873_v56 }
 0x6a8   :  { %2550 = vmatpush1.msra.mxu0 %v2510_v62  ;;  %v2872_v62 = vld [vmem:[#allocation11 + $0x268] sm:$0xff]  ;;  %2900 = vmatprep.subr.mxu1 %v3832_v0 }
 0x6a9   :  { %2366 = vmatmul.mubr.f32.gmra.mxu0 %v3551_v9  ;;  %2421 = vmatmul.mubr.f32.gmra.mxu1 %v3552_v11  ;;  %v2871_v9 = vld [vmem:[#allocation11 + $0x260] sm:$0xff] }
 0x6aa   :  { %2370 = vmatprep.mubr.f32.mxu0 %v3553_v43  ;;  %2425 = vmatprep.mubr.f32.mxu1 %v3554_v10  ;;  %v2870_v10 = vld [vmem:[#allocation11 + $0x258] sm:$0xff] }
 0x6ab   :  { %2551 = vmatprep.subr.mxu0 %v2509_v15  ;;  %2901 = vmatpush1.msra.mxu1 %v2872_v62  ;;  %v2889_v62 = vld [vmem:[#allocation11 + $0x2f0] sm:$0xff] }
 0x6ac   :  { %2552 = vmatpush1.msra.mxu0 %v2508_v35  ;;  %2902 = vmatprep.subr.mxu1 %v3832_v0 }
 0x6ad   :  { %2371 = vmatmul.mubr.f32.gmra.mxu0 %v3555_v50  ;;  %2426 = vmatmul.mubr.f32.gmra.mxu1 %v3556_v6  ;;  %v2236_v50 = vld [vmem:[#allocation7 + $0x210] sm:$0xff] }
 0x6ae   :  { %2375 = vmatprep.mubr.f32.mxu0 %v3557_v19  ;;  %2430 = vmatprep.mubr.f32.mxu1 %v3558_v33 }
 0x6af   :  { %2553 = vmatprep.subr.mxu0 %v2507_v12  ;;  %2903 = vmatpush1.msra.mxu1 %v2871_v9  ;;  %v2888_v9 = vld [vmem:[#allocation11 + $0x2e8] sm:$0xff] }
 0x6b0   :  { %2554 = vmatpush1.msra.mxu0 %v2506_v52  ;;  %2904 = vmatprep.subr.mxu1 %v3832_v0  ;;  %v2869_v52 = vld [vmem:[#allocation11 + $0x250] sm:$0xff] }
 0x6b1   :  { %2376 = vmatmul.mubr.f32.gmra.mxu0 %v3559_v4  ;;  %2431 = vmatmul.mubr.f32.gmra.mxu1 %v3560_v16  ;;  %v2868_v4 = vld [vmem:[#allocation11 + $0x248] sm:$0xff] }
 0x6b2   :  { %2380 = vmatprep.mubr.f32.mxu0 %v3561_v23  ;;  %2435 = vmatprep.mubr.f32.mxu1 %v3562_v38  ;;  %v2867_v38 = vld [vmem:[#allocation11 + $0x240] sm:$0xff] }
 0x6b3   :  { %2555 = vmatprep.subr.mxu0 %v2505_v7  ;;  %2905 = vmatpush1.msra.mxu1 %v2870_v10 }
 0x6b4   :  { %2556 = vmatpush1.msra.mxu0 %v2504_v24  ;;  %2906 = vmatprep.subr.mxu1 %v3832_v0  ;;  %v2237_v24 = vld [vmem:[#allocation7 + $0x218] sm:$0xff] }
 0x6b5   :  { %2381 = vmatmul.mubr.f32.gmra.mxu0 %v3563_v17  ;;  %2436 = vmatmul.mubr.f32.gmra.mxu1 %v3564_v63  ;;  %v2866_v63 = vld [vmem:[#allocation11 + $0x238] sm:$0xff] }
 0x6b6   :  { %2440 = vmatprep.mubr.f32.mxu1 %v3565_v28  ;;  %2557 = vmatprep.subr.mxu0 %v2503_v8  ;;  %v2238_v28 = vld [vmem:[#allocation7 + $0x220] sm:$0xff] }
 0x6b7   :  { %2558 = vmatpush1.msra.mxu0 %v2502_v1  ;;  %2601 = vmatprep.mubr.f32.mxu0 %v3832_v0 }
 0x6b8   :  { %2559 = vmatprep.subr.mxu0 %v2501_v18  ;;  %2907 = vmatpush1.msra.mxu1 %v2869_v52 }
 0x6b9   :  { %2441 = vmatmul.mubr.f32.gmra.mxu1 %v3566_v3  ;;  %2560 = vmatpush1.msra.mxu0 %v2500_v22 }
 0x6ba   :  { %2445 = vmatprep.mubr.f32.mxu1 %v3567_v37  ;;  %2561 = vmatprep.subr.mxu0 %v2499_v20  ;;  %v2865_v20 = vld [vmem:[#allocation11 + $0x230] sm:$0xff]  ;;  %v2864_v37 = vld [vmem:[#allocation11 + $0x228] sm:$0xff] }
 0x6bb   :  { %2562 = vmatpush1.msra.mxu0 %v2498_v21  ;;  %2908 = vmatprep.subr.mxu1 %v3832_v0 }
 0x6bc   :  { %2563 = vmatprep.subr.mxu0 %v2497_v25  ;;  %2909 = vmatpush1.msra.mxu1 %v2868_v4  ;;  %v2244_v4 = vld [vmem:[#allocation7 + $0x250] sm:$0xff] }
 0x6bd   :  { %2446 = vmatmul.mubr.f32.gmra.mxu1 %v3568_v27  ;;  %2564 = vmatpush1.msra.mxu0 %v2496_v61 }
 0x6be   :  { %2450 = vmatprep.mubr.f32.mxu1 %v3569_v58  ;;  %2565 = vmatprep.subr.mxu0 %v2495_v2  ;;  %v2239_v2 = vld [vmem:[#allocation7 + $0x228] sm:$0xff] }
 0x6bf   :  { %2566 = vmatpush1.msra.mxu0 %v2494_v41  ;;  %2910 = vmatprep.subr.mxu1 %v3832_v0  ;;  %v2863_v58 = vld [vmem:[#allocation11 + $0x220] sm:$0xff] }
 0x6c0   :  { %2567 = vmatprep.subr.mxu0 %v2493_v46  ;;  %2911 = vmatpush1.msra.mxu1 %v2867_v38  ;;  %v2245_v38 = vld [vmem:[#allocation7 + $0x258] sm:$0xff] }
 0x6c1   :  { %2451 = vmatmul.mubr.f32.gmra.mxu1 %v3570_v29  ;;  %2568 = vmatpush1.msra.mxu0 %v2492_v48 }
 0x6c2   :  { %2455 = vmatprep.mubr.f32.mxu1 %v3571_v30  ;;  %2912 = vmatprep.subr.mxu1 %v3832_v0 }
 0x6c3   :  { %2913 = vmatpush1.msra.mxu1 %v2866_v63  ;;  %v2884_v63 = vld [vmem:[#allocation11 + $0x2c8] sm:$0xff] }
 0x6c4   :  { %2914 = vmatprep.subr.mxu1 %v3832_v0 }
 0x6c5   :  { %2456 = vmatmul.mubr.f32.gmra.mxu1 %v3572_v31 }
 0x6c6   :  { %2460 = vmatprep.mubr.f32.mxu1 %v3573_v34  ;;  %2915 = vmatpush1.msra.mxu1 %v2865_v20  ;;  %v2862_v34 = vld [vmem:[#allocation11 + $0x218] sm:$0xff]  ;;  %v2883_v20 = vld [vmem:[#allocation11 + $0x2c0] sm:$0xff] }
 0x6c7   :  { %2916 = vmatprep.subr.mxu1 %v3832_v0 }
 0x6c8   :  { %2917 = vmatpush1.msra.mxu1 %v2864_v37  ;;  %v2882_v37 = vld [vmem:[#allocation11 + $0x2b8] sm:$0xff] }
 0x6c9   :  { %2461 = vmatmul.mubr.f32.gmra.mxu1 %v3574_v36  ;;  %2918 = vmatprep.subr.mxu1 %v3832_v0 }
 0x6ca   :  { %2465 = vmatprep.mubr.f32.mxu1 %v3575_v39  ;;  %v2240_v39 = vld [vmem:[#allocation7 + $0x230] sm:$0xff]  ;;  %2919 = vmatpush1.msra.mxu1 %v2863_v58 }
 0x6cb   :  { %2920 = vmatprep.subr.mxu1 %v3832_v0 }
 0x6cc   :  { %2921 = vmatpush1.msra.mxu1 %v2862_v34 }
 0x6cd   :  { %2466 = vmatmul.mubr.f32.gmra.mxu1 %v3576_v60  ;;  %v2861_v60 = vld [vmem:[#allocation11 + $0x210] sm:$0xff]  ;;  %2922 = vmatprep.subr.mxu1 %v3832_v0 }
 0x6ce   :  { %2470 = vmatprep.mubr.f32.mxu1 %v3577_v47  ;;  %2923 = vmatpush1.msra.mxu1 %v2861_v60 }
 0x6cf   :  { %2924 = vmatprep.subr.mxu1 %v3832_v0 }
 0x6d1   :  { %2471 = vmatmul.mubr.f32.gmra.mxu1 %v3578_v49  ;;  %v2860_v49 = vld [vmem:[#allocation11 + $0x208] sm:$0xff] }
 0x6d2   :  { %2475 = vmatprep.mubr.f32.mxu1 %v3579_v14  ;;  %2925 = vmatpush1.msra.mxu1 %v2860_v49 }
 0x6d3   :  { %2926 = vmatprep.subr.mxu1 %v3832_v0 }
 0x6d5   :  { %2476 = vmatmul.mubr.f32.gmra.mxu1 %v3580_v51  ;;  %v2241_v51 = vld [vmem:[#allocation7 + $0x238] sm:$0xff] }
 0x6d6   :  { %2480 = vmatprep.mubr.f32.mxu1 %v3581_v57 }
 0x6d9   :  { %2481 = vmatmul.mubr.f32.gmra.mxu1 %v3582_v53  ;;  %v2859_v53 = vld [vmem:[#allocation11 + $0x200] sm:$0xff] }
 0x6da   :  { %2485 = vmatprep.mubr.f32.mxu1 %v3583_v54  ;;  %2927 = vmatpush1.msra.mxu1 %v2859_v53  ;;  %v2251_v53 = vld [vmem:[#allocation7 + $0x288] sm:$0xff] }
 0x6db   :  { %2928 = vmatprep.subr.mxu1 %v3832_v0 }
 0x6dc   :  { %2929 = vmatpush2.msra.mxu1 %v2890_v55 }
 0x6dd   :  { %2486 = vmatmul.mubr.f32.gmra.mxu1 %v3584_v45  ;;  %2930 = vmatprep.subr.mxu1 %v3832_v0 }
 0x6de   :  { %2931 = vmatpush2.msra.mxu1 %v2889_v62 }
 0x6df   :  { %2932 = vmatprep.subr.mxu1 %v3832_v0 }
 0x6e0   :  { %2933 = vmatpush2.msra.mxu1 %v2888_v9  ;;  %v2875_v9 = vld [vmem:[#allocation11 + $0x280] sm:$0xff] }
 0x6e1   :  { %2934 = vmatprep.subr.mxu1 %v3832_v0 }
 0x74d   :  { %v2332_v32 = vpop.f32.mrf.mxu0  ;;  %v4626_v5 = vpop.f32.mrf.mxu1 }
 0x74e   :  { %v2333_v59 = vadd.f32 %v2332_v32, %v2234_v26  ;;  %v2242_v32 = vld [vmem:[#allocation7 + $0x240] sm:$0xff] }
 0x74f   :  { %v2334_v44 = vpop.f32.mrf.mxu0  ;;  %v2389_v15 = vpop.f32.mrf.mxu1 }
 0x750   :  { %2602 = vmatmul.mubr.f32.vlgmr.msra.gmra.mxu0 %v2333_v59 }
 0x751   :  { %v2337_v11 = vpop.f32.mrf.mxu0  ;;  %2607 = vmatprep.mubr.f32.mxu0 %v3832_v0  ;;  %v4631_v35 = vpop.f32.mrf.mxu1 }
 0x752   :  { %v2338_v43 = vadd.f32 %v2337_v11, %v2235_v13 }
 0x753   :  { %v2339_v12 = vpop.f32.mrf.mxu0  ;;  %v2394_v6 = vpop.f32.mrf.mxu1 }
 0x754   :  { %2608 = vmatmul.mubr.f32.gmra.mxu0 %v2338_v43  ;;  %v2243_v43 = vld [vmem:[#allocation7 + $0x248] sm:$0xff] }
 0x755   :  { %v2342_v19 = vpop.f32.mrf.mxu0  ;;  %2613 = vmatprep.mubr.f32.mxu0 %v3832_v0  ;;  %v4636_v33 = vpop.f32.mrf.mxu1  ;;  %v2887_v12 = vld [vmem:[#allocation11 + $0x2e0] sm:$0xff] }
 0x756   :  { %v2343_v7 = vadd.f32 %v2342_v19, %v2236_v50  ;;  %v2886_v19 = vld [vmem:[#allocation11 + $0x2d8] sm:$0xff]  ;;  %2935 = vmatpush2.msra.mxu1 %v2887_v12 }
 0x757   :  { %v2344_v16 = vpop.f32.mrf.mxu0  ;;  %v2399_v23 = vpop.f32.mrf.mxu1  ;;  %2936 = vmatprep.subr.mxu1 %v3832_v0 }
 0x758   :  { %2614 = vmatmul.mubr.f32.gmra.mxu0 %v2343_v7  ;;  %2937 = vmatpush2.msra.mxu1 %v2886_v19 }
 0x759   :  { %v2347_v8 = vpop.f32.mrf.mxu0  ;;  %2619 = vmatprep.mubr.f32.mxu0 %v3832_v0  ;;  %v4641_v1 = vpop.f32.mrf.mxu1  ;;  %2938 = vmatprep.subr.mxu1 %v3832_v0 }
 0x75a   :  { %v2348_v17 = vadd.f32 %v2347_v8, %v2237_v24  ;;  %v2885_v24 = vld [vmem:[#allocation11 + $0x2d0] sm:$0xff] }
 0x75b   :  { %v2349_v18 = vpop.f32.mrf.mxu0  ;;  %v2404_v22 = vpop.f32.mrf.mxu1  ;;  %2939 = vmatpush2.msra.mxu1 %v2885_v24  ;;  %v2257_v24 = vld [vmem:[#allocation7 + $0x2b8] sm:$0xff] }
 0x75c   :  { %2620 = vmatmul.mubr.f32.gmra.mxu0 %v2348_v17  ;;  %v2388_v22 = vadd.f32 %v4626_v5, %v2245_v38  ;;  %2940 = vmatprep.subr.mxu1 %v3832_v0  ;;  %v2881_v5 = vld [vmem:[#allocation11 + $0x2b0] sm:$0xff] }
 0x75d   :  { %v2352_v21 = vpop.f32.mrf.mxu0  ;;  %2625 = vmatprep.mubr.f32.mxu0 %v3832_v0  ;;  %v4646_v3 = vpop.f32.mrf.mxu1  ;;  %2941 = vmatpush2.msra.mxu1 %v2884_v63  ;;  %v2260_v63 = vld [vmem:[#allocation7 + $0x2d0] sm:$0xff] }
 0x75e   :  { %v2353_v25 = vadd.f32 %v2352_v21, %v2238_v28  ;;  %v2246_v21 = vld [vmem:[#allocation7 + $0x260] sm:$0xff]  ;;  %2942 = vmatprep.subr.mxu1 %v3832_v0 }
 0x75f   :  { %v2354_v61 = vpop.f32.mrf.mxu0  ;;  %v2409_v27 = vpop.f32.mrf.mxu1  ;;  %2943 = vmatpush2.msra.mxu1 %v2883_v20  ;;  %v2262_v20 = vld [vmem:[#allocation7 + $0x2e0] sm:$0xff] }
 0x760   :  { %2626 = vmatmul.mubr.f32.gmra.mxu0 %v2353_v25  ;;  %2944 = vmatprep.subr.mxu1 %v3832_v0  ;;  %v2247_v27 = vld [vmem:[#allocation7 + $0x268] sm:$0xff] }
 0x761   :  { %v2357_v29 = vpop.f32.mrf.mxu0  ;;  %2631 = vmatprep.mubr.f32.mxu0 %v3832_v0  ;;  %v4651_v30 = vpop.f32.mrf.mxu1  ;;  %2945 = vmatpush2.msra.mxu1 %v2882_v37  ;;  %v2398_v34 = vadd.f32 %v4636_v33, %v2247_v27  ;;  %v2249_v33 = vld [vmem:[#allocation7 + $0x278] sm:$0xff] }
 0x762   :  { %v2358_v31 = vadd.f32 %v2357_v29, %v2239_v2  ;;  %v2393_v2 = vadd.f32 %v4631_v35, %v2246_v21  ;;  %2946 = vmatprep.subr.mxu1 %v3832_v0  ;;  %v2880_v29 = vld [vmem:[#allocation11 + $0x2a8] sm:$0xff]  ;;  %v2879_v35 = vld [vmem:[#allocation11 + $0x2a0] sm:$0xff]  ;;  %v2408_v49 = vadd.f32 %v4646_v3, %v2249_v33 }
 0x763   :  { %v2359_v36 = vpop.f32.mrf.mxu0  ;;  %v2414_v41 = vpop.f32.mrf.mxu1  ;;  %2947 = vmatpush2.msra.mxu1 %v2881_v5  ;;  %v2252_v3 = vld [vmem:[#allocation7 + $0x290] sm:$0xff]  ;;  %v2265_v5 = vld [vmem:[#allocation7 + $0x2f8] sm:$0xff] }
 0x764   :  { %2632 = vmatmul.mubr.f32.gmra.mxu0 %v2358_v31  ;;  %2948 = vmatprep.subr.mxu1 %v3832_v0  ;;  %v2248_v36 = vld [vmem:[#allocation7 + $0x270] sm:$0xff] }
 0x765   :  { %v2362_v46 = vpop.f32.mrf.mxu0  ;;  %2637 = vmatprep.mubr.f32.mxu0 %v3832_v0  ;;  %v4656_v47 = vpop.f32.mrf.mxu1  ;;  %2949 = vmatpush2.msra.mxu1 %v2880_v29  ;;  %v2403_v60 = vadd.f32 %v4641_v1, %v2248_v36 }
 0x766   :  { %v2363_v48 = vadd.f32 %v2362_v46, %v2240_v39  ;;  %2950 = vmatprep.subr.mxu1 %v3832_v0  ;;  %v2418_v55 = vadd.f32 %v4656_v47, %v2251_v53 }
 0x767   :  { %v2364_v14 = vpop.f32.mrf.mxu0  ;;  %v2419_v57 = vpop.f32.mrf.mxu1  ;;  %2951 = vmatpush2.msra.mxu1 %v2879_v35 }
 0x768   :  { %2638 = vmatmul.mubr.f32.gmra.mxu0 %v2363_v48  ;;  %2952 = vmatprep.subr.mxu1 %v3832_v0  ;;  %v2250_v14 = vld [vmem:[#allocation7 + $0x280] sm:$0xff] }
 0x769   :  { %v2367_v54 = vpop.f32.mrf.mxu0  ;;  %2643 = vmatprep.mubr.f32.mxu0 %v3832_v0  ;;  %v4661_v45 = vpop.f32.mrf.mxu1  ;;  %v2413_v1 = vadd.f32 %v4651_v30, %v2250_v14 }
 0x76a   :  { %v2368_v26 = vadd.f32 %v2367_v54, %v2241_v51  ;;  %v2423_v30 = vadd.f32 %v4661_v45, %v2252_v3 }
 0x76b   :  { %v2369_v56 = vpop.f32.mrf.mxu0  ;;  %v2424_v59 = vpop.f32.mrf.mxu1 }
 0x76c   :  { %2644 = vmatmul.mubr.f32.gmra.mxu0 %v2368_v26  ;;  %v2878_v56 = vld [vmem:[#allocation11 + $0x298] sm:$0xff]  ;;  %v2877_v59 = vld [vmem:[#allocation11 + $0x290] sm:$0xff] }
 0x76d   :  { %v2372_v44 = vpop.f32.mrf.mxu0  ;;  %2649 = vmatprep.mubr.f32.mxu0 %v3832_v0  ;;  %v4666_v13 = vpop.f32.mrf.mxu1  ;;  %2953 = vmatpush2.msra.mxu1 %v2878_v56 }
 0x76e   :  { %v2373_v15 = vadd.f32 %v2372_v44, %v2242_v32  ;;  %2954 = vmatprep.subr.mxu1 %v3832_v0  ;;  %v2876_v44 = vld [vmem:[#allocation11 + $0x288] sm:$0xff] }
 0x76f   :  { %v2374_v11 = vpop.f32.mrf.mxu0  ;;  %v2429_v10 = vpop.f32.mrf.mxu1  ;;  %2955 = vmatpush2.msra.mxu1 %v2877_v59 }
 0x770   :  { %2650 = vmatmul.mubr.f32.gmra.mxu0 %v2373_v15  ;;  %2956 = vmatprep.subr.mxu1 %v3832_v0  ;;  %v2253_v15 = vld [vmem:[#allocation7 + $0x298] sm:$0xff]  ;;  %v2254_v10 = vld [vmem:[#allocation7 + $0x2a0] sm:$0xff] }
 0x771   :  { %v2377_v50 = vpop.f32.mrf.mxu0  ;;  %2655 = vmatprep.mubr.f32.mxu0 %v3832_v0  ;;  %v4671_v6 = vpop.f32.mrf.mxu1  ;;  %2957 = vmatpush2.msra.mxu1 %v2876_v44 }
 0x772   :  { %v2378_v52 = vadd.f32 %v2377_v50, %v2243_v43  ;;  %2958 = vmatprep.subr.mxu1 %v3832_v0  ;;  %v2428_v43 = vadd.f32 %v4666_v13, %v2253_v15  ;;  %v2433_v50 = vadd.f32 %v4671_v6, %v2254_v10 }
 0x773   :  { %v2379_v7 = vpop.f32.mrf.mxu0  ;;  %v2434_v16 = vpop.f32.mrf.mxu1  ;;  %2959 = vmatpush2.msra.mxu1 %v2875_v9 }
 0x774   :  { %2656 = vmatmul.mubr.f32.gmra.mxu0 %v2378_v52  ;;  %v2255_v52 = vld [vmem:[#allocation7 + $0x2a8] sm:$0xff]  ;;  %v2256_v16 = vld [vmem:[#allocation7 + $0x2b0] sm:$0xff] }
 0x775   :  { %v2382_v23 = vpop.f32.mrf.mxu0  ;;  %2661 = vmatprep.mubr.f32.mxu0 %v3832_v0  ;;  %v4676_v8 = vpop.f32.mrf.mxu1 }
 0x776   :  { %v2383_v17 = vadd.f32 %v2382_v23, %v2244_v4  ;;  %v2438_v4 = vadd.f32 %v4676_v8, %v2255_v52  ;;  %v2258_v23 = vld [vmem:[#allocation7 + $0x2c0] sm:$0xff]  ;;  %v2259_v8 = vld [vmem:[#allocation7 + $0x2c8] sm:$0xff] }
 0x777   :  { %v2384_v18 = vpop.f32.mrf.mxu0  ;;  %v2439_v28 = vpop.f32.mrf.mxu1 }
 0x778   :  { %2662 = vmatmul.mubr.f32.gmra.mxu0 %v2383_v17  ;;  %v2261_v28 = vld [vmem:[#allocation7 + $0x2d8] sm:$0xff] }
 0x779   :  { %2667 = vmatprep.mubr.f32.mxu0 %v3832_v0  ;;  %v4682_v25 = vpop.f32.mrf.mxu1 }
 0x77a   :  { %v2443_v13 = vadd.f32 %v4682_v25, %v2256_v16  ;;  %v2263_v25 = vld [vmem:[#allocation7 + $0x2e8] sm:$0xff] }
 0x77b   :  { %v2444_v61 = vpop.f32.mrf.mxu1 }
 0x77c   :  { %2668 = vmatmul.mubr.f32.gmra.mxu0 %v2388_v22  ;;  %v2264_v61 = vld [vmem:[#allocation7 + $0x2f0] sm:$0xff] }
 0x77d   :  { %2673 = vmatprep.mubr.f32.mxu0 %v3832_v0  ;;  %v4688_v58 = vpop.f32.mrf.mxu1 }
 0x77e   :  { %v2448_v6 = vadd.f32 %v4688_v58, %v2257_v24  ;;  %v2525_v58 = vld [vmem:[#allocation10 + $0x2] ss:$4 sm:$0x3] }
 0x77f   :  { %v2449_v31 = vpop.f32.mrf.mxu1  ;;  %v4737_v29 = vrot.slane %v2525_v58, %v4032_v40 }
 0x780   :  { %2674 = vmatmul.mubr.f32.gmra.mxu0 %v2393_v2  ;;  %v4740_v31 = vrot.slane %v2525_v58, %v4034_v42 }
 0x781   :  { %2679 = vmatprep.mubr.f32.mxu0 %v3832_v0  ;;  %v4694_v39 = vpop.f32.mrf.mxu1 }
 0x782   :  { %v2453_v38 = vadd.f32 %v4694_v39, %v2258_v23 }
 0x783   :  { %v2454_v41 = vpop.f32.mrf.mxu1 }
 0x784   :  { %2680 = vmatmul.mubr.f32.gmra.mxu0 %v2398_v34 }
 0x785   :  { %2685 = vmatprep.mubr.f32.mxu0 %v3832_v0  ;;  %v4700_v46 = vpop.f32.mrf.mxu1 }
 0x786   :  { %v2458_v17 = vadd.f32 %v4700_v46, %v2259_v8 }
 0x787   :  { %v2459_v48 = vpop.f32.mrf.mxu1 }
 0x788   :  { %2686 = vmatmul.mubr.f32.gmra.mxu0 %v2403_v60 }
 0x789   :  { %2691 = vmatprep.mubr.f32.mxu0 %v3832_v0  ;;  %v4704_v51 = vpop.f32.mrf.mxu1 }
 0x78a   :  { %v2463_v18 = vadd.f32 %v4704_v51, %v2260_v63 }
 0x78b   :  { %v2464_v57 = vpop.f32.mrf.mxu1 }
 0x78c   :  { %2692 = vmatmul.mubr.f32.gmra.mxu0 %v2408_v49 }
 0x78d   :  { %2697 = vmatprep.mubr.f32.mxu0 %v3832_v0  ;;  %v2467_v54 = vpop.f32.mrf.mxu1 }
 0x78e   :  { %v2468_v22 = vadd.f32 %v2467_v54, %v2261_v28 }
 0x78f   :  { %v2469_v26 = vpop.f32.mrf.mxu1 }
 0x790   :  { %2698 = vmatmul.mubr.f32.gmra.mxu0 %v2413_v1 }
 0x791   :  { %2703 = vmatprep.mubr.f32.mxu0 %v3832_v0  ;;  %v2472_v32 = vpop.f32.mrf.mxu1 }
 0x792   :  { %v2473_v21 = vadd.f32 %v2472_v32, %v2262_v20 }
 0x793   :  { %v2474_v62 = vpop.f32.mrf.mxu1 }
 0x794   :  { %2704 = vmatmul.mubr.f32.gmra.mxu0 %v2418_v55 }
 0x795   :  { %2709 = vmatprep.mubr.f32.mxu0 %v3832_v0  ;;  %v2477_v47 = vpop.f32.mrf.mxu1 }
 0x796   :  { %v2478_v37 = vadd.f32 %v2477_v47, %v2263_v25 }
 0x797   :  { %v2479_v11 = vpop.f32.mrf.mxu1 }
 0x798   :  { %2710 = vmatmul.mubr.f32.gmra.mxu0 %v2423_v30 }
 0x799   :  { %2715 = vmatprep.mubr.f32.mxu0 %v3832_v0  ;;  %v2482_v45 = vpop.f32.mrf.mxu1 }
 0x79a   :  { %v2483_v2 = vadd.f32 %v2482_v45, %v2264_v61 }
 0x79b   :  { %v2484_v12 = vpop.f32.mrf.mxu1 }
 0x79c   :  { %2716 = vmatmul.mubr.f32.gmra.mxu0 %v2428_v43 }
 0x79d   :  { %2721 = vmatprep.mubr.f32.mxu0 %v3832_v0  ;;  %v2487_v19 = vpop.f32.mrf.mxu1 }
 0x79e   :  { %v2488_v27 = vadd.f32 %v2487_v19, %v2265_v5 }
 0x79f   :  { %v2489_v7 = vpop.f32.mrf.mxu1 }
 0x7a0   :  { %2722 = vmatmul.mubr.f32.gmra.mxu0 %v2433_v50 }
 0x7a1   :  { %2727 = vmatprep.mubr.f32.mxu0 %v3832_v0 }
 0x7a4   :  { %2728 = vmatmul.mubr.f32.gmra.mxu0 %v2438_v4 }
 0x7a5   :  { %2733 = vmatprep.mubr.f32.mxu0 %v3832_v0 }
 0x7a8   :  { %2734 = vmatmul.mubr.f32.gmra.mxu0 %v2443_v13 }
 0x7a9   :  { %2739 = vmatprep.mubr.f32.mxu0 %v3832_v0 }
 0x7ac   :  { %2740 = vmatmul.mubr.f32.gmra.mxu0 %v2448_v6 }
 0x7ad   :  { %2745 = vmatprep.mubr.f32.mxu0 %v3832_v0 }
 0x7b0   :  { %2746 = vmatmul.mubr.f32.gmra.mxu0 %v2453_v38 }
 0x7b1   :  { %2751 = vmatprep.mubr.f32.mxu0 %v3832_v0 }
 0x7b4   :  { %2752 = vmatmul.mubr.f32.gmra.mxu0 %v2458_v17 }
 0x7b5   :  { %2757 = vmatprep.mubr.f32.mxu0 %v3832_v0 }
 0x7b8   :  { %2758 = vmatmul.mubr.f32.gmra.mxu0 %v2463_v18 }
 0x7b9   :  { %2763 = vmatprep.mubr.f32.mxu0 %v3832_v0 }
 0x7bc   :  { %2764 = vmatmul.mubr.f32.gmra.mxu0 %v2468_v22 }
 0x7bd   :  { %2769 = vmatprep.mubr.f32.mxu0 %v3832_v0 }
 0x7c0   :  { %2770 = vmatmul.mubr.f32.gmra.mxu0 %v2473_v21 }
 0x7c1   :  { %2775 = vmatprep.mubr.f32.mxu0 %v3832_v0 }
 0x7c4   :  { %2776 = vmatmul.mubr.f32.gmra.mxu0 %v2478_v37 }
 0x7c5   :  { %2781 = vmatprep.mubr.f32.mxu0 %v3832_v0 }
 0x7c8   :  { %2782 = vmatmul.mubr.f32.gmra.mxu0 %v2483_v2 }
 0x7c9   :  { %2787 = vmatprep.mubr.f32.mxu0 %v3832_v0 }
 0x7cc   :  { %2788 = vmatmul.mubr.f32.gmra.mxu0 %v2488_v27 }
 0x810   :  { %v2603_v34 = vpop.f32.mrf.mxu0 }
 0x811   :  { %v2604_v35 = vadd.f32 %v2603_v34, %v4737_v29 }
 0x812   :  { %v2605_v36 = vpop.f32.mrf.mxu0 }
 0x813   :  { %v2606_v39 = vadd.f32 %v2605_v36, %v4740_v31  ;;  %v2794_v33 = vmax.f32 %v2604_v35, 0.0 }
 0x814   :  { %v2609_v41 = vpop.f32.mrf.mxu0 }
 0x815   :  { %v2795_v60 = vmax.f32 %v2606_v39, 0.0  ;;  %v2610_v46 = vadd.f32 %v2609_v41, %v4737_v29 }
 0x816   :  { %v2611_v0 = vpop.f32.mrf.mxu0 }
 0x817   :  { %v2612_v48 = vadd.f32 %v2611_v0, %v4740_v31  ;;  %2960 = vmatprep.mubr.f32.mxu1 %v2795_v60  ;;  %v2796_v42 = vmax.f32 %v2610_v46, 0.0 }
 0x818   :  { %v2615_v40 = vpop.f32.mrf.mxu0  ;;  %2961 = vmatmul.mubr.f32.vlgmr.msra.gmra.mxu1 %v2794_v33 }
 0x819   :  { %v2797_v49 = vmax.f32 %v2612_v48, 0.0  ;;  %v2616_v14 = vadd.f32 %v2615_v40, %v4737_v29 }
 0x81a   :  { %v2617_v51 = vpop.f32.mrf.mxu0 }
 0x81b   :  { %v2618_v57 = vadd.f32 %v2617_v51, %v4740_v31  ;;  %2965 = vmatprep.mubr.f32.mxu1 %v2797_v49  ;;  %v2798_v54 = vmax.f32 %v2616_v14, 0.0 }
 0x81c   :  { %v2621_v1 = vpop.f32.mrf.mxu0  ;;  %2966 = vmatmul.mubr.f32.gmra.mxu1 %v2796_v42 }
 0x81d   :  { %v2799_v53 = vmax.f32 %v2618_v57, 0.0  ;;  %v2622_v26 = vadd.f32 %v2621_v1, %v4737_v29 }
 0x81e   :  { %v2623_v55 = vpop.f32.mrf.mxu0 }
 0x81f   :  { %v2624_v56 = vadd.f32 %v2623_v55, %v4740_v31  ;;  %2970 = vmatprep.mubr.f32.mxu1 %v2799_v53  ;;  %v2800_v59 = vmax.f32 %v2622_v26, 0.0 }
 0x820   :  { %v2627_v3 = vpop.f32.mrf.mxu0  ;;  %2971 = vmatmul.mubr.f32.gmra.mxu1 %v2798_v54 }
 0x821   :  { %v2801_v32 = vmax.f32 %v2624_v56, 0.0  ;;  %v2628_v62 = vadd.f32 %v2627_v3, %v4737_v29 }
 0x822   :  { %v2629_v30 = vpop.f32.mrf.mxu0 }
 0x823   :  { %v2630_v44 = vadd.f32 %v2629_v30, %v4740_v31  ;;  %2975 = vmatprep.mubr.f32.mxu1 %v2801_v32  ;;  %v2802_v9 = vmax.f32 %v2628_v62, 0.0 }
 0x824   :  { %v2633_v15 = vpop.f32.mrf.mxu0  ;;  %2976 = vmatmul.mubr.f32.gmra.mxu1 %v2800_v59 }
 0x825   :  { %v2803_v47 = vmax.f32 %v2630_v44, 0.0  ;;  %v2634_v11 = vadd.f32 %v2633_v15, %v4737_v29 }
 0x826   :  { %v2635_v43 = vpop.f32.mrf.mxu0 }
 0x827   :  { %v2636_v10 = vadd.f32 %v2635_v43, %v4740_v31  ;;  %2980 = vmatprep.mubr.f32.mxu1 %v2803_v47  ;;  %v2804_v50 = vmax.f32 %v2634_v11, 0.0 }
 0x828   :  { %v2639_v45 = vpop.f32.mrf.mxu0  ;;  %2981 = vmatmul.mubr.f32.gmra.mxu1 %v2802_v9 }
 0x829   :  { %v2805_v12 = vmax.f32 %v2636_v10, 0.0  ;;  %v2640_v52 = vadd.f32 %v2639_v45, %v4737_v29 }
 0x82a   :  { %v2641_v19 = vpop.f32.mrf.mxu0 }
 0x82b   :  { %v2642_v7 = vadd.f32 %v2641_v19, %v4740_v31  ;;  %2985 = vmatprep.mubr.f32.mxu1 %v2805_v12  ;;  %v2806_v13 = vmax.f32 %v2640_v52, 0.0 }
 0x82c   :  { %v2645_v4 = vpop.f32.mrf.mxu0  ;;  %2986 = vmatmul.mubr.f32.gmra.mxu1 %v2804_v50 }
 0x82d   :  { %v2807_v16 = vmax.f32 %v2642_v7, 0.0  ;;  %v2646_v24 = vadd.f32 %v2645_v4, %v4737_v29 }
 0x82e   :  { %v2647_v6 = vpop.f32.mrf.mxu0 }
 0x82f   :  { %v2648_v23 = vadd.f32 %v2647_v6, %v4740_v31  ;;  %2990 = vmatprep.mubr.f32.mxu1 %v2807_v16  ;;  %v2808_v17 = vmax.f32 %v2646_v24, 0.0 }
 0x830   :  { %v2651_v38 = vpop.f32.mrf.mxu0  ;;  %2991 = vmatmul.mubr.f32.gmra.mxu1 %v2806_v13 }
 0x831   :  { %v2809_v8 = vmax.f32 %v2648_v23, 0.0  ;;  %v2652_v63 = vadd.f32 %v2651_v38, %v4737_v29 }
 0x832   :  { %v2653_v18 = vpop.f32.mrf.mxu0 }
 0x833   :  { %v2654_v28 = vadd.f32 %v2653_v18, %v4740_v31  ;;  %2995 = vmatprep.mubr.f32.mxu1 %v2809_v8  ;;  %v2810_v21 = vmax.f32 %v2652_v63, 0.0 }
 0x834   :  { %v2657_v22 = vpop.f32.mrf.mxu0  ;;  %2996 = vmatmul.mubr.f32.gmra.mxu1 %v2808_v17 }
 0x835   :  { %v2811_v20 = vmax.f32 %v2654_v28, 0.0  ;;  %v2658_v25 = vadd.f32 %v2657_v22, %v4737_v29 }
 0x836   :  { %v2659_v37 = vpop.f32.mrf.mxu0 }
 0x837   :  { %v2660_v61 = vadd.f32 %v2659_v37, %v4740_v31  ;;  %3000 = vmatprep.mubr.f32.mxu1 %v2811_v20  ;;  %v2812_v27 = vmax.f32 %v2658_v25, 0.0 }
 0x838   :  { %v2663_v2 = vpop.f32.mrf.mxu0  ;;  %3001 = vmatmul.mubr.f32.gmra.mxu1 %v2810_v21 }
 0x839   :  { %v2813_v5 = vmax.f32 %v2660_v61, 0.0  ;;  %v2664_v58 = vadd.f32 %v2663_v2, %v4737_v29 }
 0x83a   :  { %v2665_v34 = vpop.f32.mrf.mxu0 }
 0x83b   :  { %v2666_v35 = vadd.f32 %v2665_v34, %v4740_v31  ;;  %3005 = vmatprep.mubr.f32.mxu1 %v2813_v5  ;;  %v2814_v41 = vmax.f32 %v2664_v58, 0.0 }
 0x83c   :  { %v2669_v36 = vpop.f32.mrf.mxu0  ;;  %3006 = vmatmul.mubr.f32.gmra.mxu1 %v2812_v27 }
 0x83d   :  { %v2815_v39 = vmax.f32 %v2666_v35, 0.0  ;;  %v2670_v60 = vadd.f32 %v2669_v36, %v4737_v29 }
 0x83e   :  { %v2671_v33 = vpop.f32.mrf.mxu0 }
 0x83f   :  { %v2672_v46 = vadd.f32 %v2671_v33, %v4740_v31  ;;  %3010 = vmatprep.mubr.f32.mxu1 %v2815_v39  ;;  %v2816_v40 = vmax.f32 %v2670_v60, 0.0 }
 0x840   :  { %v2675_v0 = vpop.f32.mrf.mxu0  ;;  %3011 = vmatmul.mubr.f32.gmra.mxu1 %v2814_v41 }
 0x841   :  { %v2817_v48 = vmax.f32 %v2672_v46, 0.0  ;;  %v2676_v49 = vadd.f32 %v2675_v0, %v4737_v29 }
 0x842   :  { %v2677_v42 = vpop.f32.mrf.mxu0 }
 0x843   :  { %v2678_v14 = vadd.f32 %v2677_v42, %v4740_v31  ;;  %3015 = vmatprep.mubr.f32.mxu1 %v2817_v48  ;;  %v2818_v1 = vmax.f32 %v2676_v49, 0.0 }
 0x844   :  { %v2681_v51 = vpop.f32.mrf.mxu0  ;;  %3016 = vmatmul.mubr.f32.gmra.mxu1 %v2816_v40 }
 0x845   :  { %v2819_v57 = vmax.f32 %v2678_v14, 0.0  ;;  %v2682_v53 = vadd.f32 %v2681_v51, %v4737_v29 }
 0x846   :  { %v2683_v54 = vpop.f32.mrf.mxu0 }
 0x847   :  { %v2684_v26 = vadd.f32 %v2683_v54, %v4740_v31  ;;  %3020 = vmatprep.mubr.f32.mxu1 %v2819_v57  ;;  %v2820_v3 = vmax.f32 %v2682_v53, 0.0 }
 0x848   :  { %v2687_v55 = vpop.f32.mrf.mxu0  ;;  %3021 = vmatmul.mubr.f32.gmra.mxu1 %v2818_v1 }
 0x849   :  { %v2821_v56 = vmax.f32 %v2684_v26, 0.0  ;;  %v2688_v32 = vadd.f32 %v2687_v55, %v4737_v29 }
 0x84a   :  { %v2689_v59 = vpop.f32.mrf.mxu0 }
 0x84b   :  { %v2690_v62 = vadd.f32 %v2689_v59, %v4740_v31  ;;  %3025 = vmatprep.mubr.f32.mxu1 %v2821_v56  ;;  %v2822_v15 = vmax.f32 %v2688_v32, 0.0 }
 0x84c   :  { %v2693_v30 = vpop.f32.mrf.mxu0  ;;  %3026 = vmatmul.mubr.f32.gmra.mxu1 %v2820_v3 }
 0x84d   :  { %v2823_v44 = vmax.f32 %v2690_v62, 0.0  ;;  %v2694_v47 = vadd.f32 %v2693_v30, %v4737_v29 }
 0x84e   :  { %v2695_v9 = vpop.f32.mrf.mxu0 }
 0x84f   :  { %v2696_v11 = vadd.f32 %v2695_v9, %v4740_v31  ;;  %3030 = vmatprep.mubr.f32.mxu1 %v2823_v44  ;;  %v2824_v45 = vmax.f32 %v2694_v47, 0.0 }
 0x850   :  { %v2699_v43 = vpop.f32.mrf.mxu0  ;;  %3031 = vmatmul.mubr.f32.gmra.mxu1 %v2822_v15 }
 0x851   :  { %v2825_v10 = vmax.f32 %v2696_v11, 0.0  ;;  %v2700_v12 = vadd.f32 %v2699_v43, %v4737_v29 }
 0x852   :  { %v2701_v50 = vpop.f32.mrf.mxu0 }
 0x853   :  { %v2702_v52 = vadd.f32 %v2701_v50, %v4740_v31  ;;  %3035 = vmatprep.mubr.f32.mxu1 %v2825_v10  ;;  %v2826_v4 = vmax.f32 %v2700_v12, 0.0 }
 0x854   :  { %v2705_v19 = vpop.f32.mrf.mxu0  ;;  %3036 = vmatmul.mubr.f32.gmra.mxu1 %v2824_v45 }
 0x855   :  { %v2827_v7 = vmax.f32 %v2702_v52, 0.0  ;;  %v2706_v16 = vadd.f32 %v2705_v19, %v4737_v29 }
 0x856   :  { %v2707_v13 = vpop.f32.mrf.mxu0 }
 0x857   :  { %v2708_v24 = vadd.f32 %v2707_v13, %v4740_v31  ;;  %3040 = vmatprep.mubr.f32.mxu1 %v2827_v7  ;;  %v2828_v38 = vmax.f32 %v2706_v16, 0.0 }
 0x858   :  { %v2711_v6 = vpop.f32.mrf.mxu0  ;;  %3041 = vmatmul.mubr.f32.gmra.mxu1 %v2826_v4 }
 0x859   :  { %v2829_v23 = vmax.f32 %v2708_v24, 0.0  ;;  %v2712_v8 = vadd.f32 %v2711_v6, %v4737_v29 }
 0x85a   :  { %v2713_v17 = vpop.f32.mrf.mxu0 }
 0x85b   :  { %v2714_v63 = vadd.f32 %v2713_v17, %v4740_v31  ;;  %3045 = vmatprep.mubr.f32.mxu1 %v2829_v23  ;;  %v2830_v22 = vmax.f32 %v2712_v8, 0.0 }
 0x85c   :  { %v2717_v18 = vpop.f32.mrf.mxu0  ;;  %3046 = vmatmul.mubr.f32.gmra.mxu1 %v2828_v38 }
 0x85d   :  { %v2831_v28 = vmax.f32 %v2714_v63, 0.0  ;;  %v2718_v20 = vadd.f32 %v2717_v18, %v4737_v29 }
 0x85e   :  { %v2719_v21 = vpop.f32.mrf.mxu0 }
 0x85f   :  { %v2720_v25 = vadd.f32 %v2719_v21, %v4740_v31  ;;  %3050 = vmatprep.mubr.f32.mxu1 %v2831_v28  ;;  %v2832_v2 = vmax.f32 %v2718_v20, 0.0 }
 0x860   :  { %v2723_v37 = vpop.f32.mrf.mxu0  ;;  %3051 = vmatmul.mubr.f32.gmra.mxu1 %v2830_v22 }
 0x861   :  { %v2833_v61 = vmax.f32 %v2720_v25, 0.0  ;;  %v2724_v5 = vadd.f32 %v2723_v37, %v4737_v29 }
 0x862   :  { %v2725_v27 = vpop.f32.mrf.mxu0 }
 0x863   :  { %v2726_v58 = vadd.f32 %v2725_v27, %v4740_v31  ;;  %3055 = vmatprep.mubr.f32.mxu1 %v2833_v61  ;;  %v2834_v36 = vmax.f32 %v2724_v5, 0.0 }
 0x864   :  { %v2729_v34 = vpop.f32.mrf.mxu0  ;;  %3056 = vmatmul.mubr.f32.gmra.mxu1 %v2832_v2 }
 0x865   :  { %v2835_v35 = vmax.f32 %v2726_v58, 0.0  ;;  %v2730_v39 = vadd.f32 %v2729_v34, %v4737_v29 }
 0x866   :  { %v2731_v41 = vpop.f32.mrf.mxu0 }
 0x867   :  { %v2732_v60 = vadd.f32 %v2731_v41, %v4740_v31  ;;  %3060 = vmatprep.mubr.f32.mxu1 %v2835_v35  ;;  %v2836_v0 = vmax.f32 %v2730_v39, 0.0 }
 0x868   :  { %v2735_v33 = vpop.f32.mrf.mxu0  ;;  %3061 = vmatmul.mubr.f32.gmra.mxu1 %v2834_v36 }
 0x869   :  { %v2837_v46 = vmax.f32 %v2732_v60, 0.0  ;;  %v2736_v48 = vadd.f32 %v2735_v33, %v4737_v29  ;;  %v4806_v33 = vld [vmem:[#allocation13 + $0x2] ss:$0 sm:$0xff] }
 0x86a   :  { %v2737_v40 = vpop.f32.mrf.mxu0 }
 0x86b   :  { %v2738_v49 = vadd.f32 %v2737_v40, %v4740_v31  ;;  %3065 = vmatprep.mubr.f32.mxu1 %v2837_v46  ;;  %v2838_v51 = vmax.f32 %v2736_v48, 0.0  ;;  %v4811_v40 = vld [vmem:[#allocation16 + $0x2] ss:$0 sm:$0xff] }
 0x86c   :  { %v2741_v42 = vpop.f32.mrf.mxu0  ;;  %3066 = vmatmul.mubr.f32.gmra.mxu1 %v2836_v0  ;;  %v4808_v0 = vld [vmem:[#allocation14 + $0x2] ss:$0 sm:$0xff] }
 0x86d   :  { %v2839_v14 = vmax.f32 %v2738_v49, 0.0  ;;  %v2742_v57 = vadd.f32 %v2741_v42, %v4737_v29 }
 0x86e   :  { %v2743_v1 = vpop.f32.mrf.mxu0 }
 0x86f   :  { %v2744_v53 = vadd.f32 %v2743_v1, %v4740_v31  ;;  %3070 = vmatprep.mubr.f32.mxu1 %v2839_v14  ;;  %v2840_v55 = vmax.f32 %v2742_v57, 0.0 }
 0x870   :  { %v2747_v54 = vpop.f32.mrf.mxu0  ;;  %3071 = vmatmul.mubr.f32.gmra.mxu1 %v2838_v51 }
 0x871   :  { %v2841_v26 = vmax.f32 %v2744_v53, 0.0  ;;  %v2748_v56 = vadd.f32 %v2747_v54, %v4737_v29 }
 0x872   :  { %v2749_v3 = vpop.f32.mrf.mxu0 }
 0x873   :  { %v2750_v32 = vadd.f32 %v2749_v3, %v4740_v31  ;;  %3075 = vmatprep.mubr.f32.mxu1 %v2841_v26  ;;  %v2842_v30 = vmax.f32 %v2748_v56, 0.0 }
 0x874   :  { %v2753_v59 = vpop.f32.mrf.mxu0  ;;  %3076 = vmatmul.mubr.f32.gmra.mxu1 %v2840_v55 }
 0x875   :  { %v2843_v62 = vmax.f32 %v2750_v32, 0.0  ;;  %v2754_v44 = vadd.f32 %v2753_v59, %v4737_v29 }
 0x876   :  { %v2755_v15 = vpop.f32.mrf.mxu0 }
 0x877   :  { %v2756_v47 = vadd.f32 %v2755_v15, %v4740_v31  ;;  %3080 = vmatprep.mubr.f32.mxu1 %v2843_v62  ;;  %v2844_v43 = vmax.f32 %v2754_v44, 0.0 }
 0x878   :  { %v2759_v9 = vpop.f32.mrf.mxu0  ;;  %3081 = vmatmul.mubr.f32.gmra.mxu1 %v2842_v30 }
 0x879   :  { %v2845_v11 = vmax.f32 %v2756_v47, 0.0  ;;  %v2760_v10 = vadd.f32 %v2759_v9, %v4737_v29 }
 0x87a   :  { %v2761_v45 = vpop.f32.mrf.mxu0 }
 0x87b   :  { %v2762_v12 = vadd.f32 %v2761_v45, %v4740_v31  ;;  %3085 = vmatprep.mubr.f32.mxu1 %v2845_v11  ;;  %v2846_v19 = vmax.f32 %v2760_v10, 0.0 }
 0x87c   :  { %v2765_v50 = vpop.f32.mrf.mxu0  ;;  %3086 = vmatmul.mubr.f32.gmra.mxu1 %v2844_v43 }
 0x87d   :  { %v2847_v52 = vmax.f32 %v2762_v12, 0.0  ;;  %v2766_v7 = vadd.f32 %v2765_v50, %v4737_v29 }
 0x87e   :  { %v2767_v4 = vpop.f32.mrf.mxu0 }
 0x87f   :  { %v2768_v16 = vadd.f32 %v2767_v4, %v4740_v31  ;;  %3090 = vmatprep.mubr.f32.mxu1 %v2847_v52  ;;  %v2848_v6 = vmax.f32 %v2766_v7, 0.0 }
 0x880   :  { %v2771_v13 = vpop.f32.mrf.mxu0  ;;  %3091 = vmatmul.mubr.f32.gmra.mxu1 %v2846_v19 }
 0x881   :  { %v2849_v24 = vmax.f32 %v2768_v16, 0.0  ;;  %v2772_v23 = vadd.f32 %v2771_v13, %v4737_v29 }
 0x882   :  { %v2773_v38 = vpop.f32.mrf.mxu0 }
 0x883   :  { %v2774_v8 = vadd.f32 %v2773_v38, %v4740_v31  ;;  %3095 = vmatprep.mubr.f32.mxu1 %v2849_v24  ;;  %v2850_v18 = vmax.f32 %v2772_v23, 0.0 }
 0x884   :  { %v2777_v17 = vpop.f32.mrf.mxu0  ;;  %3096 = vmatmul.mubr.f32.gmra.mxu1 %v2848_v6 }
 0x885   :  { %v2851_v63 = vmax.f32 %v2774_v8, 0.0  ;;  %v2778_v28 = vadd.f32 %v2777_v17, %v4737_v29 }
 0x886   :  { %v2779_v22 = vpop.f32.mrf.mxu0 }
 0x887   :  { %v2780_v20 = vadd.f32 %v2779_v22, %v4740_v31  ;;  %3100 = vmatprep.mubr.f32.mxu1 %v2851_v63  ;;  %v2852_v37 = vmax.f32 %v2778_v28, 0.0  ;;  %v3228_v63 = vld [vmem:[%s5028_s9 + $0x8] sm:$0xff] }
 0x888   :  { %v2783_v21 = vpop.f32.mrf.mxu0  ;;  %3101 = vmatmul.mubr.f32.gmra.mxu1 %v2850_v18  ;;  %3293 = vmatprep.mubr.f32.mxu0 %v3228_v63 }
 0x889   :  { %v2853_v25 = vmax.f32 %v2780_v20, 0.0  ;;  %v2784_v61 = vadd.f32 %v2783_v21, %v4737_v29 }
 0x88a   :  { %v2785_v2 = vpop.f32.mrf.mxu0 }
 0x88b   :  { %v2786_v5 = vadd.f32 %v2785_v2, %v4740_v31  ;;  %3105 = vmatprep.mubr.f32.mxu1 %v2853_v25  ;;  %v2854_v34 = vmax.f32 %v2784_v61, 0.0 }
 0x88c   :  { %v2789_v27 = vpop.f32.mrf.mxu0  ;;  %3106 = vmatmul.mubr.f32.gmra.mxu1 %v2852_v37 }
 0x88d   :  { %v2855_v58 = vmax.f32 %v2786_v5, 0.0  ;;  %v2790_v35 = vadd.f32 %v2789_v27, %v4737_v29 }
 0x88e   :  { %v2791_v36 = vpop.f32.mrf.mxu0 }
 0x88f   :  { %v2792_v39 = vadd.f32 %v2791_v36, %v4740_v31  ;;  %3110 = vmatprep.mubr.f32.mxu1 %v2855_v58  ;;  %v2856_v60 = vmax.f32 %v2790_v35, 0.0 }
 0x890   :  { %3111 = vmatmul.mubr.f32.gmra.mxu1 %v2854_v34 }
 0x891   :  { %v2857_v41 = vmax.f32 %v2792_v39, 0.0 }
 0x893   :  { %3115 = vmatprep.mubr.f32.mxu1 %v2857_v41 }
 0x894   :  { %3116 = vmatmul.mubr.f32.gmra.mxu1 %v2856_v60 }
 0x8d8   :  { %v2962_v46 = vpop.f32.mrf.mxu1 }
 0x8d9   :  { %v2963_v48 = vadd.f32 %v4806_v33, %v2962_v46 }
 0x8da   :  { %v2964_v49 = vpop.f32.mrf.mxu1 }
 0x8db   :  { %v3126_v29 = vmul.f32 %v4808_v0, %v2963_v48 }
 0x8dc   :  { %v2967_v42 = vpop.f32.mrf.mxu1 }
 0x8dd   :  { %v4815_v31 = vadd.f32 %v4811_v40, %v3126_v29  ;;  %v2968_v14 = vadd.f32 %v4806_v33, %v2967_v42 }
 0x8de   :  { %v2969_v51 = vpop.f32.mrf.mxu1 }
 0x8df   :  { %3195 = vst [vmem:[#allocation18] sm:$0xff] %v4815_v31  ;;  %v3127_v57 = vmul.f32 %v4808_v0, %v2968_v14 }
 0x8e0   :  { %v2972_v1 = vpop.f32.mrf.mxu1 }
 0x8e1   :  { %v4821_v53 = vadd.f32 %v4811_v40, %v3127_v57  ;;  %v2973_v54 = vadd.f32 %v4806_v33, %v2972_v1 }
 0x8e2   :  { %v2974_v26 = vpop.f32.mrf.mxu1 }
 0x8e3   :  { %3196 = vst [vmem:[#allocation18 + $0x8] sm:$0xff] %v4821_v53  ;;  %v3128_v55 = vmul.f32 %v4808_v0, %v2973_v54 }
 0x8e4   :  { %v2977_v56 = vpop.f32.mrf.mxu1 }
 0x8e5   :  { %v4827_v3 = vadd.f32 %v4811_v40, %v3128_v55  ;;  %v2978_v32 = vadd.f32 %v4806_v33, %v2977_v56 }
 0x8e6   :  { %v2979_v59 = vpop.f32.mrf.mxu1 }
 0x8e7   :  { %3197 = vst [vmem:[#allocation18 + $0x10] sm:$0xff] %v4827_v3  ;;  %v3129_v62 = vmul.f32 %v4808_v0, %v2978_v32 }
 0x8e8   :  { %v2982_v30 = vpop.f32.mrf.mxu1 }
 0x8e9   :  { %v4833_v44 = vadd.f32 %v4811_v40, %v3129_v62  ;;  %v2983_v15 = vadd.f32 %v4806_v33, %v2982_v30 }
 0x8ea   :  { %v2984_v47 = vpop.f32.mrf.mxu1 }
 0x8eb   :  { %3198 = vst [vmem:[#allocation18 + $0x18] sm:$0xff] %v4833_v44  ;;  %v3130_v9 = vmul.f32 %v4808_v0, %v2983_v15 }
 0x8ec   :  { %v2987_v11 = vpop.f32.mrf.mxu1 }
 0x8ed   :  { %v4839_v43 = vadd.f32 %v4811_v40, %v3130_v9  ;;  %v2988_v10 = vadd.f32 %v4806_v33, %v2987_v11 }
 0x8ee   :  { %v2989_v45 = vpop.f32.mrf.mxu1 }
 0x8ef   :  { %3199 = vst [vmem:[#allocation18 + $0x20] sm:$0xff] %v4839_v43  ;;  %v3131_v12 = vmul.f32 %v4808_v0, %v2988_v10 }
 0x8f0   :  { %v2992_v50 = vpop.f32.mrf.mxu1 }
 0x8f1   :  { %v4845_v52 = vadd.f32 %v4811_v40, %v3131_v12  ;;  %v2993_v19 = vadd.f32 %v4806_v33, %v2992_v50 }
 0x8f2   :  { %v2994_v7 = vpop.f32.mrf.mxu1 }
 0x8f3   :  { %3200 = vst [vmem:[#allocation18 + $0x28] sm:$0xff] %v4845_v52  ;;  %v3132_v4 = vmul.f32 %v4808_v0, %v2993_v19 }
 0x8f4   :  { %v2997_v16 = vpop.f32.mrf.mxu1 }
 0x8f5   :  { %v4851_v13 = vadd.f32 %v4811_v40, %v3132_v4  ;;  %v2998_v24 = vadd.f32 %v4806_v33, %v2997_v16 }
 0x8f6   :  { %v2999_v6 = vpop.f32.mrf.mxu1 }
 0x8f7   :  { %3201 = vst [vmem:[#allocation18 + $0x30] sm:$0xff] %v4851_v13  ;;  %v3133_v23 = vmul.f32 %v4808_v0, %v2998_v24 }
 0x8f8   :  { %v3002_v38 = vpop.f32.mrf.mxu1 }
 0x8f9   :  { %v4857_v8 = vadd.f32 %v4811_v40, %v3133_v23  ;;  %v3003_v17 = vadd.f32 %v4806_v33, %v3002_v38 }
 0x8fa   :  { %v3004_v18 = vpop.f32.mrf.mxu1 }
 0x8fb   :  { %3202 = vst [vmem:[#allocation18 + $0x38] sm:$0xff] %v4857_v8  ;;  %v3134_v28 = vmul.f32 %v4808_v0, %v3003_v17 }
 0x8fc   :  { %v3007_v22 = vpop.f32.mrf.mxu1 }
 0x8fd   :  { %v4866_v20 = vadd.f32 %v4811_v40, %v3134_v28  ;;  %v3008_v21 = vadd.f32 %v4806_v33, %v3007_v22 }
 0x8fe   :  { %v3009_v25 = vpop.f32.mrf.mxu1 }
 0x8ff   :  { %3203 = vst [vmem:[#allocation18 + $0x40] sm:$0xff] %v4866_v20  ;;  %v3135_v37 = vmul.f32 %v4808_v0, %v3008_v21 }
 0x900   :  { %v3012_v61 = vpop.f32.mrf.mxu1 }
 0x901   :  { %v4872_v2 = vadd.f32 %v4811_v40, %v3135_v37  ;;  %v3013_v5 = vadd.f32 %v4806_v33, %v3012_v61 }
 0x902   :  { %v3014_v27 = vpop.f32.mrf.mxu1 }
 0x903   :  { %3204 = vst [vmem:[#allocation18 + $0x48] sm:$0xff] %v4872_v2  ;;  %v3136_v58 = vmul.f32 %v4808_v0, %v3013_v5 }
 0x904   :  { %v3017_v34 = vpop.f32.mrf.mxu1 }
 0x905   :  { %v4878_v35 = vadd.f32 %v4811_v40, %v3136_v58  ;;  %v3018_v36 = vadd.f32 %v4806_v33, %v3017_v34 }
 0x906   :  { %v3019_v39 = vpop.f32.mrf.mxu1 }
 0x907   :  { %3205 = vst [vmem:[#allocation18 + $0x50] sm:$0xff] %v4878_v35  ;;  %v3137_v41 = vmul.f32 %v4808_v0, %v3018_v36 }
 0x908   :  { %v3022_v60 = vpop.f32.mrf.mxu1 }
 0x909   :  { %v4884_v46 = vadd.f32 %v4811_v40, %v3137_v41  ;;  %v3023_v48 = vadd.f32 %v4806_v33, %v3022_v60 }
 0x90a   :  { %v3024_v49 = vpop.f32.mrf.mxu1 }
 0x90b   :  { %3206 = vst [vmem:[#allocation18 + $0x58] sm:$0xff] %v4884_v46  ;;  %v3138_v29 = vmul.f32 %v4808_v0, %v3023_v48 }
 0x90c   :  { %v3027_v42 = vpop.f32.mrf.mxu1 }
 0x90d   :  { %v4890_v14 = vadd.f32 %v4811_v40, %v3138_v29  ;;  %v3028_v51 = vadd.f32 %v4806_v33, %v3027_v42 }
 0x90e   :  { %v3029_v57 = vpop.f32.mrf.mxu1 }
 0x90f   :  { %3207 = vst [vmem:[#allocation18 + $0x60] sm:$0xff] %v4890_v14  ;;  %v3139_v1 = vmul.f32 %v4808_v0, %v3028_v51 }
 0x910   :  { %v3032_v54 = vpop.f32.mrf.mxu1 }
 0x911   :  { %v4896_v26 = vadd.f32 %v4811_v40, %v3139_v1  ;;  %v3033_v55 = vadd.f32 %v4806_v33, %v3032_v54 }
 0x912   :  { %v3034_v56 = vpop.f32.mrf.mxu1 }
 0x913   :  { %3208 = vst [vmem:[#allocation18 + $0x68] sm:$0xff] %v4896_v26  ;;  %v3140_v32 = vmul.f32 %v4808_v0, %v3033_v55 }
 0x914   :  { %v3037_v59 = vpop.f32.mrf.mxu1 }
 0x915   :  { %v4902_v62 = vadd.f32 %v4811_v40, %v3140_v32  ;;  %v3038_v30 = vadd.f32 %v4806_v33, %v3037_v59 }
 0x916   :  { %v3039_v15 = vpop.f32.mrf.mxu1 }
 0x917   :  { %3209 = vst [vmem:[#allocation18 + $0x70] sm:$0xff] %v4902_v62  ;;  %v3141_v47 = vmul.f32 %v4808_v0, %v3038_v30 }
 0x918   :  { %v3042_v9 = vpop.f32.mrf.mxu1 }
 0x919   :  { %v4908_v11 = vadd.f32 %v4811_v40, %v3141_v47  ;;  %v3043_v10 = vadd.f32 %v4806_v33, %v3042_v9 }
 0x91a   :  { %v3044_v45 = vpop.f32.mrf.mxu1 }
 0x91b   :  { %3210 = vst [vmem:[#allocation18 + $0x78] sm:$0xff] %v4908_v11  ;;  %v3142_v12 = vmul.f32 %v4808_v0, %v3043_v10 }
 0x91c   :  { %v3047_v50 = vpop.f32.mrf.mxu1 }
 0x91d   :  { %v3048_v19 = vadd.f32 %v4806_v33, %v3047_v50  ;;  %v4915_v7 = vadd.f32 %v4811_v40, %v3142_v12 }
 0x91e   :  { %v3049_v4 = vpop.f32.mrf.mxu1 }
 0x91f   :  { %v3143_v16 = vmul.f32 %v4808_v0, %v3048_v19  ;;  %3211 = vst [vmem:[#allocation18 + $0x80] sm:$0xff] %v4915_v7 }
 0x920   :  { %v3052_v24 = vpop.f32.mrf.mxu1 }
 0x921   :  { %v3053_v6 = vadd.f32 %v4806_v33, %v3052_v24  ;;  %v4921_v23 = vadd.f32 %v4811_v40, %v3143_v16 }
 0x922   :  { %v3054_v38 = vpop.f32.mrf.mxu1 }
 0x923   :  { %v3144_v17 = vmul.f32 %v4808_v0, %v3053_v6  ;;  %3212 = vst [vmem:[#allocation18 + $0x88] sm:$0xff] %v4921_v23 }
 0x924   :  { %v3057_v63 = vpop.f32.mrf.mxu1 }
 0x925   :  { %v3058_v18 = vadd.f32 %v4806_v33, %v3057_v63  ;;  %v4927_v28 = vadd.f32 %v4811_v40, %v3144_v17 }
 0x926   :  { %v3059_v22 = vpop.f32.mrf.mxu1 }
 0x927   :  { %v3145_v21 = vmul.f32 %v4808_v0, %v3058_v18  ;;  %3213 = vst [vmem:[#allocation18 + $0x90] sm:$0xff] %v4927_v28 }
 0x928   :  { %v3062_v25 = vpop.f32.mrf.mxu1 }
 0x929   :  { %v3063_v37 = vadd.f32 %v4806_v33, %v3062_v25  ;;  %v4933_v61 = vadd.f32 %v4811_v40, %v3145_v21 }
 0x92a   :  { %v3064_v5 = vpop.f32.mrf.mxu1 }
 0x92b   :  { %v3146_v27 = vmul.f32 %v4808_v0, %v3063_v37  ;;  %3214 = vst [vmem:[#allocation18 + $0x98] sm:$0xff] %v4933_v61 }
 0x92c   :  { %v3067_v58 = vpop.f32.mrf.mxu1 }
 0x92d   :  { %v3068_v34 = vadd.f32 %v4806_v33, %v3067_v58  ;;  %v4939_v36 = vadd.f32 %v4811_v40, %v3146_v27 }
 0x92e   :  { %v3069_v39 = vpop.f32.mrf.mxu1 }
 0x92f   :  { %v3147_v41 = vmul.f32 %v4808_v0, %v3068_v34  ;;  %3215 = vst [vmem:[#allocation18 + $0xa0] sm:$0xff] %v4939_v36 }
 0x930   :  { %v3072_v60 = vpop.f32.mrf.mxu1 }
 0x931   :  { %v3073_v48 = vadd.f32 %v4806_v33, %v3072_v60  ;;  %v4945_v49 = vadd.f32 %v4811_v40, %v3147_v41 }
 0x932   :  { %v3074_v29 = vpop.f32.mrf.mxu1 }
 0x933   :  { %v3148_v42 = vmul.f32 %v4808_v0, %v3073_v48  ;;  %3216 = vst [vmem:[#allocation18 + $0xa8] sm:$0xff] %v4945_v49 }
 0x934   :  { %v3077_v51 = vpop.f32.mrf.mxu1 }
 0x935   :  { %v3078_v57 = vadd.f32 %v4806_v33, %v3077_v51  ;;  %v4951_v1 = vadd.f32 %v4811_v40, %v3148_v42 }
 0x936   :  { %v3079_v54 = vpop.f32.mrf.mxu1 }
 0x937   :  { %v3149_v55 = vmul.f32 %v4808_v0, %v3078_v57  ;;  %3217 = vst [vmem:[#allocation18 + $0xb0] sm:$0xff] %v4951_v1 }
 0x938   :  { %v3082_v56 = vpop.f32.mrf.mxu1 }
 0x939   :  { %v3083_v32 = vadd.f32 %v4806_v33, %v3082_v56  ;;  %v4957_v59 = vadd.f32 %v4811_v40, %v3149_v55 }
 0x93a   :  { %v3084_v30 = vpop.f32.mrf.mxu1 }
 0x93b   :  { %v3150_v15 = vmul.f32 %v4808_v0, %v3083_v32  ;;  %3218 = vst [vmem:[#allocation18 + $0xb8] sm:$0xff] %v4957_v59 }
 0x93c   :  { %v3087_v47 = vpop.f32.mrf.mxu1 }
 0x93d   :  { %v3088_v9 = vadd.f32 %v4806_v33, %v3087_v47  ;;  %v3187_v10 = vadd.f32 %v4811_v40, %v3150_v15 }
 0x93e   :  { %v3089_v45 = vpop.f32.mrf.mxu1 }
 0x93f   :  { %v3151_v12 = vmul.f32 %v4808_v0, %v3088_v9  ;;  %3219 = vst [vmem:[#allocation18 + $0xc0] sm:$0xff] %v3187_v10 }
 0x940   :  { %v3092_v50 = vpop.f32.mrf.mxu1 }
 0x941   :  { %v3093_v19 = vadd.f32 %v4806_v33, %v3092_v50  ;;  %v3188_v4 = vadd.f32 %v4811_v40, %v3151_v12 }
 0x942   :  { %v3094_v16 = vpop.f32.mrf.mxu1 }
 0x943   :  { %v3152_v24 = vmul.f32 %v4808_v0, %v3093_v19  ;;  %3220 = vst [vmem:[#allocation18 + $0xc8] sm:$0xff] %v3188_v4 }
 0x944   :  { %v3097_v6 = vpop.f32.mrf.mxu1 }
 0x945   :  { %v3098_v38 = vadd.f32 %v4806_v33, %v3097_v6  ;;  %v3189_v17 = vadd.f32 %v4811_v40, %v3152_v24 }
 0x946   :  { %v3099_v63 = vpop.f32.mrf.mxu1 }
 0x947   :  { %v3153_v18 = vmul.f32 %v4808_v0, %v3098_v38  ;;  %3221 = vst [vmem:[#allocation18 + $0xd0] sm:$0xff] %v3189_v17 }
 0x948   :  { %v3102_v22 = vpop.f32.mrf.mxu1 }
 0x949   :  { %v3103_v21 = vadd.f32 %v4806_v33, %v3102_v22  ;;  %v3190_v25 = vadd.f32 %v4811_v40, %v3153_v18 }
 0x94a   :  { %v3104_v37 = vpop.f32.mrf.mxu1 }
 0x94b   :  { %v3154_v5 = vmul.f32 %v4808_v0, %v3103_v21  ;;  %3222 = vst [vmem:[#allocation18 + $0xd8] sm:$0xff] %v3190_v25 }
 0x94c   :  { %v3107_v27 = vpop.f32.mrf.mxu1 }
 0x94d   :  { %v3108_v58 = vadd.f32 %v4806_v33, %v3107_v27  ;;  %v3191_v34 = vadd.f32 %v4811_v40, %v3154_v5 }
 0x94e   :  { %v3109_v39 = vpop.f32.mrf.mxu1 }
 0x94f   :  { %v3155_v41 = vmul.f32 %v4808_v0, %v3108_v58  ;;  %3223 = vst [vmem:[#allocation18 + $0xe0] sm:$0xff] %v3191_v34 }
 0x950   :  { %v3112_v60 = vpop.f32.mrf.mxu1 }
 0x951   :  { %v3113_v48 = vadd.f32 %v4806_v33, %v3112_v60  ;;  %v3192_v29 = vadd.f32 %v4811_v40, %v3155_v41 }
 0x952   :  { %v3114_v42 = vpop.f32.mrf.mxu1 }
 0x953   :  { %v3156_v51 = vmul.f32 %v4808_v0, %v3113_v48  ;;  %3224 = vst [vmem:[#allocation18 + $0xe8] sm:$0xff] %v3192_v29 }
 0x954   :  { %v3117_v57 = vpop.f32.mrf.mxu1 }
 0x955   :  { %v3118_v54 = vadd.f32 %v4806_v33, %v3117_v57  ;;  %v3193_v55 = vadd.f32 %v4811_v40, %v3156_v51  ;;  %v3227_v33 = vld [vmem:[%s5028_s9] sm:$0xff] }
 0x956   :  { %v3119_v56 = vpop.f32.mrf.mxu1 }
 0x957   :  { %v3157_v32 = vmul.f32 %v4808_v0, %v3118_v54  ;;  %3225 = vst [vmem:[#allocation18 + $0xf0] sm:$0xff] %v3193_v55 }
 0x959   :  { %v3194_v30 = vadd.f32 %v4811_v40, %v3157_v32 }
 0x95b   :  { %3226 = vst [vmem:[#allocation18 + $0xf8] sm:$0xff] %v3194_v30  ;;  %3344 = vmatprep.subr.mxu0 %v3194_v30 }
 0x95c   :  { %3345 = vmatpush3.msra.mxu0 %v4908_v11 }
 0x95d   :  { %3346 = vmatprep.subr.mxu0 %v3193_v55 }
 0x95e   :  { %3347 = vmatpush3.msra.mxu0 %v4902_v62 }
 0x95f   :  { %3348 = vmatprep.subr.mxu0 %v3192_v29 }
 0x960   :  { %3349 = vmatpush3.msra.mxu0 %v4896_v26 }
 0x961   :  { %3350 = vmatprep.subr.mxu0 %v3191_v34 }
 0x962   :  { %3351 = vmatpush3.msra.mxu0 %v4890_v14 }
 0x963   :  { %3352 = vmatprep.subr.mxu0 %v3190_v25 }
 0x964   :  { %3353 = vmatpush3.msra.mxu0 %v4884_v46 }
 0x965   :  { %3354 = vmatprep.subr.mxu0 %v3189_v17 }
 0x966   :  { %3355 = vmatpush3.msra.mxu0 %v4878_v35 }
 0x967   :  { %3356 = vmatprep.subr.mxu0 %v3188_v4 }
 0x968   :  { %3357 = vmatpush3.msra.mxu0 %v4872_v2 }
 0x969   :  { %3358 = vmatprep.subr.mxu0 %v3187_v10 }
 0x96a   :  { %3359 = vmatpush3.msra.mxu0 %v4866_v20 }
 0x96b   :  { %3360 = vmatprep.subr.mxu0 %v4957_v59 }
 0x96c   :  { %3361 = vmatpush3.msra.mxu0 %v4857_v8 }
 0x96d   :  { %3362 = vmatprep.subr.mxu0 %v4951_v1 }
 0x96e   :  { %3363 = vmatpush3.msra.mxu0 %v4851_v13 }
 0x96f   :  { %3364 = vmatprep.subr.mxu0 %v4945_v49 }
 0x970   :  { %3365 = vmatpush3.msra.mxu0 %v4845_v52 }
 0x971   :  { %3366 = vmatprep.subr.mxu0 %v4939_v36 }
 0x972   :  { %3367 = vmatpush3.msra.mxu0 %v4839_v43 }
 0x973   :  { %3368 = vmatprep.subr.mxu0 %v4933_v61 }
 0x974   :  { %3369 = vmatpush3.msra.mxu0 %v4833_v44 }
 0x975   :  { %3370 = vmatprep.subr.mxu0 %v4927_v28 }
 0x976   :  { %3371 = vmatpush3.msra.mxu0 %v4827_v3 }
 0x977   :  { %3372 = vmatprep.subr.mxu0 %v4921_v23 }
 0x978   :  { %3373 = vmatpush3.msra.mxu0 %v4821_v53 }
 0x979   :  { %3374 = vmatprep.subr.mxu0 %v4915_v7 }
 0x97a   :  { %3375 = vmatpush3.msra.mxu0 %v4815_v31 }
 0x97b   :  { %3294 = vmatmul.mubr.f32.vlgmr.msra.gmra.mxu0 %v3227_v33 }
 0x97c   :  { %3776 = shalt.err (!%p3773_p7)
}
 0x97d   :  { %3321 = dma.vmem_to_hbm [thread:$0]  %s3316_s24, 4096, %s5030_s11, [#allocation19], %s3825_s14, %s3825_s14, %s3826_s15  }
 0x97e   :  { %s3834_s7 = smov [#allocation17]  }
 0x97f   :  { %s3306_s26 = sshll.u32 %s3834_s7, 4  ;;  %s3307_s26 = int_to_ptr.vmem [resolvable:$true] %s3306_s26 }
 0x980   :  { %s3785_s27 = scalar_lea.vmem %s3307_s26, 128  ;;  %p3790_p9 = scmp.lt.s32.totalorder %s3307_s26, %s3307_s26 }
 0x981   :  { %p3786_p8 = scmp.ne.s32.totalorder %s3307_s26, %s3785_s27  ;;  %p3791_p10 = scmp.lt.s32.totalorder %s3785_s27, %s3785_s27 }
 0x983   :  { %p3792_p11 = por %p3791_p10, %p3790_p9 }
 0x985   :  { %p3793_p12 = pnand %p3792_p11, %p3786_p8 }
 0xa3b   :  { %v3376_v0 = vpop.f32.mrf.mxu0 }
 0xa3d   :  { %v3377_v40 = vpop.f32.mrf.mxu0 }
 0xa3e   :  { %v3378_v31 = vadd.f32 %v3377_v40, %v3376_v0 }
 0xa40   :  { %3299 = vst [vmem:[#allocation17] sm:$0xff] %v3378_v31 }
 0xa41   :  { %3796 = shalt.err (!%p3793_p12)
}
 0xa42   :  { %3309 = dma.vmem_to_hbm [thread:$0]  %s3307_s26, 128, %s5029_s10, [#allocation4]  }
 0xa43   :  { %3815 = dma.done.wait [#allocation4], 128  }
 0xa44   :  { %3816 = vsyncadd [#allocation4], 4294967168 }
 0xa45   :  { %3817 = dma.done.wait [#allocation19], 4096  }
 0xa46   :  { %3818 = vsyncadd [#allocation19], 4294963200 }
 0xa47   :  { %3328 = vsyncpa [#allocation3], 1 }
 0xa48   :  { %3329 = vsyncpa [#allocation6], 1 }
 0xa49   :  { %3330 = vsyncpa [#allocation9], 1 }
 0xa4a   :  { %3331 = vsyncpa [#allocation12], 1 }
 0xa4b   :  { %3332 = vsyncpa [#allocation15], 1 }
 0xa4c   :  { %3333 = vsyncpa [#allocation4], 1 }
 0xa4d   :  { %3334 = vsyncpa [#allocation19], 1 }

</bundles_post_ra>
